<compile_context>
chip_gen: v7x
topology: tpu7x:2x2x1
jax: 0.10.0
libtpu: 0.0.40
codegen_flags: <defaults>
</compile_context>

<pallas_src>
import functools

import jax
import jax.numpy as jnp
from jax.experimental import pallas as pl
from jax.experimental.pallas import tpu as pltpu

LEAKY_SLOPE = 0.2
BN_EPS = 1e-5


def _round_up(x, m):
    return (x + m - 1) // m * m


def _pick_tile(n, prefs=(2048, 1024, 512, 256, 128, 64, 32, 16, 8)):
    for t in prefs:
        if t <= n and n % t == 0:
            return t
    return n


# ----------------------- GEMM + bias/LeakyReLU/BN-stats --------------------- #

def _gemm_kernel(a_ref, w_ref, *rest, leaky, has_bias, emit_stats):
    """acc(f32) += A(bf16) @ W(bf16); epilogue at the last k step:
    optional bias + LeakyReLU, bf16 store, optional per-block BN sum/sumsq."""
    if has_bias:
        b_ref, rest = rest[0], rest[1:]
    if emit_stats:
        o_ref, stats_ref, acc_ref = rest
    else:
        o_ref, acc_ref = rest

    k = pl.program_id(2)

    @pl.when(k == 0)
    def _():
        acc_ref[...] = jnp.zeros_like(acc_ref)

    acc_ref[...] += jnp.dot(a_ref[...], w_ref[...],
                            preferred_element_type=jnp.float32)

    @pl.when(k == pl.num_programs(2) - 1)
    def _():
        acc = acc_ref[...]
        if has_bias:
            acc = acc + b_ref[...]
        if leaky:
            acc = jnp.where(acc >= 0.0, acc, LEAKY_SLOPE * acc)
        o_ref[...] = acc.astype(o_ref.dtype)
        if emit_stats:
            # Per-(row-block) partial BN statistics from the f32 accumulator.
            # Zero-padded A rows contribute exactly 0 (no bias / no activation
            # on BN layers), so the wrapper just divides by the true M.
            row_s = jnp.sum(acc, axis=0, keepdims=True)            # (1, tn)
            row_sq = jnp.sum(acc * acc, axis=0, keepdims=True)     # (1, tn)
            stats_ref[0:1, 0:1, :] = row_s[None]
            stats_ref[0:1, 1:2, :] = row_sq[None]


def gemm_fused(a, w, b=None, *, leaky, emit_stats=False, tm=512, tk=1024):
    """act(A @ W + b); A:(M,K) bf16, W:(K,N) -> padded (Mp, Np) bf16 output
    (+ optional (ni, 2, Np) f32 BN partial stats).

    Full-N output tiles: the patch matrix A is read from HBM exactly once.
    With the j grid collapsed, megacore parallelism comes from the M axis
    (Mp/tm blocks >= 2 at production sizes; a single block at toy sizes).
    """
    M, K = a.shape
    Kw, N = w.shape
    assert K == Kw and a.dtype == jnp.bfloat16
    Np = tn = _round_up(N, 128)              # lane-dense, full-N tile (<= 512 here)
    tm = min(tm, _round_up(M, 16))           # bf16 sublane granule
    Mp = _round_up(M, tm)
    if K < 128:                              # conv1: full-K block, no zero-pad of K
        tk = K
        Kp = K
    else:
        tk = min(tk, _round_up(K, 128))
        Kp = _round_up(K, tk)

    a_p = a if (Mp == M and Kp == K) else jnp.pad(a, ((0, Mp - M), (0, Kp - K)))
    w_p = jnp.pad(w.astype(jnp.bfloat16), ((0, Kp - K), (0, Np - N)))

    ni, nj, nk = Mp // tm, Np // tn, Kp // tk

    inputs = [a_p, w_p]
    in_specs = [
        pl.BlockSpec((tm, tk), lambda i, j, k: (i, k)),
        pl.BlockSpec((tk, tn), lambda i, j, k: (k, j)),
    ]
    has_bias = b is not None
    if has_bias:
        b_p = jnp.pad(b.astype(jnp.float32), (0, Np - N)).reshape(1, Np)
        inputs.append(b_p)
        in_specs.append(pl.BlockSpec((1, tn), lambda i, j, k: (0, j)))

    out_shapes = [jax.ShapeDtypeStruct((Mp, Np), jnp.bfloat16)]
    out_specs = [pl.BlockSpec((tm, tn), lambda i, j, k: (i, j))]
    if emit_stats:
        out_shapes.append(jax.ShapeDtypeStruct((ni, 2, Np), jnp.float32))
        out_specs.append(pl.BlockSpec((1, 2, tn), lambda i, j, k: (i, 0, j)))

    res = pl.pallas_call(
        functools.partial(_gemm_kernel, leaky=leaky, has_bias=has_bias,
                          emit_stats=emit_stats),
        out_shape=tuple(out_shapes) if emit_stats else out_shapes[0],
        grid_spec=pltpu.PrefetchScalarGridSpec(
            num_scalar_prefetch=0,
            grid=(ni, nj, nk),
            in_specs=in_specs,
            out_specs=tuple(out_specs) if emit_stats else out_specs[0],
            scratch_shapes=[pltpu.VMEM((tm, tn), jnp.float32)]),
        compiler_params=pltpu.CompilerParams(
            dimension_semantics=("parallel", "parallel", "arbitrary")),
    )(*inputs)
    if emit_stats:
        return res[0], res[1]
    return res, None


# --------------------- BatchNorm finalize + normalize ----------------------- #

def _bn_scale_shift(stats, gamma, beta, m_true):
    """(ni, 2, Np) partial sums -> fused (scale, shift) rows, (2, C) f32.
    Training-mode (biased) batch variance, matching nn.BatchNorm2d in .train()."""
    C = gamma.shape[0]
    tot = jnp.sum(stats, axis=0)                               # (2, Np)
    mean = tot[0, :C] / m_true
    var = jnp.maximum(tot[1, :C] / m_true - mean * mean, 0.0)
    scale = gamma.astype(jnp.float32) * jax.lax.rsqrt(var + BN_EPS)
    shift = beta.astype(jnp.float32) - mean * scale
    return jnp.stack([scale, shift], axis=0)                   # (2, C)


def _bn_norm_lrelu_kernel(x_ref, ss_ref, o_ref):
    x = x_ref[...].astype(jnp.float32)                         # math stays f32 (v5e)
    y = x * ss_ref[0:1, :] + ss_ref[1:2, :]
    o_ref[...] = jnp.where(y >= 0.0, y, LEAKY_SLOPE * y).astype(o_ref.dtype)


def bn_norm_lrelu(x_pad, ss):
    """y = x * scale + shift, LeakyReLU(0.2); bf16 in/out, tiled over rows."""
    Mp, C = x_pad.shape
    tm = _pick_tile(Mp)
    return pl.pallas_call(
        _bn_norm_lrelu_kernel,
        out_shape=jax.ShapeDtypeStruct((Mp, C), jnp.bfloat16),
        grid_spec=pltpu.PrefetchScalarGridSpec(
            num_scalar_prefetch=0,
            grid=(Mp // tm,),
            in_specs=[pl.BlockSpec((tm, C), lambda i: (i, 0)),
                      pl.BlockSpec((2, C), lambda i: (0, 0))],
            out_specs=pl.BlockSpec((tm, C), lambda i: (i, 0))),
        compiler_params=pltpu.CompilerParams(
            dimension_semantics=("parallel",)),
    )(x_pad, ss)


# ------------------------- final 512 -> 1 conv (matvec) --------------------- #

def _matvec_kernel(a_ref, w_ref, b_ref, o_ref, acc_ref):
    k = pl.program_id(1)

    @pl.when(k == 0)
    def _():
        acc_ref[...] = jnp.zeros_like(acc_ref)

    prod = a_ref[...].astype(jnp.float32) * w_ref[...].astype(jnp.float32)
    acc_ref[...] += jnp.sum(prod, axis=1, keepdims=True)

    @pl.when(k == pl.num_programs(1) - 1)
    def _():
        o_ref[...] = acc_ref[...] + b_ref[0]


def matvec_bias(a, w_row, bias, *, tm=512, tk=2048):
    """A(bf16, M x K) @ w(K,) + bias -> (M, 1) f32 via VPU multiply-reduce.
    Cout=1, so an MXU GEMM would waste 128x padded weight DMA / MXU work."""
    M, K = a.shape
    tm = min(tm, _round_up(M, 16))
    tk = min(tk, _round_up(K, 128))
    Mp, Kp = _round_up(M, tm), _round_up(K, tk)
    a_p = a if (Mp == M and Kp == K) else jnp.pad(a, ((0, Mp - M), (0, Kp - K)))
    w_p = jnp.pad(w_row.astype(jnp.bfloat16).reshape(1, K), ((0, 0), (0, Kp - K)))
    b = bias.astype(jnp.float32).reshape(1)

    out = pl.pallas_call(
        _matvec_kernel,
        out_shape=jax.ShapeDtypeStruct((Mp, 1), jnp.float32),
        grid_spec=pltpu.PrefetchScalarGridSpec(
            num_scalar_prefetch=0,
            grid=(Mp // tm, Kp // tk),
            in_specs=[pl.BlockSpec((tm, tk), lambda i, k: (i, k)),
                      pl.BlockSpec((1, tk), lambda i, k: (0, k)),
                      pl.BlockSpec(memory_space=pltpu.MemorySpace.SMEM)],
            out_specs=pl.BlockSpec((tm, 1), lambda i, k: (i, 0)),
            scratch_shapes=[pltpu.VMEM((tm, 1), jnp.float32)]),
        compiler_params=pltpu.CompilerParams(
            dimension_semantics=("parallel", "arbitrary")),
    )(a_p, w_p, b)
    return out[:M]


# ------------------------------- JAX glue ---------------------------------- #

def _reflect_pad_nhwc(x, pad=1):
    # PyTorch padding_mode='reflect' == jnp.pad mode='reflect' (edge not repeated)
    return jnp.pad(x, ((0, 0), (pad, pad), (pad, pad), (0, 0)), mode="reflect")


def _im2col_nhwc(xp, k, stride):
    """Padded NHWC (bf16) -> (N*OH*OW, k*k*C) patch matrix, column order (kh, kw, c)."""
    N, Hp, Wp, C = xp.shape
    OH = (Hp - k) // stride + 1
    OW = (Wp - k) // stride + 1
    cols = [xp[:, kh:kh + stride * OH:stride, kw:kw + stride * OW:stride, :]
            for kh in range(k) for kw in range(k)]
    p = jnp.concatenate(cols, axis=-1)                   # (N, OH, OW, k*k*C)
    return p.reshape(N * OH * OW, k * k * C), (N, OH, OW)


def _w_mat(w_pt):
    """PyTorch weight (Cout, Cin, kh, kw) -> (kh*kw*Cin, Cout), matching im2col columns."""
    cout = w_pt.shape[0]
    return jnp.transpose(w_pt, (2, 3, 1, 0)).reshape(-1, cout)


def discriminator_forward(params, x, y):
    # NCHW f32 interface (PyTorch) -> NHWC bf16 internal activations, once.
    h = jnp.concatenate([x, y], axis=1)
    h = jnp.transpose(h, (0, 2, 3, 1)).astype(jnp.bfloat16)

    # conv1 (in+1 -> 64, s=2, bias) + LeakyReLU fused in the GEMM epilogue.
    a, (n, oh, ow) = _im2col_nhwc(_reflect_pad_nhwc(h), 4, 2)
    o_pad, _ = gemm_fused(a, _w_mat(params["w1"]), params["b1"], leaky=True)
    h = o_pad[:a.shape[0], :64].reshape(n, oh, ow, 64)

    # CNNBlocks: conv(no bias) -> BatchNorm(batch stats) -> LeakyReLU.
    # BN sum/sumsq is fused into the GEMM epilogue; only normalize re-reads the
    # conv output (bf16).
    for idx, (cout, stride) in zip((2, 3, 4), ((128, 2), (256, 2), (512, 1))):
        a, (n, oh, ow) = _im2col_nhwc(_reflect_pad_nhwc(h), 4, stride)
        o_pad, stats = gemm_fused(a, _w_mat(params[f"w{idx}"]), None,
                                  leaky=False, emit_stats=True)
        ss = _bn_scale_shift(stats, params[f"gamma{idx}"], params[f"beta{idx}"],
                             a.shape[0])
        y_pad = bn_norm_lrelu(o_pad, ss)
        h = y_pad[:a.shape[0], :cout].reshape(n, oh, ow, cout)

    # final conv (512 -> 1, s=1, bias), no activation; back to NCHW at the boundary.
    a, (n, oh, ow) = _im2col_nhwc(_reflect_pad_nhwc(h), 4, 1)
    o = matvec_bias(a, _w_mat(params["w5"]).reshape(-1), params["b5"])
    return jnp.transpose(o.reshape(n, oh, ow, 1), (0, 3, 1, 2)).astype(jnp.float32)


def init_params(key, in_channels=3):
    ks = jax.random.split(key, 8)

    def conv_w(k, cout, cin):
        return jax.random.normal(k, (cout, cin, 4, 4), jnp.float32) * 0.05

    p = {}
    p["w1"] = conv_w(ks[0], 64, in_channels + 1)
    p["b1"] = jax.random.normal(ks[1], (64,), jnp.float32) * 0.05
    p["w2"] = conv_w(ks[2], 128, 64)
    p["gamma2"] = jnp.ones((128,), jnp.float32)
    p["beta2"] = jnp.zeros((128,), jnp.float32)
    p["w3"] = conv_w(ks[3], 256, 128)
    p["gamma3"] = jnp.ones((256,), jnp.float32)
    p["beta3"] = jnp.zeros((256,), jnp.float32)
    p["w4"] = conv_w(ks[4], 512, 256)
    p["gamma4"] = jnp.ones((512,), jnp.float32)
    p["beta4"] = jnp.zeros((512,), jnp.float32)
    p["w5"] = conv_w(ks[5], 1, 512)
    p["b5"] = jax.random.normal(ks[6], (1,), jnp.float32) * 0.05
    return p


if __name__ == "__main__":
    key = jax.random.PRNGKey(0)
    kp, kx, ky = jax.random.split(key, 3)
    params = init_params(kp, in_channels=3)

    # Spatial 32 keeps reflect padding valid through all 5 convs
    # (32 -> 16 -> 8 -> 4 -> 3 -> 2).
    x = jax.random.normal(kx, (2, 3, 32, 32), jnp.float32)  # image, NCHW
    y = jax.random.normal(ky, (2, 1, 32, 32), jnp.float32)  # conditioning map, NCHW

    fwd = jax.jit(functools.partial(discriminator_forward, params))
    out = jax.block_until_ready(fwd(x, y))
    assert out.shape == (2, 1, 2, 2), out.shape
    assert out.dtype == jnp.float32
    print("KERNEL_OK")
</pallas_src>

<mosaic_0001>
module attributes {stable_mosaic.version = 11 : i64} {
  func.func @_gemm_kernel(%arg0: i32, %arg1: i32, %arg2: i32, %arg3: memref<512x64xbf16, #tpu.memory_space<vmem>>, %arg4: memref<64x128xbf16, #tpu.memory_space<vmem>>, %arg5: memref<1x128xf32, #tpu.memory_space<vmem>>, %arg6: memref<512x128xbf16, #tpu.memory_space<vmem>>, %arg7: memref<512x128xf32, #tpu.memory_space<vmem>>) attributes {dimension_semantics = [#tpu.dimension_semantics<parallel>, #tpu.dimension_semantics<parallel>, #tpu.dimension_semantics<arbitrary>], iteration_bounds = array<i64: 1, 1, 1>, scalar_prefetch = 0 : i64, scratch_operands = 1 : i64, tpu.core_type = #tpu.core_type<tc>, window_params = [{transform_indices = @transform_0, window_bounds = array<i64: 512, 64>}, {transform_indices = @transform_1, window_bounds = array<i64: 64, 128>}, {transform_indices = @transform_2, window_bounds = array<i64: 1, 128>}, {transform_indices = @transform_3, window_bounds = array<i64: 512, 128>}]} {
    %c0_i32 = arith.constant 0 : i32
    %0 = arith.cmpi eq, %arg2, %c0_i32 : i32
    %1 = arith.extui %0 : i1 to i32
    %c0_i32_0 = arith.constant 0 : i32
    %2 = arith.cmpi ne, %1, %c0_i32_0 : i32
    scf.if %2 {
      %cst_10 = arith.constant 0.000000e+00 : f32
      %12 = vector.broadcast %cst_10 : f32 to vector<512x128xf32>
      %c0_11 = arith.constant 0 : index
      %c0_12 = arith.constant 0 : index
      %13 = vector.load %arg7[%c0_11, %c0_12] : memref<512x128xf32, #tpu.memory_space<vmem>>, vector<512x128xf32>
      tpu.vector_store %arg7[%c0_11, %c0_12], %12 {strides = array<i32>} : memref<512x128xf32, #tpu.memory_space<vmem>>, vector<512x128xf32>,
    } else {
    }
    %c0 = arith.constant 0 : index
    %c0_1 = arith.constant 0 : index
    %3 = vector.load %arg7[%c0, %c0_1] : memref<512x128xf32, #tpu.memory_space<vmem>>, vector<512x128xf32>
    %c0_2 = arith.constant 0 : index
    %c0_3 = arith.constant 0 : index
    %4 = vector.load %arg3[%c0_2, %c0_3] : memref<512x64xbf16, #tpu.memory_space<vmem>>, vector<512x64xbf16>
    %c0_4 = arith.constant 0 : index
    %c0_5 = arith.constant 0 : index
    %5 = vector.load %arg4[%c0_4, %c0_5] : memref<64x128xbf16, #tpu.memory_space<vmem>>, vector<64x128xbf16>
    %cst = arith.constant dense<0.000000e+00> : vector<512x128xf32>
    %6 = tpu.matmul %4, %5, %cst {dimension_numbers = #tpu.dot_dimension_numbers<[1], [0], [0], [1], [0, 0, 1, 1], [], []>} : vector<512x64xbf16>, vector<64x128xbf16>, vector<512x128xf32> -> vector<512x128xf32>
    %7 = arith.addf %3, %6 : vector<512x128xf32>
    %c0_6 = arith.constant 0 : index
    %c0_7 = arith.constant 0 : index
    %8 = vector.load %arg7[%c0_6, %c0_7] : memref<512x128xf32, #tpu.memory_space<vmem>>, vector<512x128xf32>
    tpu.vector_store %arg7[%c0_6, %c0_7], %7 {strides = array<i32>} : memref<512x128xf32, #tpu.memory_space<vmem>>, vector<512x128xf32>,
    %c0_i32_8 = arith.constant 0 : i32
    %9 = arith.cmpi eq, %arg2, %c0_i32_8 : i32
    %10 = arith.extui %9 : i1 to i32
    %c0_i32_9 = arith.constant 0 : i32
    %11 = arith.cmpi ne, %10, %c0_i32_9 : i32
    scf.if %11 {
      %c0_10 = arith.constant 0 : index
      %c0_11 = arith.constant 0 : index
      %12 = vector.load %arg7[%c0_10, %c0_11] : memref<512x128xf32, #tpu.memory_space<vmem>>, vector<512x128xf32>
      %c0_12 = arith.constant 0 : index
      %c0_13 = arith.constant 0 : index
      %13 = vector.load %arg5[%c0_12, %c0_13] : memref<1x128xf32, #tpu.memory_space<vmem>>, vector<1x128xf32>
      %14 = vector.broadcast %13 : vector<1x128xf32> to vector<512x128xf32>
      %15 = arith.addf %12, %14 : vector<512x128xf32>
      %cst_14 = arith.constant 0.000000e+00 : f32
      %16 = vector.broadcast %cst_14 : f32 to vector<512x128xf32>
      %17 = arith.cmpf oge, %15, %16 : vector<512x128xf32>
      %cst_15 = arith.constant 2.000000e-01 : f32
      %18 = vector.broadcast %cst_15 : f32 to vector<512x128xf32>
      %19 = arith.mulf %18, %15 : vector<512x128xf32>
      %20 = arith.select %17, %15, %19 : vector<512x128xi1>, vector<512x128xf32>
      %21 = arith.truncf %20 : vector<512x128xf32> to vector<512x128xbf16>
      %c0_16 = arith.constant 0 : index
      %c0_17 = arith.constant 0 : index
      %22 = vector.load %arg6[%c0_16, %c0_17] : memref<512x128xbf16, #tpu.memory_space<vmem>>, vector<512x128xbf16>
      tpu.vector_store %arg6[%c0_16, %c0_17], %21 {strides = array<i32>} : memref<512x128xbf16, #tpu.memory_space<vmem>>, vector<512x128xbf16>,
    } else {
    }
    return
  }
  func.func @transform_0(%arg0: i32, %arg1: i32, %arg2: i32) -> (i32, i32) {
    %c0_i32 = arith.constant 0 : i32
    return %arg0, %arg2 : i32, i32
  }
  func.func @transform_1(%arg0: i32, %arg1: i32, %arg2: i32) -> (i32, i32) {
    %c0_i32 = arith.constant 0 : i32
    return %arg2, %arg1 : i32, i32
  }
  func.func @transform_2(%arg0: i32, %arg1: i32, %arg2: i32) -> (i32, i32) {
    %c0_i32 = arith.constant 0 : i32
    %c0_i32_0 = arith.constant 0 : i32
    return %c0_i32, %arg1 : i32, i32
  }
  func.func @transform_3(%arg0: i32, %arg1: i32, %arg2: i32) -> (i32, i32) {
    %c0_i32 = arith.constant 0 : i32
    return %arg0, %arg1 : i32, i32
  }
}

module attributes {stable_mosaic.version = 11 : i64} {
  func.func @_gemm_kernel(%arg0: i32, %arg1: i32, %arg2: i32, %arg3: memref<128x1024xbf16, #tpu.memory_space<vmem>>, %arg4: memref<1024x128xbf16, #tpu.memory_space<vmem>>, %arg5: memref<128x128xbf16, #tpu.memory_space<vmem>>, %arg6: memref<1x2x128xf32, #tpu.memory_space<vmem>>, %arg7: memref<128x128xf32, #tpu.memory_space<vmem>>) attributes {dimension_semantics = [#tpu.dimension_semantics<parallel>, #tpu.dimension_semantics<parallel>, #tpu.dimension_semantics<arbitrary>], iteration_bounds = array<i64: 1, 1, 1>, scalar_prefetch = 0 : i64, scratch_operands = 1 : i64, tpu.core_type = #tpu.core_type<tc>, window_params = [{transform_indices = @transform_0, window_bounds = array<i64: 128, 1024>}, {transform_indices = @transform_1, window_bounds = array<i64: 1024, 128>}, {transform_indices = @transform_2, window_bounds = array<i64: 128, 128>}, {transform_indices = @transform_3, window_bounds = array<i64: 1, 2, 128>}]} {
    %c0_i32 = arith.constant 0 : i32
    %0 = arith.cmpi eq, %arg2, %c0_i32 : i32
    %1 = arith.extui %0 : i1 to i32
    %c0_i32_0 = arith.constant 0 : i32
    %2 = arith.cmpi ne, %1, %c0_i32_0 : i32
    scf.if %2 {
      %cst_10 = arith.constant 0.000000e+00 : f32
      %12 = vector.broadcast %cst_10 : f32 to vector<128x128xf32>
      %c0_11 = arith.constant 0 : index
      %c0_12 = arith.constant 0 : index
      %13 = vector.load %arg7[%c0_11, %c0_12] : memref<128x128xf32, #tpu.memory_space<vmem>>, vector<128x128xf32>
      tpu.vector_store %arg7[%c0_11, %c0_12], %12 {strides = array<i32>} : memref<128x128xf32, #tpu.memory_space<vmem>>, vector<128x128xf32>,
    } else {
    }
    %c0 = arith.constant 0 : index
    %c0_1 = arith.constant 0 : index
    %3 = vector.load %arg7[%c0, %c0_1] : memref<128x128xf32, #tpu.memory_space<vmem>>, vector<128x128xf32>
    %c0_2 = arith.constant 0 : index
    %c0_3 = arith.constant 0 : index
    %4 = vector.load %arg3[%c0_2, %c0_3] : memref<128x1024xbf16, #tpu.memory_space<vmem>>, vector<128x1024xbf16>
    %c0_4 = arith.constant 0 : index
    %c0_5 = arith.constant 0 : index
    %5 = vector.load %arg4[%c0_4, %c0_5] : memref<1024x128xbf16, #tpu.memory_space<vmem>>, vector<1024x128xbf16>
    %cst = arith.constant dense<0.000000e+00> : vector<128x128xf32>
    %6 = tpu.matmul %4, %5, %cst {dimension_numbers = #tpu.dot_dimension_numbers<[1], [0], [0], [1], [0, 0, 1, 1], [], []>} : vector<128x1024xbf16>, vector<1024x128xbf16>, vector<128x128xf32> -> vector<128x128xf32>
    %7 = arith.addf %3, %6 : vector<128x128xf32>
    %c0_6 = arith.constant 0 : index
    %c0_7 = arith.constant 0 : index
    %8 = vector.load %arg7[%c0_6, %c0_7] : memref<128x128xf32, #tpu.memory_space<vmem>>, vector<128x128xf32>
    tpu.vector_store %arg7[%c0_6, %c0_7], %7 {strides = array<i32>} : memref<128x128xf32, #tpu.memory_space<vmem>>, vector<128x128xf32>,
    %c0_i32_8 = arith.constant 0 : i32
    %9 = arith.cmpi eq, %arg2, %c0_i32_8 : i32
    %10 = arith.extui %9 : i1 to i32
    %c0_i32_9 = arith.constant 0 : i32
    %11 = arith.cmpi ne, %10, %c0_i32_9 : i32
    scf.if %11 {
      %c0_10 = arith.constant 0 : index
      %c0_11 = arith.constant 0 : index
      %12 = vector.load %arg7[%c0_10, %c0_11] : memref<128x128xf32, #tpu.memory_space<vmem>>, vector<128x128xf32>
      %13 = arith.truncf %12 : vector<128x128xf32> to vector<128x128xbf16>
      %c0_12 = arith.constant 0 : index
      %c0_13 = arith.constant 0 : index
      %14 = vector.load %arg5[%c0_12, %c0_13] : memref<128x128xbf16, #tpu.memory_space<vmem>>, vector<128x128xbf16>
      tpu.vector_store %arg5[%c0_12, %c0_13], %13 {strides = array<i32>} : memref<128x128xbf16, #tpu.memory_space<vmem>>, vector<128x128xbf16>,
      %cst_14 = arith.constant dense<0.000000e+00> : vector<128xf32>
      %15 = vector.multi_reduction <add>, %12, %cst_14 [0] : vector<128x128xf32> to vector<128xf32>
      %16 = vector.shape_cast %15 : vector<128xf32> to vector<1x128xf32>
      %17 = arith.mulf %12, %12 : vector<128x128xf32>
      %cst_15 = arith.constant dense<0.000000e+00> : vector<128xf32>
      %18 = vector.multi_reduction <add>, %17, %cst_15 [0] : vector<128x128xf32> to vector<128xf32>
      %19 = vector.shape_cast %18 : vector<128xf32> to vector<1x128xf32>
      %20 = vector.shape_cast %16 : vector<1x128xf32> to vector<1x1x128xf32>
      %c0_16 = arith.constant 0 : index
      %c0_17 = arith.constant 0 : index
      %c0_18 = arith.constant 0 : index
      %21 = vector.load %arg6[%c0_16, %c0_17, %c0_18] : memref<1x2x128xf32, #tpu.memory_space<vmem>>, vector<1x1x128xf32>
      tpu.vector_store %arg6[%c0_16, %c0_17, %c0_18], %20 {strides = array<i32>} : memref<1x2x128xf32, #tpu.memory_space<vmem>>, vector<1x1x128xf32>,
      %22 = vector.shape_cast %19 : vector<1x128xf32> to vector<1x1x128xf32>
      %c0_19 = arith.constant 0 : index
      %c1 = arith.constant 1 : index
      %c0_20 = arith.constant 0 : index
      %23 = vector.load %arg6[%c0_19, %c1, %c0_20] : memref<1x2x128xf32, #tpu.memory_space<vmem>>, vector<1x1x128xf32>
      tpu.vector_store %arg6[%c0_19, %c1, %c0_20], %22 {strides = array<i32>} : memref<1x2x128xf32, #tpu.memory_space<vmem>>, vector<1x1x128xf32>,
    } else {
    }
    return
  }
  func.func @transform_0(%arg0: i32, %arg1: i32, %arg2: i32) -> (i32, i32) {
    %c0_i32 = arith.constant 0 : i32
    return %arg0, %arg2 : i32, i32
  }
  func.func @transform_1(%arg0: i32, %arg1: i32, %arg2: i32) -> (i32, i32) {
    %c0_i32 = arith.constant 0 : i32
    return %arg2, %arg1 : i32, i32
  }
  func.func @transform_2(%arg0: i32, %arg1: i32, %arg2: i32) -> (i32, i32) {
    %c0_i32 = arith.constant 0 : i32
    return %arg0, %arg1 : i32, i32
  }
  func.func @transform_3(%arg0: i32, %arg1: i32, %arg2: i32) -> (i32, i32, i32) {
    %c0_i32 = arith.constant 0 : i32
    %c0_i32_0 = arith.constant 0 : i32
    return %arg0, %c0_i32, %arg1 : i32, i32, i32
  }
}

module attributes {stable_mosaic.version = 11 : i64} {
  func.func @_bn_norm_lrelu_kernel(%arg0: i32, %arg1: memref<128x128xbf16, #tpu.memory_space<vmem>>, %arg2: memref<2x128xf32, #tpu.memory_space<vmem>>, %arg3: memref<128x128xbf16, #tpu.memory_space<vmem>>) attributes {dimension_semantics = [#tpu.dimension_semantics<parallel>], iteration_bounds = array<i64: 1>, scalar_prefetch = 0 : i64, scratch_operands = 0 : i64, tpu.core_type = #tpu.core_type<tc>, window_params = [{transform_indices = @transform_0, window_bounds = array<i64: 128, 128>}, {pipeline_mode = #tpu.pipeline_mode<synchronous>, transform_indices = @transform_1, window_bounds = array<i64: 2, 128>}, {transform_indices = @transform_2, window_bounds = array<i64: 128, 128>}]} {
    %c0 = arith.constant 0 : index
    %c0_0 = arith.constant 0 : index
    %0 = vector.load %arg1[%c0, %c0_0] : memref<128x128xbf16, #tpu.memory_space<vmem>>, vector<128x128xbf16>
    %1 = arith.extf %0 : vector<128x128xbf16> to vector<128x128xf32>
    %c0_1 = arith.constant 0 : index
    %c0_2 = arith.constant 0 : index
    %2 = vector.load %arg2[%c0_1, %c0_2] : memref<2x128xf32, #tpu.memory_space<vmem>>, vector<1x128xf32>
    %3 = vector.broadcast %2 : vector<1x128xf32> to vector<128x128xf32>
    %4 = arith.mulf %1, %3 : vector<128x128xf32>
    %c1 = arith.constant 1 : index
    %c0_3 = arith.constant 0 : index
    %5 = vector.load %arg2[%c1, %c0_3] : memref<2x128xf32, #tpu.memory_space<vmem>>, vector<1x128xf32>
    %6 = vector.broadcast %5 : vector<1x128xf32> to vector<128x128xf32>
    %7 = arith.addf %4, %6 : vector<128x128xf32>
    %cst = arith.constant 0.000000e+00 : f32
    %8 = vector.broadcast %cst : f32 to vector<128x128xf32>
    %9 = arith.cmpf oge, %7, %8 : vector<128x128xf32>
    %cst_4 = arith.constant 2.000000e-01 : f32
    %10 = vector.broadcast %cst_4 : f32 to vector<128x128xf32>
    %11 = arith.mulf %10, %7 : vector<128x128xf32>
    %12 = arith.select %9, %7, %11 : vector<128x128xi1>, vector<128x128xf32>
    %13 = arith.truncf %12 : vector<128x128xf32> to vector<128x128xbf16>
    %c0_5 = arith.constant 0 : index
    %c0_6 = arith.constant 0 : index
    %14 = vector.load %arg3[%c0_5, %c0_6] : memref<128x128xbf16, #tpu.memory_space<vmem>>, vector<128x128xbf16>
    tpu.vector_store %arg3[%c0_5, %c0_6], %13 {strides = array<i32>} : memref<128x128xbf16, #tpu.memory_space<vmem>>, vector<128x128xbf16>,
    return
  }
  func.func @transform_0(%arg0: i32) -> (i32, i32) {
    %c0_i32 = arith.constant 0 : i32
    %c0_i32_0 = arith.constant 0 : i32
    return %arg0, %c0_i32 : i32, i32
  }
  func.func @transform_1(%arg0: i32) -> (i32, i32) {
    %c0_i32 = arith.constant 0 : i32
    %c0_i32_0 = arith.constant 0 : i32
    %c0_i32_1 = arith.constant 0 : i32
    return %c0_i32, %c0_i32_0 : i32, i32
  }
  func.func @transform_2(%arg0: i32) -> (i32, i32) {
    %c0_i32 = arith.constant 0 : i32
    %c0_i32_0 = arith.constant 0 : i32
    return %arg0, %c0_i32 : i32, i32
  }
}

module attributes {stable_mosaic.version = 11 : i64} {
  func.func @_gemm_kernel(%arg0: i32, %arg1: i32, %arg2: i32, %arg3: memref<32x1024xbf16, #tpu.memory_space<vmem>>, %arg4: memref<1024x256xbf16, #tpu.memory_space<vmem>>, %arg5: memref<32x256xbf16, #tpu.memory_space<vmem>>, %arg6: memref<1x2x256xf32, #tpu.memory_space<vmem>>, %arg7: memref<32x256xf32, #tpu.memory_space<vmem>>) attributes {dimension_semantics = [#tpu.dimension_semantics<parallel>, #tpu.dimension_semantics<parallel>, #tpu.dimension_semantics<arbitrary>], iteration_bounds = array<i64: 1, 1, 2>, scalar_prefetch = 0 : i64, scratch_operands = 1 : i64, tpu.core_type = #tpu.core_type<tc>, window_params = [{transform_indices = @transform_0, window_bounds = array<i64: 32, 1024>}, {transform_indices = @transform_1, window_bounds = array<i64: 1024, 256>}, {transform_indices = @transform_2, window_bounds = array<i64: 32, 256>}, {transform_indices = @transform_3, window_bounds = array<i64: 1, 2, 256>}]} {
    %c0_i32 = arith.constant 0 : i32
    %0 = arith.cmpi eq, %arg2, %c0_i32 : i32
    %1 = arith.extui %0 : i1 to i32
    %c0_i32_0 = arith.constant 0 : i32
    %2 = arith.cmpi ne, %1, %c0_i32_0 : i32
    scf.if %2 {
      %cst_9 = arith.constant 0.000000e+00 : f32
      %12 = vector.broadcast %cst_9 : f32 to vector<32x256xf32>
      %c0_10 = arith.constant 0 : index
      %c0_11 = arith.constant 0 : index
      %13 = vector.load %arg7[%c0_10, %c0_11] : memref<32x256xf32, #tpu.memory_space<vmem>>, vector<32x256xf32>
      tpu.vector_store %arg7[%c0_10, %c0_11], %12 {strides = array<i32>} : memref<32x256xf32, #tpu.memory_space<vmem>>, vector<32x256xf32>,
    } else {
    }
    %c0 = arith.constant 0 : index
    %c0_1 = arith.constant 0 : index
    %3 = vector.load %arg7[%c0, %c0_1] : memref<32x256xf32, #tpu.memory_space<vmem>>, vector<32x256xf32>
    %c0_2 = arith.constant 0 : index
    %c0_3 = arith.constant 0 : index
    %4 = vector.load %arg3[%c0_2, %c0_3] : memref<32x1024xbf16, #tpu.memory_space<vmem>>, vector<32x1024xbf16>
    %c0_4 = arith.constant 0 : index
    %c0_5 = arith.constant 0 : index
    %5 = vector.load %arg4[%c0_4, %c0_5] : memref<1024x256xbf16, #tpu.memory_space<vmem>>, vector<1024x256xbf16>
    %cst = arith.constant dense<0.000000e+00> : vector<32x256xf32>
    %6 = tpu.matmul %4, %5, %cst {dimension_numbers = #tpu.dot_dimension_numbers<[1], [0], [0], [1], [0, 0, 1, 1], [], []>} : vector<32x1024xbf16>, vector<1024x256xbf16>, vector<32x256xf32> -> vector<32x256xf32>
    %7 = arith.addf %3, %6 : vector<32x256xf32>
    %c0_6 = arith.constant 0 : index
    %c0_7 = arith.constant 0 : index
    %8 = vector.load %arg7[%c0_6, %c0_7] : memref<32x256xf32, #tpu.memory_space<vmem>>, vector<32x256xf32>
    tpu.vector_store %arg7[%c0_6, %c0_7], %7 {strides = array<i32>} : memref<32x256xf32, #tpu.memory_space<vmem>>, vector<32x256xf32>,
    %c1_i32 = arith.constant 1 : i32
    %9 = arith.cmpi eq, %arg2, %c1_i32 : i32
    %10 = arith.extui %9 : i1 to i32
    %c0_i32_8 = arith.constant 0 : i32
    %11 = arith.cmpi ne, %10, %c0_i32_8 : i32
    scf.if %11 {
      %c0_9 = arith.constant 0 : index
      %c0_10 = arith.constant 0 : index
      %12 = vector.load %arg7[%c0_9, %c0_10] : memref<32x256xf32, #tpu.memory_space<vmem>>, vector<32x256xf32>
      %13 = arith.truncf %12 : vector<32x256xf32> to vector<32x256xbf16>
      %c0_11 = arith.constant 0 : index
      %c0_12 = arith.constant 0 : index
      %14 = vector.load %arg5[%c0_11, %c0_12] : memref<32x256xbf16, #tpu.memory_space<vmem>>, vector<32x256xbf16>
      tpu.vector_store %arg5[%c0_11, %c0_12], %13 {strides = array<i32>} : memref<32x256xbf16, #tpu.memory_space<vmem>>, vector<32x256xbf16>,
      %cst_13 = arith.constant dense<0.000000e+00> : vector<256xf32>
      %15 = vector.multi_reduction <add>, %12, %cst_13 [0] : vector<32x256xf32> to vector<256xf32>
      %16 = vector.shape_cast %15 : vector<256xf32> to vector<1x256xf32>
      %17 = arith.mulf %12, %12 : vector<32x256xf32>
      %cst_14 = arith.constant dense<0.000000e+00> : vector<256xf32>
      %18 = vector.multi_reduction <add>, %17, %cst_14 [0] : vector<32x256xf32> to vector<256xf32>
      %19 = vector.shape_cast %18 : vector<256xf32> to vector<1x256xf32>
      %20 = vector.shape_cast %16 : vector<1x256xf32> to vector<1x1x256xf32>
      %c0_15 = arith.constant 0 : index
      %c0_16 = arith.constant 0 : index
      %c0_17 = arith.constant 0 : index
      %21 = vector.load %arg6[%c0_15, %c0_16, %c0_17] : memref<1x2x256xf32, #tpu.memory_space<vmem>>, vector<1x1x256xf32>
      tpu.vector_store %arg6[%c0_15, %c0_16, %c0_17], %20 {strides = array<i32>} : memref<1x2x256xf32, #tpu.memory_space<vmem>>, vector<1x1x256xf32>,
      %22 = vector.shape_cast %19 : vector<1x256xf32> to vector<1x1x256xf32>
      %c0_18 = arith.constant 0 : index
      %c1 = arith.constant 1 : index
      %c0_19 = arith.constant 0 : index
      %23 = vector.load %arg6[%c0_18, %c1, %c0_19] : memref<1x2x256xf32, #tpu.memory_space<vmem>>, vector<1x1x256xf32>
      tpu.vector_store %arg6[%c0_18, %c1, %c0_19], %22 {strides = array<i32>} : memref<1x2x256xf32, #tpu.memory_space<vmem>>, vector<1x1x256xf32>,
    } else {
    }
    return
  }
  func.func @transform_0(%arg0: i32, %arg1: i32, %arg2: i32) -> (i32, i32) {
    %c0_i32 = arith.constant 0 : i32
    return %arg0, %arg2 : i32, i32
  }
  func.func @transform_1(%arg0: i32, %arg1: i32, %arg2: i32) -> (i32, i32) {
    %c0_i32 = arith.constant 0 : i32
    return %arg2, %arg1 : i32, i32
  }
  func.func @transform_2(%arg0: i32, %arg1: i32, %arg2: i32) -> (i32, i32) {
    %c0_i32 = arith.constant 0 : i32
    return %arg0, %arg1 : i32, i32
  }
  func.func @transform_3(%arg0: i32, %arg1: i32, %arg2: i32) -> (i32, i32, i32) {
    %c0_i32 = arith.constant 0 : i32
    %c0_i32_0 = arith.constant 0 : i32
    return %arg0, %c0_i32, %arg1 : i32, i32, i32
  }
}

module attributes {stable_mosaic.version = 11 : i64} {
  func.func @_bn_norm_lrelu_kernel(%arg0: i32, %arg1: memref<32x256xbf16, #tpu.memory_space<vmem>>, %arg2: memref<2x256xf32, #tpu.memory_space<vmem>>, %arg3: memref<32x256xbf16, #tpu.memory_space<vmem>>) attributes {dimension_semantics = [#tpu.dimension_semantics<parallel>], iteration_bounds = array<i64: 1>, scalar_prefetch = 0 : i64, scratch_operands = 0 : i64, tpu.core_type = #tpu.core_type<tc>, window_params = [{transform_indices = @transform_0, window_bounds = array<i64: 32, 256>}, {pipeline_mode = #tpu.pipeline_mode<synchronous>, transform_indices = @transform_1, window_bounds = array<i64: 2, 256>}, {transform_indices = @transform_2, window_bounds = array<i64: 32, 256>}]} {
    %c0 = arith.constant 0 : index
    %c0_0 = arith.constant 0 : index
    %0 = vector.load %arg1[%c0, %c0_0] : memref<32x256xbf16, #tpu.memory_space<vmem>>, vector<32x256xbf16>
    %1 = arith.extf %0 : vector<32x256xbf16> to vector<32x256xf32>
    %c0_1 = arith.constant 0 : index
    %c0_2 = arith.constant 0 : index
    %2 = vector.load %arg2[%c0_1, %c0_2] : memref<2x256xf32, #tpu.memory_space<vmem>>, vector<1x256xf32>
    %3 = vector.broadcast %2 : vector<1x256xf32> to vector<32x256xf32>
    %4 = arith.mulf %1, %3 : vector<32x256xf32>
    %c1 = arith.constant 1 : index
    %c0_3 = arith.constant 0 : index
    %5 = vector.load %arg2[%c1, %c0_3] : memref<2x256xf32, #tpu.memory_space<vmem>>, vector<1x256xf32>
    %6 = vector.broadcast %5 : vector<1x256xf32> to vector<32x256xf32>
    %7 = arith.addf %4, %6 : vector<32x256xf32>
    %cst = arith.constant 0.000000e+00 : f32
    %8 = vector.broadcast %cst : f32 to vector<32x256xf32>
    %9 = arith.cmpf oge, %7, %8 : vector<32x256xf32>
    %cst_4 = arith.constant 2.000000e-01 : f32
    %10 = vector.broadcast %cst_4 : f32 to vector<32x256xf32>
    %11 = arith.mulf %10, %7 : vector<32x256xf32>
    %12 = arith.select %9, %7, %11 : vector<32x256xi1>, vector<32x256xf32>
    %13 = arith.truncf %12 : vector<32x256xf32> to vector<32x256xbf16>
    %c0_5 = arith.constant 0 : index
    %c0_6 = arith.constant 0 : index
    %14 = vector.load %arg3[%c0_5, %c0_6] : memref<32x256xbf16, #tpu.memory_space<vmem>>, vector<32x256xbf16>
    tpu.vector_store %arg3[%c0_5, %c0_6], %13 {strides = array<i32>} : memref<32x256xbf16, #tpu.memory_space<vmem>>, vector<32x256xbf16>,
    return
  }
  func.func @transform_0(%arg0: i32) -> (i32, i32) {
    %c0_i32 = arith.constant 0 : i32
    %c0_i32_0 = arith.constant 0 : i32
    return %arg0, %c0_i32 : i32, i32
  }
  func.func @transform_1(%arg0: i32) -> (i32, i32) {
    %c0_i32 = arith.constant 0 : i32
    %c0_i32_0 = arith.constant 0 : i32
    %c0_i32_1 = arith.constant 0 : i32
    return %c0_i32, %c0_i32_0 : i32, i32
  }
  func.func @transform_2(%arg0: i32) -> (i32, i32) {
    %c0_i32 = arith.constant 0 : i32
    %c0_i32_0 = arith.constant 0 : i32
    return %arg0, %c0_i32 : i32, i32
  }
}

module attributes {stable_mosaic.version = 11 : i64} {
  func.func @_gemm_kernel(%arg0: i32, %arg1: i32, %arg2: i32, %arg3: memref<32x1024xbf16, #tpu.memory_space<vmem>>, %arg4: memref<1024x512xbf16, #tpu.memory_space<vmem>>, %arg5: memref<32x512xbf16, #tpu.memory_space<vmem>>, %arg6: memref<1x2x512xf32, #tpu.memory_space<vmem>>, %arg7: memref<32x512xf32, #tpu.memory_space<vmem>>) attributes {dimension_semantics = [#tpu.dimension_semantics<parallel>, #tpu.dimension_semantics<parallel>, #tpu.dimension_semantics<arbitrary>], iteration_bounds = array<i64: 1, 1, 4>, scalar_prefetch = 0 : i64, scratch_operands = 1 : i64, tpu.core_type = #tpu.core_type<tc>, window_params = [{transform_indices = @transform_0, window_bounds = array<i64: 32, 1024>}, {transform_indices = @transform_1, window_bounds = array<i64: 1024, 512>}, {transform_indices = @transform_2, window_bounds = array<i64: 32, 512>}, {transform_indices = @transform_3, window_bounds = array<i64: 1, 2, 512>}]} {
    %c0_i32 = arith.constant 0 : i32
    %0 = arith.cmpi eq, %arg2, %c0_i32 : i32
    %1 = arith.extui %0 : i1 to i32
    %c0_i32_0 = arith.constant 0 : i32
    %2 = arith.cmpi ne, %1, %c0_i32_0 : i32
    scf.if %2 {
      %cst_9 = arith.constant 0.000000e+00 : f32
      %12 = vector.broadcast %cst_9 : f32 to vector<32x512xf32>
      %c0_10 = arith.constant 0 : index
      %c0_11 = arith.constant 0 : index
      %13 = vector.load %arg7[%c0_10, %c0_11] : memref<32x512xf32, #tpu.memory_space<vmem>>, vector<32x512xf32>
      tpu.vector_store %arg7[%c0_10, %c0_11], %12 {strides = array<i32>} : memref<32x512xf32, #tpu.memory_space<vmem>>, vector<32x512xf32>,
    } else {
    }
    %c0 = arith.constant 0 : index
    %c0_1 = arith.constant 0 : index
    %3 = vector.load %arg7[%c0, %c0_1] : memref<32x512xf32, #tpu.memory_space<vmem>>, vector<32x512xf32>
    %c0_2 = arith.constant 0 : index
    %c0_3 = arith.constant 0 : index
    %4 = vector.load %arg3[%c0_2, %c0_3] : memref<32x1024xbf16, #tpu.memory_space<vmem>>, vector<32x1024xbf16>
    %c0_4 = arith.constant 0 : index
    %c0_5 = arith.constant 0 : index
    %5 = vector.load %arg4[%c0_4, %c0_5] : memref<1024x512xbf16, #tpu.memory_space<vmem>>, vector<1024x512xbf16>
    %cst = arith.constant dense<0.000000e+00> : vector<32x512xf32>
    %6 = tpu.matmul %4, %5, %cst {dimension_numbers = #tpu.dot_dimension_numbers<[1], [0], [0], [1], [0, 0, 1, 1], [], []>} : vector<32x1024xbf16>, vector<1024x512xbf16>, vector<32x512xf32> -> vector<32x512xf32>
    %7 = arith.addf %3, %6 : vector<32x512xf32>
    %c0_6 = arith.constant 0 : index
    %c0_7 = arith.constant 0 : index
    %8 = vector.load %arg7[%c0_6, %c0_7] : memref<32x512xf32, #tpu.memory_space<vmem>>, vector<32x512xf32>
    tpu.vector_store %arg7[%c0_6, %c0_7], %7 {strides = array<i32>} : memref<32x512xf32, #tpu.memory_space<vmem>>, vector<32x512xf32>,
    %c3_i32 = arith.constant 3 : i32
    %9 = arith.cmpi eq, %arg2, %c3_i32 : i32
    %10 = arith.extui %9 : i1 to i32
    %c0_i32_8 = arith.constant 0 : i32
    %11 = arith.cmpi ne, %10, %c0_i32_8 : i32
    scf.if %11 {
      %c0_9 = arith.constant 0 : index
      %c0_10 = arith.constant 0 : index
      %12 = vector.load %arg7[%c0_9, %c0_10] : memref<32x512xf32, #tpu.memory_space<vmem>>, vector<32x512xf32>
      %13 = arith.truncf %12 : vector<32x512xf32> to vector<32x512xbf16>
      %c0_11 = arith.constant 0 : index
      %c0_12 = arith.constant 0 : index
      %14 = vector.load %arg5[%c0_11, %c0_12] : memref<32x512xbf16, #tpu.memory_space<vmem>>, vector<32x512xbf16>
      tpu.vector_store %arg5[%c0_11, %c0_12], %13 {strides = array<i32>} : memref<32x512xbf16, #tpu.memory_space<vmem>>, vector<32x512xbf16>,
      %cst_13 = arith.constant dense<0.000000e+00> : vector<512xf32>
      %15 = vector.multi_reduction <add>, %12, %cst_13 [0] : vector<32x512xf32> to vector<512xf32>
      %16 = vector.shape_cast %15 : vector<512xf32> to vector<1x512xf32>
      %17 = arith.mulf %12, %12 : vector<32x512xf32>
      %cst_14 = arith.constant dense<0.000000e+00> : vector<512xf32>
      %18 = vector.multi_reduction <add>, %17, %cst_14 [0] : vector<32x512xf32> to vector<512xf32>
      %19 = vector.shape_cast %18 : vector<512xf32> to vector<1x512xf32>
      %20 = vector.shape_cast %16 : vector<1x512xf32> to vector<1x1x512xf32>
      %c0_15 = arith.constant 0 : index
      %c0_16 = arith.constant 0 : index
      %c0_17 = arith.constant 0 : index
      %21 = vector.load %arg6[%c0_15, %c0_16, %c0_17] : memref<1x2x512xf32, #tpu.memory_space<vmem>>, vector<1x1x512xf32>
      tpu.vector_store %arg6[%c0_15, %c0_16, %c0_17], %20 {strides = array<i32>} : memref<1x2x512xf32, #tpu.memory_space<vmem>>, vector<1x1x512xf32>,
      %22 = vector.shape_cast %19 : vector<1x512xf32> to vector<1x1x512xf32>
      %c0_18 = arith.constant 0 : index
      %c1 = arith.constant 1 : index
      %c0_19 = arith.constant 0 : index
      %23 = vector.load %arg6[%c0_18, %c1, %c0_19] : memref<1x2x512xf32, #tpu.memory_space<vmem>>, vector<1x1x512xf32>
      tpu.vector_store %arg6[%c0_18, %c1, %c0_19], %22 {strides = array<i32>} : memref<1x2x512xf32, #tpu.memory_space<vmem>>, vector<1x1x512xf32>,
    } else {
    }
    return
  }
  func.func @transform_0(%arg0: i32, %arg1: i32, %arg2: i32) -> (i32, i32) {
    %c0_i32 = arith.constant 0 : i32
    return %arg0, %arg2 : i32, i32
  }
  func.func @transform_1(%arg0: i32, %arg1: i32, %arg2: i32) -> (i32, i32) {
    %c0_i32 = arith.constant 0 : i32
    return %arg2, %arg1 : i32, i32
  }
  func.func @transform_2(%arg0: i32, %arg1: i32, %arg2: i32) -> (i32, i32) {
    %c0_i32 = arith.constant 0 : i32
    return %arg0, %arg1 : i32, i32
  }
  func.func @transform_3(%arg0: i32, %arg1: i32, %arg2: i32) -> (i32, i32, i32) {
    %c0_i32 = arith.constant 0 : i32
    %c0_i32_0 = arith.constant 0 : i32
    return %arg0, %c0_i32, %arg1 : i32, i32, i32
  }
}

module attributes {stable_mosaic.version = 11 : i64} {
  func.func @_bn_norm_lrelu_kernel(%arg0: i32, %arg1: memref<32x512xbf16, #tpu.memory_space<vmem>>, %arg2: memref<2x512xf32, #tpu.memory_space<vmem>>, %arg3: memref<32x512xbf16, #tpu.memory_space<vmem>>) attributes {dimension_semantics = [#tpu.dimension_semantics<parallel>], iteration_bounds = array<i64: 1>, scalar_prefetch = 0 : i64, scratch_operands = 0 : i64, tpu.core_type = #tpu.core_type<tc>, window_params = [{transform_indices = @transform_0, window_bounds = array<i64: 32, 512>}, {pipeline_mode = #tpu.pipeline_mode<synchronous>, transform_indices = @transform_1, window_bounds = array<i64: 2, 512>}, {transform_indices = @transform_2, window_bounds = array<i64: 32, 512>}]} {
    %c0 = arith.constant 0 : index
    %c0_0 = arith.constant 0 : index
    %0 = vector.load %arg1[%c0, %c0_0] : memref<32x512xbf16, #tpu.memory_space<vmem>>, vector<32x512xbf16>
    %1 = arith.extf %0 : vector<32x512xbf16> to vector<32x512xf32>
    %c0_1 = arith.constant 0 : index
    %c0_2 = arith.constant 0 : index
    %2 = vector.load %arg2[%c0_1, %c0_2] : memref<2x512xf32, #tpu.memory_space<vmem>>, vector<1x512xf32>
    %3 = vector.broadcast %2 : vector<1x512xf32> to vector<32x512xf32>
    %4 = arith.mulf %1, %3 : vector<32x512xf32>
    %c1 = arith.constant 1 : index
    %c0_3 = arith.constant 0 : index
    %5 = vector.load %arg2[%c1, %c0_3] : memref<2x512xf32, #tpu.memory_space<vmem>>, vector<1x512xf32>
    %6 = vector.broadcast %5 : vector<1x512xf32> to vector<32x512xf32>
    %7 = arith.addf %4, %6 : vector<32x512xf32>
    %cst = arith.constant 0.000000e+00 : f32
    %8 = vector.broadcast %cst : f32 to vector<32x512xf32>
    %9 = arith.cmpf oge, %7, %8 : vector<32x512xf32>
    %cst_4 = arith.constant 2.000000e-01 : f32
    %10 = vector.broadcast %cst_4 : f32 to vector<32x512xf32>
    %11 = arith.mulf %10, %7 : vector<32x512xf32>
    %12 = arith.select %9, %7, %11 : vector<32x512xi1>, vector<32x512xf32>
    %13 = arith.truncf %12 : vector<32x512xf32> to vector<32x512xbf16>
    %c0_5 = arith.constant 0 : index
    %c0_6 = arith.constant 0 : index
    %14 = vector.load %arg3[%c0_5, %c0_6] : memref<32x512xbf16, #tpu.memory_space<vmem>>, vector<32x512xbf16>
    tpu.vector_store %arg3[%c0_5, %c0_6], %13 {strides = array<i32>} : memref<32x512xbf16, #tpu.memory_space<vmem>>, vector<32x512xbf16>,
    return
  }
  func.func @transform_0(%arg0: i32) -> (i32, i32) {
    %c0_i32 = arith.constant 0 : i32
    %c0_i32_0 = arith.constant 0 : i32
    return %arg0, %c0_i32 : i32, i32
  }
  func.func @transform_1(%arg0: i32) -> (i32, i32) {
    %c0_i32 = arith.constant 0 : i32
    %c0_i32_0 = arith.constant 0 : i32
    %c0_i32_1 = arith.constant 0 : i32
    return %c0_i32, %c0_i32_0 : i32, i32
  }
  func.func @transform_2(%arg0: i32) -> (i32, i32) {
    %c0_i32 = arith.constant 0 : i32
    %c0_i32_0 = arith.constant 0 : i32
    return %arg0, %c0_i32 : i32, i32
  }
}

module attributes {stable_mosaic.version = 11 : i64} {
  func.func @_matvec_kernel(%arg0: i32, %arg1: i32, %arg2: memref<16x2048xbf16, #tpu.memory_space<vmem>>, %arg3: memref<1x2048xbf16, #tpu.memory_space<vmem>>, %arg4: memref<1xf32, #tpu.memory_space<smem>>, %arg5: memref<16x1xf32, #tpu.memory_space<vmem>>, %arg6: memref<16x1xf32, #tpu.memory_space<vmem>>) attributes {dimension_semantics = [#tpu.dimension_semantics<parallel>, #tpu.dimension_semantics<arbitrary>], iteration_bounds = array<i64: 1, 4>, scalar_prefetch = 0 : i64, scratch_operands = 1 : i64, tpu.core_type = #tpu.core_type<tc>, window_params = [{transform_indices = @transform_0, window_bounds = array<i64: 16, 2048>}, {transform_indices = @transform_1, window_bounds = array<i64: 1, 2048>}, {transform_indices = @transform_2, window_bounds = array<i64: 1>}, {transform_indices = @transform_3, window_bounds = array<i64: 16, 1>}]} {
    %c0_i32 = arith.constant 0 : i32
    %0 = arith.cmpi eq, %arg1, %c0_i32 : i32
    %1 = arith.extui %0 : i1 to i32
    %c0_i32_0 = arith.constant 0 : i32
    %2 = arith.cmpi ne, %1, %c0_i32_0 : i32
    scf.if %2 {
      %cst_9 = arith.constant 0.000000e+00 : f32
      %17 = vector.broadcast %cst_9 : f32 to vector<16x1xf32>
      %c0_10 = arith.constant 0 : index
      %c0_11 = arith.constant 0 : index
      %18 = vector.load %arg6[%c0_10, %c0_11] : memref<16x1xf32, #tpu.memory_space<vmem>>, vector<16x1xf32>
      tpu.vector_store %arg6[%c0_10, %c0_11], %17 {strides = array<i32>} : memref<16x1xf32, #tpu.memory_space<vmem>>, vector<16x1xf32>,
    } else {
    }
    %c0 = arith.constant 0 : index
    %c0_1 = arith.constant 0 : index
    %3 = vector.load %arg2[%c0, %c0_1] : memref<16x2048xbf16, #tpu.memory_space<vmem>>, vector<16x2048xbf16>
    %4 = arith.extf %3 : vector<16x2048xbf16> to vector<16x2048xf32>
    %c0_2 = arith.constant 0 : index
    %c0_3 = arith.constant 0 : index
    %5 = vector.load %arg3[%c0_2, %c0_3] : memref<1x2048xbf16, #tpu.memory_space<vmem>>, vector<1x2048xbf16>
    %6 = arith.extf %5 : vector<1x2048xbf16> to vector<1x2048xf32>
    %7 = vector.broadcast %6 : vector<1x2048xf32> to vector<16x2048xf32>
    %8 = arith.mulf %4, %7 : vector<16x2048xf32>
    %c0_4 = arith.constant 0 : index
    %c0_5 = arith.constant 0 : index
    %9 = vector.load %arg6[%c0_4, %c0_5] : memref<16x1xf32, #tpu.memory_space<vmem>>, vector<16x1xf32>
    %cst = arith.constant dense<0.000000e+00> : vector<16xf32>
    %10 = vector.multi_reduction <add>, %8, %cst [1] : vector<16x2048xf32> to vector<16xf32>
    %11 = vector.shape_cast %10 : vector<16xf32> to vector<16x1xf32>
    %12 = arith.addf %9, %11 : vector<16x1xf32>
    %c0_6 = arith.constant 0 : index
    %c0_7 = arith.constant 0 : index
    %13 = vector.load %arg6[%c0_6, %c0_7] : memref<16x1xf32, #tpu.memory_space<vmem>>, vector<16x1xf32>
    tpu.vector_store %arg6[%c0_6, %c0_7], %12 {strides = array<i32>} : memref<16x1xf32, #tpu.memory_space<vmem>>, vector<16x1xf32>,
    %c3_i32 = arith.constant 3 : i32
    %14 = arith.cmpi eq, %arg1, %c3_i32 : i32
    %15 = arith.extui %14 : i1 to i32
    %c0_i32_8 = arith.constant 0 : i32
    %16 = arith.cmpi ne, %15, %c0_i32_8 : i32
    scf.if %16 {
      %c0_9 = arith.constant 0 : index
      %c0_10 = arith.constant 0 : index
      %17 = vector.load %arg6[%c0_9, %c0_10] : memref<16x1xf32, #tpu.memory_space<vmem>>, vector<16x1xf32>
      %c0_11 = arith.constant 0 : index
      %18 = memref.load %arg4[%c0_11] : memref<1xf32, #tpu.memory_space<smem>>
      %19 = vector.broadcast %18 : f32 to vector<16x1xf32>
      %20 = arith.addf %17, %19 : vector<16x1xf32>
      %c0_12 = arith.constant 0 : index
      %c0_13 = arith.constant 0 : index
      %21 = vector.load %arg5[%c0_12, %c0_13] : memref<16x1xf32, #tpu.memory_space<vmem>>, vector<16x1xf32>
      tpu.vector_store %arg5[%c0_12, %c0_13], %20 {strides = array<i32>} : memref<16x1xf32, #tpu.memory_space<vmem>>, vector<16x1xf32>,
    } else {
    }
    return
  }
  func.func @transform_0(%arg0: i32, %arg1: i32) -> (i32, i32) {
    %c0_i32 = arith.constant 0 : i32
    return %arg0, %arg1 : i32, i32
  }
  func.func @transform_1(%arg0: i32, %arg1: i32) -> (i32, i32) {
    %c0_i32 = arith.constant 0 : i32
    %c0_i32_0 = arith.constant 0 : i32
    return %c0_i32, %arg1 : i32, i32
  }
  func.func @transform_2(%arg0: i32, %arg1: i32) -> i32 {
    %c0_i32 = arith.constant 0 : i32
    %c0_i32_0 = arith.constant 0 : i32
    return %c0_i32 : i32
  }
  func.func @transform_3(%arg0: i32, %arg1: i32) -> (i32, i32) {
    %c0_i32 = arith.constant 0 : i32
    %c0_i32_0 = arith.constant 0 : i32
    return %arg0, %c0_i32 : i32, i32
  }
}

</mosaic_0001>

<bundles_post_ra>
// kernel: discriminator_forward.8
= control target key start
LH: loop header
LB: loop body
LE: loop exit
PB: predicated region body
PF: predicated region fallthrough
CT: control target
= control target key end

     0   :  { %vm403_vm0 = vcmask 523264   ;;  %s2445_s1 = inlined_call_operand.vmem [shape: bf16[64,128], index: 1, kind: input, shape index: {}]   ;;  %s2446_s0 = inlined_call_operand.vmem [shape: bf16[512,64], index: 0, kind: input, shape index: {}]   ;;  %s2447_s2 = inlined_call_operand.vmem [shape: f32[1,128], index: 2, kind: input, shape index: {}]   ;;  %s2448_s3 = inlined_call_operand.vmem [shape: bf16[512,128], index: 3, kind: output, shape index: {}]  }
   0x1   :  { %v2075_v0 = vld [vmem:[%s2445_s1] sm:$0xff]   ;;  %v2076_v1 = vld [vmem:[%s2445_s1 + $0x8] sm:$0xff]   ;;  %v2077_v2 = vld [vmem:[%s2445_s1 + $0x10] sm:$0xff]  }
   0x2   :  { %1995 = vmatprep.subr.bf16.mxu0 %v2075_v0  ;;  %2067 = vmatprep.subr.bf16.mxu1 %v2075_v0  ;;  %v2079_v3 = vld [vmem:[%s2446_s0] sm:$0xff]   ;;  %v2078_v5 = vld [vmem:[%s2445_s1 + $0x18] sm:$0xff]   ;;  %v2081_v6 = vld [vmem:[%s2446_s0 + $0x8] sm:$0xff]  }
   0x3   :  { %1996 = vmatpush3.bf16.msra.mxu0 %v2075_v0  ;;  %2071 = vmatpush3.bf16.msra.mxu1 %v2075_v0  ;;  %v2080_v4 = vld [vmem:[%s2446_s0 + $0x80] sm:$0xff]   ;;  %v2082_v7 = vld [vmem:[%s2446_s0 + $0x88] sm:$0xff]   ;;  %v2083_v8 = vld [vmem:[%s2446_s0 + $0x10] sm:$0xff]  }
   0x4   :  { %1997 = vmatprep.subr.bf16.mxu0 %v2076_v1  ;;  %2068 = vmatprep.subr.bf16.mxu1 %v2076_v1  ;;  %v2084_v9 = vld [vmem:[%s2446_s0 + $0x90] sm:$0xff]   ;;  %v2085_v10 = vld [vmem:[%s2446_s0 + $0x18] sm:$0xff]   ;;  %v2087_v12 = vld [vmem:[%s2446_s0 + $0x20] sm:$0xff]  }
   0x5   :  { %2003 = vmatprep.mubr.msk.bf16.mxu0 %vm403_vm0, %v2079_v3  ;;  %2035 = vmatprep.mubr.msk.bf16.mxu1 %vm403_vm0, %v2080_v4  ;;  %v2086_v11 = vld [vmem:[%s2446_s0 + $0x98] sm:$0xff]   ;;  %v2088_v13 = vld [vmem:[%s2446_s0 + $0xa0] sm:$0xff]   ;;  %v2089_v14 = vld [vmem:[%s2446_s0 + $0x28] sm:$0xff]  }
   0x6   :  { %v2090_v15 = vld [vmem:[%s2446_s0 + $0xa8] sm:$0xff]   ;;  %v2091_v16 = vld [vmem:[%s2446_s0 + $0x30] sm:$0xff]   ;;  %v2093_v18 = vld [vmem:[%s2446_s0 + $0x38] sm:$0xff]  }
   0x7   :  { %1998 = vmatpush3.bf16.msra.mxu0 %v2076_v1  ;;  %2072 = vmatpush3.bf16.msra.mxu1 %v2076_v1  ;;  %v2092_v17 = vld [vmem:[%s2446_s0 + $0xb0] sm:$0xff]   ;;  %v2094_v19 = vld [vmem:[%s2446_s0 + $0xb8] sm:$0xff]   ;;  %v2095_v20 = vld [vmem:[%s2446_s0 + $0x40] sm:$0xff]  }
   0x8   :  { %1999 = vmatprep.subr.bf16.mxu0 %v2077_v2  ;;  %2069 = vmatprep.subr.bf16.mxu1 %v2077_v2  ;;  %v2096_v21 = vld [vmem:[%s2446_s0 + $0xc0] sm:$0xff]   ;;  %v2097_v22 = vld [vmem:[%s2446_s0 + $0x48] sm:$0xff]   ;;  %v2099_v24 = vld [vmem:[%s2446_s0 + $0x50] sm:$0xff]  }
   0x9   :  { %v2098_v23 = vld [vmem:[%s2446_s0 + $0xc8] sm:$0xff]   ;;  %v2100_v25 = vld [vmem:[%s2446_s0 + $0xd0] sm:$0xff]   ;;  %v2101_v26 = vld [vmem:[%s2446_s0 + $0x58] sm:$0xff]  }
   0xa   :  { %v2102_v27 = vld [vmem:[%s2446_s0 + $0xd8] sm:$0xff]   ;;  %v2103_v28 = vld [vmem:[%s2446_s0 + $0x60] sm:$0xff]   ;;  %v2105_v30 = vld [vmem:[%s2446_s0 + $0x68] sm:$0xff]  }
   0xb   :  { %2000 = vmatpush3.bf16.msra.mxu0 %v2077_v2  ;;  %2073 = vmatpush3.bf16.msra.mxu1 %v2077_v2  ;;  %v2104_v29 = vld [vmem:[%s2446_s0 + $0xe0] sm:$0xff]   ;;  %v2106_v31 = vld [vmem:[%s2446_s0 + $0xe8] sm:$0xff]   ;;  %v2107_v32 = vld [vmem:[%s2446_s0 + $0x70] sm:$0xff]  }
   0xc   :  { %2001 = vmatprep.subr.bf16.mxu0 %v2078_v5  ;;  %2070 = vmatprep.subr.bf16.mxu1 %v2078_v5  ;;  %v2108_v33 = vld [vmem:[%s2446_s0 + $0xf0] sm:$0xff]   ;;  %v2109_v34 = vld [vmem:[%s2446_s0 + $0x78] sm:$0xff]   ;;  %v2274_v36 = vld [vmem:[%s2447_s2] ss:$0 sm:$0xff] }
   0xd   :  { %v2110_v35 = vld [vmem:[%s2446_s0 + $0xf8] sm:$0xff]  }
   0xf   :  { %2002 = vmatpush3.bf16.msra.mxu0 %v2078_v5  ;;  %2074 = vmatpush3.bf16.msra.mxu1 %v2078_v5 }
  0x12   :  { %2004 = vmatmul.mubr.msk.bf16.vlgmr.msra.gmra.mrb[0].mxu0 %vm403_vm0, %v2081_v6  ;;  %2036 = vmatmul.mubr.msk.bf16.vlgmr.msra.gmra.mrb[0].mxu1 %vm403_vm0, %v2082_v7 }
  0x13   :  { %2007 = vmatprep.mubr.msk.bf16.mxu0 %vm403_vm0, %v2083_v8  ;;  %2039 = vmatprep.mubr.msk.bf16.mxu1 %vm403_vm0, %v2084_v9 }
  0x1a   :  { %2008 = vmatmul.mubr.msk.bf16.gmra.mrb[4].mxu0 %vm403_vm0, %v2085_v10  ;;  %2040 = vmatmul.mubr.msk.bf16.gmra.mrb[4].mxu1 %vm403_vm0, %v2086_v11 }
  0x1b   :  { %2011 = vmatprep.mubr.msk.bf16.mxu0 %vm403_vm0, %v2087_v12  ;;  %2043 = vmatprep.mubr.msk.bf16.mxu1 %vm403_vm0, %v2088_v13 }
  0x22   :  { %2012 = vmatmul.mubr.msk.bf16.gmra.mrb[8].mxu0 %vm403_vm0, %v2089_v14  ;;  %2044 = vmatmul.mubr.msk.bf16.gmra.mrb[8].mxu1 %vm403_vm0, %v2090_v15 }
  0x23   :  { %2015 = vmatprep.mubr.msk.bf16.mxu0 %vm403_vm0, %v2091_v16  ;;  %2047 = vmatprep.mubr.msk.bf16.mxu1 %vm403_vm0, %v2092_v17 }
  0x2a   :  { %2016 = vmatmul.mubr.msk.bf16.gmra.mrb[12].mxu0 %vm403_vm0, %v2093_v18  ;;  %2048 = vmatmul.mubr.msk.bf16.gmra.mrb[12].mxu1 %vm403_vm0, %v2094_v19 }
  0x2b   :  { %2019 = vmatprep.mubr.msk.bf16.mxu0 %vm403_vm0, %v2095_v20  ;;  %2051 = vmatprep.mubr.msk.bf16.mxu1 %vm403_vm0, %v2096_v21 }
  0x32   :  { %2020 = vmatmul.mubr.msk.bf16.gmra.mrb[16].mxu0 %vm403_vm0, %v2097_v22  ;;  %2052 = vmatmul.mubr.msk.bf16.gmra.mrb[16].mxu1 %vm403_vm0, %v2098_v23 }
  0x33   :  { %2023 = vmatprep.mubr.msk.bf16.mxu0 %vm403_vm0, %v2099_v24  ;;  %2055 = vmatprep.mubr.msk.bf16.mxu1 %vm403_vm0, %v2100_v25 }
  0x3a   :  { %2024 = vmatmul.mubr.msk.bf16.gmra.mrb[20].mxu0 %vm403_vm0, %v2101_v26  ;;  %2056 = vmatmul.mubr.msk.bf16.gmra.mrb[20].mxu1 %vm403_vm0, %v2102_v27 }
  0x3b   :  { %2027 = vmatprep.mubr.msk.bf16.mxu0 %vm403_vm0, %v2103_v28  ;;  %2059 = vmatprep.mubr.msk.bf16.mxu1 %vm403_vm0, %v2104_v29 }
  0x42   :  { %2028 = vmatmul.mubr.msk.bf16.gmra.mrb[24].mxu0 %vm403_vm0, %v2105_v30  ;;  %2060 = vmatmul.mubr.msk.bf16.gmra.mrb[24].mxu1 %vm403_vm0, %v2106_v31 }
  0x43   :  { %2031 = vmatprep.mubr.msk.bf16.mxu0 %vm403_vm0, %v2107_v32  ;;  %2063 = vmatprep.mubr.msk.bf16.mxu1 %vm403_vm0, %v2108_v33 }
  0x4a   :  { %2032 = vmatmul.mubr.msk.bf16.gmra.mrb[28].mxu0 %vm403_vm0, %v2109_v34  ;;  %2064 = vmatmul.mubr.msk.bf16.gmra.mrb[28].mxu1 %vm403_vm0, %v2110_v35 }
  0xe5   :  { %v2005_v37 = vpop.f32.mrb[0].mxu0  ;;  %v2037_v38 = vpop.f32.mrb[0].mxu1 }
  0xe6   :  { %v993_v39 = vadd.f32 %v2005_v37, %v2274_v36  ;;  %v1025_v40 = vadd.f32 %v2037_v38, %v2274_v36  ;;  %v534_v41 = vpop.f32.mrb[1].mxu0  ;;  %v662_v42 = vpop.f32.mrb[1].mxu1 }
  0xe7   :  { %v991_v43 = vadd.f32 %v2274_v36, %v534_v41  ;;  %v1023_v44 = vadd.f32 %v2274_v36, %v662_v42  ;;  %v2006_v45 = vpop.f32.mrb[2].mxu0  ;;  %v2038_v46 = vpop.f32.mrb[2].mxu1 }
  0xe8   :  { %vm1057_vm1 = vcmp.ge.f32.partialorder %v993_v39, 0.0  ;;  %v1121_v47 = vmul.f32 0.2, %v993_v39  ;;  %vm1089_vm2 = vcmp.ge.f32.partialorder %v1025_v40, 0.0  ;;  %v1153_v48 = vmul.f32 0.2, %v1025_v40 }
  0xe9   :  { %vm1055_vm3 = vcmp.ge.f32.partialorder %v991_v43, 0.0  ;;  %v1119_v49 = vmul.f32 0.2, %v991_v43  ;;  %vm1087_vm4 = vcmp.ge.f32.partialorder %v1023_v44, 0.0  ;;  %v1151_v50 = vmul.f32 0.2, %v1023_v44 }
  0xea   :  { %v994_v51 = vadd.f32 %v2006_v45, %v2274_v36  ;;  %v1026_v52 = vadd.f32 %v2038_v46, %v2274_v36  ;;  %v537_v53 = vpop.f32.mrb[3].mxu0  ;;  %v665_v54 = vpop.f32.mrb[3].mxu1  ;;  %v1185_v55 = vsel %vm1057_vm1, %v993_v39, %v1121_v47  ;;  %v1217_v56 = vsel %vm1089_vm2, %v1025_v40, %v1153_v48 }
  0xeb   :  { %v992_v57 = vadd.f32 %v2274_v36, %v537_v53  ;;  %v1024_v58 = vadd.f32 %v2274_v36, %v665_v54  ;;  %v1183_v63 = vsel %vm1055_vm3, %v991_v43, %v1119_v49  ;;  %v1215_v0 = vsel %vm1087_vm4, %v1023_v44, %v1151_v50 }
  0xec   :  { %vm1058_vm5 = vcmp.ge.f32.partialorder %v994_v51, 0.0  ;;  %v1122_v59 = vmul.f32 0.2, %v994_v51  ;;  %vm1090_vm6 = vcmp.ge.f32.partialorder %v1026_v52, 0.0  ;;  %v1154_v60 = vmul.f32 0.2, %v1026_v52 }
  0xed   :  { %vm1056_vm7 = vcmp.ge.f32.partialorder %v992_v57, 0.0  ;;  %v1120_v61 = vmul.f32 0.2, %v992_v57  ;;  %vm1088_vm8 = vcmp.ge.f32.partialorder %v1024_v58, 0.0  ;;  %v1152_v62 = vmul.f32 0.2, %v1024_v58 }
  0xee   :  { %v1186_v1 = vsel %vm1058_vm5, %v994_v51, %v1122_v59  ;;  %v1218_v2 = vsel %vm1090_vm6, %v1026_v52, %v1154_v60  ;;  %v2009_v3 = vpop.f32.mrb[4].mxu0  ;;  %v2041_v4 = vpop.f32.mrb[4].mxu1 }
  0xef   :  { %v1776_v5 = vpack.c.bf16 %v1186_v1, %v1185_v55  ;;  %v1856_v6 = vpack.c.bf16 %v1218_v2, %v1217_v56  ;;  %v1184_v7 = vsel %vm1056_vm7, %v992_v57, %v1120_v61  ;;  %v1216_v8 = vsel %vm1088_vm8, %v1024_v58, %v1152_v62  ;;  %v550_v9 = vpop.f32.mrb[5].mxu0  ;;  %v678_v10 = vpop.f32.mrb[5].mxu1 }
  0xf0   :  { %v1771_v11 = vpack.c.bf16 %v1184_v7, %v1183_v63  ;;  %v1851_v12 = vpack.c.bf16 %v1216_v8, %v1215_v0  ;;  %v997_v13 = vadd.f32 %v2009_v3, %v2274_v36  ;;  %v1029_v14 = vadd.f32 %v2041_v4, %v2274_v36  ;;  %v2010_v15 = vpop.f32.mrb[6].mxu0  ;;  %v2042_v16 = vpop.f32.mrb[6].mxu1 }
  0xf1   :  { %1928 = vst [vmem:[%s2448_s3 + $0x8] sm:$0xff] %v1776_v5   ;;  %1944 = vst [vmem:[%s2448_s3 + $0x88] sm:$0xff] %v1856_v6   ;;  %v995_v17 = vadd.f32 %v2274_v36, %v550_v9  ;;  %v1027_v18 = vadd.f32 %v2274_v36, %v678_v10  ;;  %v998_v19 = vadd.f32 %v2010_v15, %v2274_v36  ;;  %v553_v21 = vpop.f32.mrb[7].mxu0  ;;  %v681_v22 = vpop.f32.mrb[7].mxu1 }
  0xf2   :  { %v1030_v20 = vadd.f32 %v2042_v16, %v2274_v36  ;;  %1772 = vst [vmem:[%s2448_s3] sm:$0xff] %v1771_v11   ;;  %1943 = vst [vmem:[%s2448_s3 + $0x80] sm:$0xff] %v1851_v12   ;;  %vm1061_vm9 = vcmp.ge.f32.partialorder %v997_v13, 0.0  ;;  %v1125_v23 = vmul.f32 0.2, %v997_v13  ;;  %vm1093_vm10 = vcmp.ge.f32.partialorder %v1029_v14, 0.0 }
  0xf3   :  { %v1157_v24 = vmul.f32 0.2, %v1029_v14  ;;  %vm1059_vm11 = vcmp.ge.f32.partialorder %v995_v17, 0.0  ;;  %v1123_v25 = vmul.f32 0.2, %v995_v17  ;;  %vm1091_vm12 = vcmp.ge.f32.partialorder %v1027_v18, 0.0 }
  0xf4   :  { %v1155_v26 = vmul.f32 0.2, %v1027_v18  ;;  %v1189_v27 = vsel %vm1061_vm9, %v997_v13, %v1125_v23  ;;  %vm1062_vm13 = vcmp.ge.f32.partialorder %v998_v19, 0.0  ;;  %v1126_v29 = vmul.f32 0.2, %v998_v19 }
  0xf5   :  { %v1221_v28 = vsel %vm1093_vm10, %v1029_v14, %v1157_v24  ;;  %v1187_v30 = vsel %vm1059_vm11, %v995_v17, %v1123_v25  ;;  %vm1094_vm14 = vcmp.ge.f32.partialorder %v1030_v20, 0.0  ;;  %v1158_v32 = vmul.f32 0.2, %v1030_v20  ;;  %v2013_v33 = vpop.f32.mrb[8].mxu0  ;;  %v2045_v34 = vpop.f32.mrb[8].mxu1 }
  0xf6   :  { %v1219_v31 = vsel %vm1091_vm12, %v1027_v18, %v1155_v26  ;;  %v1190_v35 = vsel %vm1062_vm13, %v998_v19, %v1126_v29  ;;  %v996_v37 = vadd.f32 %v2274_v36, %v553_v21  ;;  %v1028_v38 = vadd.f32 %v2274_v36, %v681_v22  ;;  %v566_v40 = vpop.f32.mrb[9].mxu0  ;;  %v694_v41 = vpop.f32.mrb[9].mxu1 }
  0xf7   :  { %v1001_v39 = vadd.f32 %v2013_v33, %v2274_v36  ;;  %v1786_v42 = vpack.c.bf16 %v1190_v35, %v1189_v27  ;;  %v1222_v43 = vsel %vm1094_vm14, %v1030_v20, %v1158_v32  ;;  %v1033_v44 = vadd.f32 %v2045_v34, %v2274_v36  ;;  %v2014_v46 = vpop.f32.mrb[10].mxu0  ;;  %v2046_v47 = vpop.f32.mrb[10].mxu1 }
  0xf8   :  { %v999_v45 = vadd.f32 %v2274_v36, %v566_v40  ;;  %v1866_v48 = vpack.c.bf16 %v1222_v43, %v1221_v28  ;;  %vm1060_vm15 = vcmp.ge.f32.partialorder %v996_v37, 0.0  ;;  %v1124_v49 = vmul.f32 0.2, %v996_v37  ;;  %v569_v50 = vpop.f32.mrb[11].mxu0  ;;  %v697_v51 = vpop.f32.mrb[11].mxu1 }
  0xf9   :  { %vm1092_vm0 = vcmp.ge.f32.partialorder %v1028_v38, 0.0  ;;  %1930 = vst [vmem:[%s2448_s3 + $0x18] sm:$0xff] %v1786_v42   ;;  %v1156_v52 = vmul.f32 0.2, %v1028_v38  ;;  %vm1065_vm1 = vcmp.ge.f32.partialorder %v1001_v39, 0.0  ;;  %vm1097_vm2 = vcmp.ge.f32.partialorder %v1033_v44, 0.0 }
  0xfa   :  { %v1129_v53 = vmul.f32 0.2, %v1001_v39  ;;  %1946 = vst [vmem:[%s2448_s3 + $0x98] sm:$0xff] %v1866_v48   ;;  %v1188_v54 = vsel %vm1060_vm15, %v996_v37, %v1124_v49  ;;  %v1161_v55 = vmul.f32 0.2, %v1033_v44  ;;  %vm1063_vm3 = vcmp.ge.f32.partialorder %v999_v45, 0.0 }
  0xfb   :  { %v1127_v56 = vmul.f32 0.2, %v999_v45  ;;  %v1781_v57 = vpack.c.bf16 %v1188_v54, %v1187_v30  ;;  %v1220_v58 = vsel %vm1092_vm0, %v1028_v38, %v1156_v52  ;;  %v1031_v60 = vadd.f32 %v2274_v36, %v694_v41 }
  0xfc   :  { %v1193_v59 = vsel %vm1065_vm1, %v1001_v39, %v1129_v53  ;;  %v1861_v61 = vpack.c.bf16 %v1220_v58, %v1219_v31  ;;  %v1225_v62 = vsel %vm1097_vm2, %v1033_v44, %v1161_v55  ;;  %v1002_v0 = vadd.f32 %v2014_v46, %v2274_v36 }
  0xfd   :  { %v1191_v63 = vsel %vm1063_vm3, %v999_v45, %v1127_v56  ;;  %1929 = vst [vmem:[%s2448_s3 + $0x10] sm:$0xff] %v1781_v57   ;;  %vm1095_vm4 = vcmp.ge.f32.partialorder %v1031_v60, 0.0  ;;  %v1159_v1 = vmul.f32 0.2, %v1031_v60  ;;  %v1034_v2 = vadd.f32 %v2046_v47, %v2274_v36  ;;  %v2017_v4 = vpop.f32.mrb[12].mxu0  ;;  %v2049_v5 = vpop.f32.mrb[12].mxu1 }
  0xfe   :  { %v1000_v3 = vadd.f32 %v2274_v36, %v569_v50  ;;  %1945 = vst [vmem:[%s2448_s3 + $0x90] sm:$0xff] %v1861_v61   ;;  %vm1066_vm5 = vcmp.ge.f32.partialorder %v1002_v0, 0.0  ;;  %v1130_v6 = vmul.f32 0.2, %v1002_v0  ;;  %v1032_v7 = vadd.f32 %v2274_v36, %v697_v51  ;;  %v582_v9 = vpop.f32.mrb[13].mxu0  ;;  %v710_v10 = vpop.f32.mrb[13].mxu1 }
  0xff   :  { %v1005_v8 = vadd.f32 %v2017_v4, %v2274_v36  ;;  %v1223_v11 = vsel %vm1095_vm4, %v1031_v60, %v1159_v1  ;;  %vm1098_vm6 = vcmp.ge.f32.partialorder %v1034_v2, 0.0  ;;  %v1162_v12 = vmul.f32 0.2, %v1034_v2  ;;  %v2018_v13 = vpop.f32.mrb[14].mxu0  ;;  %v2050_v14 = vpop.f32.mrb[14].mxu1 }
 0x100   :  { %vm1064_vm7 = vcmp.ge.f32.partialorder %v1000_v3, 0.0  ;;  %v1194_v15 = vsel %vm1066_vm5, %v1002_v0, %v1130_v6  ;;  %v1128_v16 = vmul.f32 0.2, %v1000_v3  ;;  %vm1096_vm8 = vcmp.ge.f32.partialorder %v1032_v7, 0.0  ;;  %v585_v18 = vpop.f32.mrb[15].mxu0  ;;  %v713_v22 = vpop.f32.mrb[15].mxu1 }
 0x101   :  { %v1160_v17 = vmul.f32 0.2, %v1032_v7  ;;  %v1796_v19 = vpack.c.bf16 %v1194_v15, %v1193_v59  ;;  %v1226_v20 = vsel %vm1098_vm6, %v1034_v2, %v1162_v12  ;;  %vm1069_vm9 = vcmp.ge.f32.partialorder %v1005_v8, 0.0 }
 0x102   :  { %v1133_v21 = vmul.f32 0.2, %v1005_v8  ;;  %v1876_v23 = vpack.c.bf16 %v1226_v20, %v1225_v62  ;;  %v1192_v24 = vsel %vm1064_vm7, %v1000_v3, %v1128_v16  ;;  %v1037_v26 = vadd.f32 %v2049_v5, %v2274_v36 }
 0x103   :  { %v1224_v25 = vsel %vm1096_vm8, %v1032_v7, %v1160_v17  ;;  %1932 = vst [vmem:[%s2448_s3 + $0x28] sm:$0xff] %v1796_v19   ;;  %v1791_v27 = vpack.c.bf16 %v1192_v24, %v1191_v63  ;;  %v1003_v30 = vadd.f32 %v2274_v36, %v582_v9  ;;  %v1035_v32 = vadd.f32 %v2274_v36, %v710_v10 }
 0x104   :  { %v1871_v28 = vpack.c.bf16 %v1224_v25, %v1223_v11  ;;  %v1197_v29 = vsel %vm1069_vm9, %v1005_v8, %v1133_v21  ;;  %1948 = vst [vmem:[%s2448_s3 + $0xa8] sm:$0xff] %v1876_v23   ;;  %vm1101_vm10 = vcmp.ge.f32.partialorder %v1037_v26, 0.0  ;;  %v1165_v31 = vmul.f32 0.2, %v1037_v26 }
 0x105   :  { %v1006_v33 = vadd.f32 %v2018_v13, %v2274_v36  ;;  %1931 = vst [vmem:[%s2448_s3 + $0x20] sm:$0xff] %v1791_v27   ;;  %vm1067_vm11 = vcmp.ge.f32.partialorder %v1003_v30, 0.0  ;;  %v1131_v34 = vmul.f32 0.2, %v1003_v30  ;;  %v1038_v35 = vadd.f32 %v2050_v14, %v2274_v36  ;;  %v2021_v38 = vpop.f32.mrb[16].mxu0  ;;  %v2053_v39 = vpop.f32.mrb[16].mxu1 }
 0x106   :  { %1947 = vst [vmem:[%s2448_s3 + $0xa0] sm:$0xff] %v1871_v28   ;;  %v1004_v37 = vadd.f32 %v2274_v36, %v585_v18  ;;  %v1229_v40 = vsel %vm1101_vm10, %v1037_v26, %v1165_v31  ;;  %vm1099_vm12 = vcmp.ge.f32.partialorder %v1035_v32, 0.0  ;;  %v1163_v41 = vmul.f32 0.2, %v1035_v32  ;;  %v598_v42 = vpop.f32.mrb[17].mxu0  ;;  %v726_v43 = vpop.f32.mrb[17].mxu1 }
 0x107   :  { %vm1070_vm13 = vcmp.ge.f32.partialorder %v1006_v33, 0.0  ;;  %v1195_v44 = vsel %vm1067_vm11, %v1003_v30, %v1131_v34  ;;  %v1134_v45 = vmul.f32 0.2, %v1006_v33  ;;  %vm1102_vm14 = vcmp.ge.f32.partialorder %v1038_v35, 0.0  ;;  %v2022_v47 = vpop.f32.mrb[18].mxu0  ;;  %v2054_v51 = vpop.f32.mrb[18].mxu1 }
 0x108   :  { %v1166_v46 = vmul.f32 0.2, %v1038_v35  ;;  %v1227_v48 = vsel %vm1099_vm12, %v1035_v32, %v1163_v41  ;;  %vm1068_vm15 = vcmp.ge.f32.partialorder %v1004_v37, 0.0  ;;  %v1132_v49 = vmul.f32 0.2, %v1004_v37  ;;  %v601_v52 = vpop.f32.mrb[19].mxu0 }
 0x109   :  { %v1036_v50 = vadd.f32 %v2274_v36, %v713_v22  ;;  %v1198_v53 = vsel %vm1070_vm13, %v1006_v33, %v1134_v45  ;;  %v1009_v55 = vadd.f32 %v2021_v38, %v2274_v36  ;;  %v1041_v56 = vadd.f32 %v2053_v39, %v2274_v36  ;;  %v729_v57 = vpop.f32.mrb[19].mxu1 }
 0x10a   :  { %v1230_v54 = vsel %vm1102_vm14, %v1038_v35, %v1166_v46  ;;  %v1806_v58 = vpack.c.bf16 %v1198_v53, %v1197_v29  ;;  %v1196_v60 = vsel %vm1068_vm15, %v1004_v37, %v1132_v49  ;;  %v1007_v1 = vadd.f32 %v2274_v36, %v598_v42 }
 0x10b   :  { %v1886_v59 = vpack.c.bf16 %v1230_v54, %v1229_v40  ;;  %vm1100_vm0 = vcmp.ge.f32.partialorder %v1036_v50, 0.0  ;;  %v1801_v61 = vpack.c.bf16 %v1196_v60, %v1195_v44  ;;  %v1164_v62 = vmul.f32 0.2, %v1036_v50 }
 0x10c   :  { %vm1073_vm1 = vcmp.ge.f32.partialorder %v1009_v55, 0.0  ;;  %v1137_v63 = vmul.f32 0.2, %v1009_v55  ;;  %1934 = vst [vmem:[%s2448_s3 + $0x38] sm:$0xff] %v1806_v58   ;;  %vm1105_vm2 = vcmp.ge.f32.partialorder %v1041_v56, 0.0  ;;  %v1039_v2 = vadd.f32 %v2274_v36, %v726_v43 }
 0x10d   :  { %1950 = vst [vmem:[%s2448_s3 + $0xb8] sm:$0xff] %v1886_v59   ;;  %v1169_v0 = vmul.f32 0.2, %v1041_v56  ;;  %1933 = vst [vmem:[%s2448_s3 + $0x30] sm:$0xff] %v1801_v61   ;;  %v1228_v3 = vsel %vm1100_vm0, %v1036_v50, %v1164_v62  ;;  %v1010_v5 = vadd.f32 %v2022_v47, %v2274_v36  ;;  %v1042_v6 = vadd.f32 %v2054_v51, %v2274_v36  ;;  %v2025_v7 = vpop.f32.mrb[20].mxu0  ;;  %v2057_v8 = vpop.f32.mrb[20].mxu1 }
 0x10e   :  { %v1201_v4 = vsel %vm1073_vm1, %v1009_v55, %v1137_v63  ;;  %v1881_v9 = vpack.c.bf16 %v1228_v3, %v1227_v48  ;;  %vm1071_vm3 = vcmp.ge.f32.partialorder %v1007_v1, 0.0  ;;  %v1135_v11 = vmul.f32 0.2, %v1007_v1  ;;  %v614_v12 = vpop.f32.mrb[21].mxu0  ;;  %v742_v13 = vpop.f32.mrb[21].mxu1 }
 0x10f   :  { %v1233_v10 = vsel %vm1105_vm2, %v1041_v56, %v1169_v0  ;;  %vm1103_vm4 = vcmp.ge.f32.partialorder %v1039_v2, 0.0  ;;  %v1167_v14 = vmul.f32 0.2, %v1039_v2  ;;  %vm1074_vm5 = vcmp.ge.f32.partialorder %v1010_v5, 0.0  ;;  %v2026_v19 = vpop.f32.mrb[22].mxu0  ;;  %v2058_v20 = vpop.f32.mrb[22].mxu1 }
 0x110   :  { %v1138_v15 = vmul.f32 0.2, %v1010_v5  ;;  %1949 = vst [vmem:[%s2448_s3 + $0xb0] sm:$0xff] %v1881_v9   ;;  %v1199_v16 = vsel %vm1071_vm3, %v1007_v1, %v1135_v11  ;;  %vm1106_vm6 = vcmp.ge.f32.partialorder %v1042_v6, 0.0  ;;  %v1170_v17 = vmul.f32 0.2, %v1042_v6 }
 0x111   :  { %v1008_v18 = vadd.f32 %v2274_v36, %v601_v52  ;;  %v1231_v21 = vsel %vm1103_vm4, %v1039_v2, %v1167_v14  ;;  %v1040_v23 = vadd.f32 %v2274_v36, %v729_v57  ;;  %v1013_v24 = vadd.f32 %v2025_v7, %v2274_v36  ;;  %v617_v25 = vpop.f32.mrb[23].mxu0  ;;  %v745_v26 = vpop.f32.mrb[23].mxu1 }
 0x112   :  { %v1202_v22 = vsel %vm1074_vm5, %v1010_v5, %v1138_v15  ;;  %v1234_v28 = vsel %vm1106_vm6, %v1042_v6, %v1170_v17  ;;  %v1045_v34 = vadd.f32 %v2057_v8, %v2274_v36  ;;  %v1011_v35 = vadd.f32 %v2274_v36, %v614_v12 }
 0x113   :  { %v1816_v27 = vpack.c.bf16 %v1202_v22, %v1201_v4  ;;  %vm1072_vm7 = vcmp.ge.f32.partialorder %v1008_v18, 0.0  ;;  %v1136_v29 = vmul.f32 0.2, %v1008_v18  ;;  %v1896_v30 = vpack.c.bf16 %v1234_v28, %v1233_v10 }
 0x114   :  { %vm1104_vm8 = vcmp.ge.f32.partialorder %v1040_v23, 0.0  ;;  %v1168_v31 = vmul.f32 0.2, %v1040_v23  ;;  %vm1077_vm9 = vcmp.ge.f32.partialorder %v1013_v24, 0.0  ;;  %v1141_v33 = vmul.f32 0.2, %v1013_v24 }
 0x115   :  { %1936 = vst [vmem:[%s2448_s3 + $0x48] sm:$0xff] %v1816_v27   ;;  %v1200_v32 = vsel %vm1072_vm7, %v1008_v18, %v1136_v29  ;;  %1952 = vst [vmem:[%s2448_s3 + $0xc8] sm:$0xff] %v1896_v30   ;;  %v1043_v39 = vadd.f32 %v2274_v36, %v742_v13  ;;  %v1014_v40 = vadd.f32 %v2026_v19, %v2274_v36  ;;  %v2029_v41 = vpop.f32.mrb[24].mxu0  ;;  %v2061_v42 = vpop.f32.mrb[24].mxu1  ;;  %vm1109_vm10 = vcmp.ge.f32.partialorder %v1045_v34, 0.0 }
 0x116   :  { %v1811_v37 = vpack.c.bf16 %v1200_v32, %v1199_v16  ;;  %v1232_v38 = vsel %vm1104_vm8, %v1040_v23, %v1168_v31  ;;  %v1173_v44 = vmul.f32 0.2, %v1045_v34  ;;  %v630_v45 = vpop.f32.mrb[25].mxu0  ;;  %v758_v46 = vpop.f32.mrb[25].mxu1  ;;  %v1205_v47 = vsel %vm1077_vm9, %v1013_v24, %v1141_v33 }
 0x117   :  { %v1891_v43 = vpack.c.bf16 %v1232_v38, %v1231_v21  ;;  %vm1075_vm11 = vcmp.ge.f32.partialorder %v1011_v35, 0.0  ;;  %v1139_v48 = vmul.f32 0.2, %v1011_v35  ;;  %v1171_v49 = vmul.f32 0.2, %v1043_v39  ;;  %v2030_v52 = vpop.f32.mrb[26].mxu0 }
 0x118   :  { %1935 = vst [vmem:[%s2448_s3 + $0x40] sm:$0xff] %v1811_v37   ;;  %vm1107_vm12 = vcmp.ge.f32.partialorder %v1043_v39, 0.0  ;;  %vm1078_vm13 = vcmp.ge.f32.partialorder %v1014_v40, 0.0  ;;  %v1142_v50 = vmul.f32 0.2, %v1014_v40  ;;  %v1046_v51 = vadd.f32 %v2058_v20, %v2274_v36  ;;  %v2062_v53 = vpop.f32.mrb[26].mxu1 }
 0x119   :  { %1951 = vst [vmem:[%s2448_s3 + $0xc0] sm:$0xff] %v1891_v43   ;;  %v1237_v54 = vsel %vm1109_vm10, %v1045_v34, %v1173_v44  ;;  %v1203_v55 = vsel %vm1075_vm11, %v1011_v35, %v1139_v48  ;;  %v1012_v56 = vadd.f32 %v2274_v36, %v617_v25  ;;  %v1044_v57 = vadd.f32 %v2274_v36, %v745_v26  ;;  %v633_v58 = vpop.f32.mrb[27].mxu0  ;;  %v761_v59 = vpop.f32.mrb[27].mxu1 }
 0x11a   :  { %v1206_v60 = vsel %vm1078_vm13, %v1014_v40, %v1142_v50  ;;  %vm1110_vm14 = vcmp.ge.f32.partialorder %v1046_v51, 0.0  ;;  %v1174_v61 = vmul.f32 0.2, %v1046_v51  ;;  %v1017_v62 = vadd.f32 %v2029_v41, %v2274_v36 }
 0x11b   :  { %v1826_v63 = vpack.c.bf16 %v1206_v60, %v1205_v47  ;;  %vm1076_vm15 = vcmp.ge.f32.partialorder %v1012_v56, 0.0  ;;  %v1140_v0 = vmul.f32 0.2, %v1012_v56  ;;  %vm1108_vm0 = vcmp.ge.f32.partialorder %v1044_v57, 0.0 }
 0x11c   :  { %v1238_v1 = vsel %vm1110_vm14, %v1046_v51, %v1174_v61  ;;  %v1172_v2 = vmul.f32 0.2, %v1044_v57  ;;  %vm1081_vm1 = vcmp.ge.f32.partialorder %v1017_v62, 0.0  ;;  %v1145_v3 = vmul.f32 0.2, %v1017_v62 }
 0x11d   :  { %1938 = vst [vmem:[%s2448_s3 + $0x58] sm:$0xff] %v1826_v63   ;;  %v1906_v4 = vpack.c.bf16 %v1238_v1, %v1237_v54  ;;  %v1204_v5 = vsel %vm1076_vm15, %v1012_v56, %v1140_v0  ;;  %v1049_v6 = vadd.f32 %v2061_v42, %v2274_v36  ;;  %v1015_v7 = vadd.f32 %v2274_v36, %v630_v45  ;;  %v2033_v8 = vpop.f32.mrb[28].mxu0  ;;  %v2065_v9 = vpop.f32.mrb[28].mxu1 }
 0x11e   :  { %v1235_v10 = vsel %vm1107_vm12, %v1043_v39, %v1171_v49  ;;  %v1821_v11 = vpack.c.bf16 %v1204_v5, %v1203_v55  ;;  %v1236_v12 = vsel %vm1108_vm0, %v1044_v57, %v1172_v2  ;;  %v1047_v13 = vadd.f32 %v2274_v36, %v758_v46  ;;  %v646_v14 = vpop.f32.mrb[29].mxu0  ;;  %v774_v15 = vpop.f32.mrb[29].mxu1 }
 0x11f   :  { %1954 = vst [vmem:[%s2448_s3 + $0xd8] sm:$0xff] %v1906_v4   ;;  %v1901_v16 = vpack.c.bf16 %v1236_v12, %v1235_v10  ;;  %vm1113_vm2 = vcmp.ge.f32.partialorder %v1049_v6, 0.0  ;;  %v1177_v17 = vmul.f32 0.2, %v1049_v6  ;;  %vm1079_vm3 = vcmp.ge.f32.partialorder %v1015_v7, 0.0  ;;  %v2034_v18 = vpop.f32.mrb[30].mxu0 }
 0x120   :  { %v2066_v19 = vpop.f32.mrb[30].mxu1  ;;  %1937 = vst [vmem:[%s2448_s3 + $0x50] sm:$0xff] %v1821_v11   ;;  %v1209_v20 = vsel %vm1081_vm1, %v1017_v62, %v1145_v3  ;;  %v1143_v21 = vmul.f32 0.2, %v1015_v7  ;;  %vm1111_vm4 = vcmp.ge.f32.partialorder %v1047_v13, 0.0  ;;  %v1018_v22 = vadd.f32 %v2030_v52, %v2274_v36  ;;  %v649_v23 = vpop.f32.mrb[31].mxu0 }
 0x121   :  { %1953 = vst [vmem:[%s2448_s3 + $0xd0] sm:$0xff] %v1901_v16   ;;  %v1175_v24 = vmul.f32 0.2, %v1047_v13  ;;  %v1050_v25 = vadd.f32 %v2062_v53, %v2274_v36  ;;  %v1016_v26 = vadd.f32 %v2274_v36, %v633_v58  ;;  %v1048_v27 = vadd.f32 %v2274_v36, %v761_v59  ;;  %v777_v28 = vpop.f32.mrb[31].mxu1 }
 0x122   :  { %v1241_v29 = vsel %vm1113_vm2, %v1049_v6, %v1177_v17  ;;  %v1207_v30 = vsel %vm1079_vm3, %v1015_v7, %v1143_v21  ;;  %vm1082_vm5 = vcmp.ge.f32.partialorder %v1018_v22, 0.0  ;;  %v1146_v31 = vmul.f32 0.2, %v1018_v22 }
 0x123   :  { %vm1114_vm6 = vcmp.ge.f32.partialorder %v1050_v25, 0.0  ;;  %v1178_v32 = vmul.f32 0.2, %v1050_v25  ;;  %vm1080_vm7 = vcmp.ge.f32.partialorder %v1016_v26, 0.0  ;;  %v1144_v33 = vmul.f32 0.2, %v1016_v26 }
 0x124   :  { %v1210_v34 = vsel %vm1082_vm5, %v1018_v22, %v1146_v31  ;;  %vm1112_vm8 = vcmp.ge.f32.partialorder %v1048_v27, 0.0  ;;  %v1176_v35 = vmul.f32 0.2, %v1048_v27  ;;  %v1021_v37 = vadd.f32 %v2033_v8, %v2274_v36 }
 0x125   :  { %v1836_v38 = vpack.c.bf16 %v1210_v34, %v1209_v20  ;;  %v1242_v39 = vsel %vm1114_vm6, %v1050_v25, %v1178_v32  ;;  %v1208_v40 = vsel %vm1080_vm7, %v1016_v26, %v1144_v33  ;;  %v1053_v41 = vadd.f32 %v2065_v9, %v2274_v36 }
 0x126   :  { %v1239_v42 = vsel %vm1111_vm4, %v1047_v13, %v1175_v24  ;;  %v1916_v43 = vpack.c.bf16 %v1242_v39, %v1241_v29  ;;  %v1831_v44 = vpack.c.bf16 %v1208_v40, %v1207_v30  ;;  %v1240_v45 = vsel %vm1112_vm8, %v1048_v27, %v1176_v35 }
 0x127   :  { %1940 = vst [vmem:[%s2448_s3 + $0x68] sm:$0xff] %v1836_v38   ;;  %v1911_v46 = vpack.c.bf16 %v1240_v45, %v1239_v42  ;;  %vm1085_vm9 = vcmp.ge.f32.partialorder %v1021_v37, 0.0  ;;  %v1149_v47 = vmul.f32 0.2, %v1021_v37  ;;  %v1181_v48 = vmul.f32 0.2, %v1053_v41 }
 0x128   :  { %1956 = vst [vmem:[%s2448_s3 + $0xe8] sm:$0xff] %v1916_v43   ;;  %1939 = vst [vmem:[%s2448_s3 + $0x60] sm:$0xff] %v1831_v44   ;;  %v1019_v49 = vadd.f32 %v2274_v36, %v646_v14  ;;  %v1051_v50 = vadd.f32 %v2274_v36, %v774_v15  ;;  %v1022_v51 = vadd.f32 %v2034_v18, %v2274_v36  ;;  %vm1117_vm10 = vcmp.ge.f32.partialorder %v1053_v41, 0.0 }
 0x129   :  { %v1054_v52 = vadd.f32 %v2066_v19, %v2274_v36  ;;  %1955 = vst [vmem:[%s2448_s3 + $0xe0] sm:$0xff] %v1911_v46   ;;  %v1020_v53 = vadd.f32 %v2274_v36, %v649_v23  ;;  %v1052_v54 = vadd.f32 %v2274_v36, %v777_v28  ;;  %v1213_v55 = vsel %vm1085_vm9, %v1021_v37, %v1149_v47 }
 0x12a   :  { %vm1083_vm11 = vcmp.ge.f32.partialorder %v1019_v49, 0.0  ;;  %v1147_v56 = vmul.f32 0.2, %v1019_v49  ;;  %v1179_v57 = vmul.f32 0.2, %v1051_v50  ;;  %vm1086_vm12 = vcmp.ge.f32.partialorder %v1022_v51, 0.0 }
 0x12b   :  { %v1150_v58 = vmul.f32 0.2, %v1022_v51  ;;  %vm1118_vm13 = vcmp.ge.f32.partialorder %v1054_v52, 0.0  ;;  %v1182_v59 = vmul.f32 0.2, %v1054_v52  ;;  %v1245_v60 = vsel %vm1117_vm10, %v1053_v41, %v1181_v48 }
 0x12c   :  { %vm1115_vm14 = vcmp.ge.f32.partialorder %v1051_v50, 0.0  ;;  %vm1084_vm15 = vcmp.ge.f32.partialorder %v1020_v53, 0.0  ;;  %v1148_v61 = vmul.f32 0.2, %v1020_v53  ;;  %vm1116_vm0 = vcmp.ge.f32.partialorder %v1052_v54, 0.0 }
 0x12d   :  { %v1214_v62 = vsel %vm1086_vm12, %v1022_v51, %v1150_v58  ;;  %v1246_v63 = vsel %vm1118_vm13, %v1054_v52, %v1182_v59  ;;  %v1180_v0 = vmul.f32 0.2, %v1052_v54  ;;  %v1211_v1 = vsel %vm1083_vm11, %v1019_v49, %v1147_v56 }
 0x12e   :  { %v1846_v2 = vpack.c.bf16 %v1214_v62, %v1213_v55  ;;  %v1926_v3 = vpack.c.bf16 %v1246_v63, %v1245_v60  ;;  %v1212_v36 = vsel %vm1084_vm15, %v1020_v53, %v1148_v61  ;;  %v1243_v4 = vsel %vm1115_vm14, %v1051_v50, %v1179_v57 }
 0x12f   :  { %v1841_v5 = vpack.c.bf16 %v1212_v36, %v1211_v1  ;;  %v1244_v6 = vsel %vm1116_vm0, %v1052_v54, %v1180_v0 }
 0x130   :  { %1942 = vst [vmem:[%s2448_s3 + $0x78] sm:$0xff] %v1846_v2   ;;  %1958 = vst [vmem:[%s2448_s3 + $0xf8] sm:$0xff] %v1926_v3   ;;  %v1921_v7 = vpack.c.bf16 %v1244_v6, %v1243_v4 }
 0x131   :  { %1941 = vst [vmem:[%s2448_s3 + $0x70] sm:$0xff] %v1841_v5  }
 0x132   :  { %1957 = vst [vmem:[%s2448_s3 + $0xf0] sm:$0xff] %v1921_v7  }

// kernel: discriminator_forward.10
= control target key start
LH: loop header
LB: loop body
LE: loop exit
PB: predicated region body
PF: predicated region fallthrough
CT: control target
= control target key end

     0   :  { %s443_s0 = inlined_call_operand.vmem [shape: bf16[128,128], index: 0, kind: input, shape index: {}]   ;;  %s444_s1 = inlined_call_operand.vmem [shape: f32[2,128], index: 1, kind: input, shape index: {}]   ;;  %s445_s2 = inlined_call_operand.vmem [shape: bf16[128,128], index: 2, kind: output, shape index: {}]  }
   0x1   :  { %v252_v0 = vld [vmem:[%s443_s0] sm:$0xff]   ;;  %v323_v4 = vld [vmem:[%s443_s0 + $0x8] sm:$0xff]   ;;  %v324_v5 = vld [vmem:[%s443_s0 + $0x10] sm:$0xff]  }
   0x2   :  { %v358_v1 = vld [vmem:[%s444_s1] ss:$0 sm:$0xff]  ;;  %v253_v2 = vunpack.c.l.bf16 %v252_v0  ;;  %v254_v3 = vunpack.c.h.bf16 %v252_v0  ;;  %v325_v6 = vld [vmem:[%s443_s0 + $0x18] sm:$0xff]   ;;  %v372_v7 = vld [vmem:[%s444_s1 + $0x1] ss:$0 sm:$0xff]  ;;  %v257_v8 = vunpack.c.l.bf16 %v323_v4  ;;  %v258_v9 = vunpack.c.h.bf16 %v323_v4 }
   0x3   :  { %v261_v10 = vunpack.c.l.bf16 %v324_v5  ;;  %v262_v11 = vunpack.c.h.bf16 %v324_v5  ;;  %v265_v14 = vunpack.c.l.bf16 %v325_v6  ;;  %v266_v15 = vunpack.c.h.bf16 %v325_v6  ;;  %v326_v34 = vld [vmem:[%s443_s0 + $0x20] sm:$0xff]   ;;  %v327_v35 = vld [vmem:[%s443_s0 + $0x28] sm:$0xff]   ;;  %v328_v48 = vld [vmem:[%s443_s0 + $0x30] sm:$0xff]  }
   0x4   :  { %v48_v12 = vmul.f32 %v253_v2, %v358_v1  ;;  %v49_v13 = vmul.f32 %v254_v3, %v358_v1  ;;  %v50_v16 = vmul.f32 %v257_v8, %v358_v1  ;;  %v51_v17 = vmul.f32 %v258_v9, %v358_v1  ;;  %v329_v4 = vld [vmem:[%s443_s0 + $0x38] sm:$0xff]  }
   0x5   :  { %v52_v18 = vmul.f32 %v261_v10, %v358_v1  ;;  %v53_v19 = vmul.f32 %v262_v11, %v358_v1  ;;  %v54_v22 = vmul.f32 %v265_v14, %v358_v1  ;;  %v55_v23 = vmul.f32 %v266_v15, %v358_v1 }
   0x6   :  { %v69_v20 = vadd.f32 %v372_v7, %v48_v12  ;;  %v70_v21 = vadd.f32 %v372_v7, %v49_v13  ;;  %v71_v24 = vadd.f32 %v372_v7, %v50_v16  ;;  %v72_v25 = vadd.f32 %v372_v7, %v51_v17 }
   0x7   :  { %v73_v26 = vadd.f32 %v372_v7, %v52_v18  ;;  %v74_v27 = vadd.f32 %v372_v7, %v53_v19  ;;  %v75_v42 = vadd.f32 %v372_v7, %v54_v22  ;;  %v76_v43 = vadd.f32 %v372_v7, %v55_v23 }
   0x8   :  { %vm85_vm0 = vcmp.ge.f32.partialorder %v69_v20, 0.0  ;;  %vm86_vm1 = vcmp.ge.f32.partialorder %v70_v21, 0.0  ;;  %v101_v28 = vmul.f32 0.2, %v69_v20  ;;  %v102_v29 = vmul.f32 0.2, %v70_v21 }
   0x9   :  { %vm87_vm2 = vcmp.ge.f32.partialorder %v71_v24, 0.0  ;;  %vm88_vm3 = vcmp.ge.f32.partialorder %v72_v25, 0.0  ;;  %v103_v30 = vmul.f32 0.2, %v71_v24  ;;  %v104_v31 = vmul.f32 0.2, %v72_v25 }
   0xa   :  { %v117_v32 = vsel %vm85_vm0, %v69_v20, %v101_v28  ;;  %v118_v33 = vsel %vm86_vm1, %v70_v21, %v102_v29  ;;  %vm89_vm4 = vcmp.ge.f32.partialorder %v73_v26, 0.0  ;;  %vm90_vm5 = vcmp.ge.f32.partialorder %v74_v27, 0.0 }
   0xb   :  { %v286_v36 = vpack.c.bf16 %v118_v33, %v117_v32  ;;  %v119_v37 = vsel %vm87_vm2, %v71_v24, %v103_v30  ;;  %v120_v38 = vsel %vm88_vm3, %v72_v25, %v104_v31  ;;  %v105_v39 = vmul.f32 0.2, %v73_v26 }
   0xc   :  { %v291_v40 = vpack.c.bf16 %v120_v38, %v119_v37  ;;  %v106_v41 = vmul.f32 0.2, %v74_v27  ;;  %v269_v45 = vunpack.c.l.bf16 %v326_v34  ;;  %v270_v46 = vunpack.c.h.bf16 %v326_v34 }
   0xd   :  { %287 = vst [vmem:[%s445_s2] sm:$0xff] %v286_v36   ;;  %v121_v44 = vsel %vm89_vm4, %v73_v26, %v105_v39  ;;  %v273_v47 = vunpack.c.l.bf16 %v327_v35  ;;  %vm91_vm6 = vcmp.ge.f32.partialorder %v75_v42, 0.0  ;;  %vm92_vm7 = vcmp.ge.f32.partialorder %v76_v43, 0.0 }
   0xe   :  { %330 = vst [vmem:[%s445_s2 + $0x8] sm:$0xff] %v291_v40   ;;  %v122_v49 = vsel %vm90_vm5, %v74_v27, %v106_v41  ;;  %v107_v50 = vmul.f32 0.2, %v75_v42  ;;  %v108_v52 = vmul.f32 0.2, %v76_v43  ;;  %v56_v53 = vmul.f32 %v269_v45, %v358_v1 }
   0xf   :  { %v296_v51 = vpack.c.bf16 %v122_v49, %v121_v44  ;;  %v57_v54 = vmul.f32 %v270_v46, %v358_v1  ;;  %v274_v56 = vunpack.c.h.bf16 %v327_v35  ;;  %v58_v57 = vmul.f32 %v273_v47, %v358_v1 }
  0x10   :  { %v123_v55 = vsel %vm91_vm6, %v75_v42, %v107_v50  ;;  %v277_v58 = vunpack.c.l.bf16 %v328_v48  ;;  %v124_v59 = vsel %vm92_vm7, %v76_v43, %v108_v52  ;;  %v77_v60 = vadd.f32 %v372_v7, %v56_v53 }
  0x11   :  { %331 = vst [vmem:[%s445_s2 + $0x10] sm:$0xff] %v296_v51   ;;  %v78_v61 = vadd.f32 %v372_v7, %v57_v54  ;;  %v278_v62 = vunpack.c.h.bf16 %v328_v48  ;;  %v301_v63 = vpack.c.bf16 %v124_v59, %v123_v55  ;;  %v59_v0 = vmul.f32 %v274_v56, %v358_v1 }
  0x12   :  { %v79_v2 = vadd.f32 %v372_v7, %v58_v57  ;;  %v60_v3 = vmul.f32 %v277_v58, %v358_v1  ;;  %vm93_vm8 = vcmp.ge.f32.partialorder %v77_v60, 0.0  ;;  %v109_v5 = vmul.f32 0.2, %v77_v60 }
  0x13   :  { %vm94_vm9 = vcmp.ge.f32.partialorder %v78_v61, 0.0  ;;  %v110_v6 = vmul.f32 0.2, %v78_v61  ;;  %332 = vst [vmem:[%s445_s2 + $0x18] sm:$0xff] %v301_v63   ;;  %v80_v8 = vadd.f32 %v372_v7, %v59_v0  ;;  %v61_v10 = vmul.f32 %v278_v62, %v358_v1 }
  0x14   :  { %vm95_vm10 = vcmp.ge.f32.partialorder %v79_v2, 0.0  ;;  %v111_v9 = vmul.f32 0.2, %v79_v2  ;;  %v125_v11 = vsel %vm93_vm8, %v77_v60, %v109_v5  ;;  %v81_v13 = vadd.f32 %v372_v7, %v60_v3 }
  0x15   :  { %v126_v12 = vsel %vm94_vm9, %v78_v61, %v110_v6  ;;  %v281_v14 = vunpack.c.l.bf16 %v329_v4  ;;  %vm96_vm11 = vcmp.ge.f32.partialorder %v80_v8, 0.0  ;;  %v112_v16 = vmul.f32 0.2, %v80_v8 }
  0x16   :  { %v306_v15 = vpack.c.bf16 %v126_v12, %v125_v11  ;;  %v127_v17 = vsel %vm95_vm10, %v79_v2, %v111_v9  ;;  %v82_v18 = vadd.f32 %v372_v7, %v61_v10  ;;  %vm97_vm12 = vcmp.ge.f32.partialorder %v81_v13, 0.0 }
  0x17   :  { %v113_v19 = vmul.f32 0.2, %v81_v13  ;;  %v282_v20 = vunpack.c.h.bf16 %v329_v4  ;;  %v128_v21 = vsel %vm96_vm11, %v80_v8, %v112_v16  ;;  %v62_v22 = vmul.f32 %v281_v14, %v358_v1 }
  0x18   :  { %333 = vst [vmem:[%s445_s2 + $0x20] sm:$0xff] %v306_v15   ;;  %v311_v23 = vpack.c.bf16 %v128_v21, %v127_v17  ;;  %vm98_vm13 = vcmp.ge.f32.partialorder %v82_v18, 0.0  ;;  %v114_v24 = vmul.f32 0.2, %v82_v18 }
  0x19   :  { %v129_v25 = vsel %vm97_vm12, %v81_v13, %v113_v19  ;;  %v63_v26 = vmul.f32 %v282_v20, %v358_v1  ;;  %v83_v27 = vadd.f32 %v372_v7, %v62_v22 }
  0x1a   :  { %334 = vst [vmem:[%s445_s2 + $0x28] sm:$0xff] %v311_v23   ;;  %v130_v28 = vsel %vm98_vm13, %v82_v18, %v114_v24 }
  0x1b   :  { %v316_v29 = vpack.c.bf16 %v130_v28, %v129_v25  ;;  %v84_v30 = vadd.f32 %v372_v7, %v63_v26  ;;  %vm99_vm14 = vcmp.ge.f32.partialorder %v83_v27, 0.0  ;;  %v115_v31 = vmul.f32 0.2, %v83_v27 }
  0x1d   :  { %335 = vst [vmem:[%s445_s2 + $0x30] sm:$0xff] %v316_v29   ;;  %vm100_vm15 = vcmp.ge.f32.partialorder %v84_v30, 0.0  ;;  %v116_v32 = vmul.f32 0.2, %v84_v30  ;;  %v131_v33 = vsel %vm99_vm14, %v83_v27, %v115_v31 }
  0x1f   :  { %v132_v1 = vsel %vm100_vm15, %v84_v30, %v116_v32 }
  0x20   :  { %v321_v34 = vpack.c.bf16 %v132_v1, %v131_v33 }
  0x22   :  { %336 = vst [vmem:[%s445_s2 + $0x38] sm:$0xff] %v321_v34  }

// kernel: discriminator_forward.9
= control target key start
LH: loop header
LB: loop body
LE: loop exit
PB: predicated region body
PF: predicated region fallthrough
CT: control target
= control target key end

     0   :  { %s2542_s1 = inlined_call_operand.vmem [shape: bf16[1024,128], index: 1, kind: input, shape index: {}]   ;;  %s2543_s0 = inlined_call_operand.vmem [shape: bf16[128,1024], index: 0, kind: input, shape index: {}]   ;;  %s2544_s2 = inlined_call_operand.vmem [shape: bf16[128,128], index: 2, kind: output, shape index: {0}]   ;;  %s2545_s3 = inlined_call_operand.vmem [shape: f32[1,2,128], index: 3, kind: output, shape index: {1}]  }
   0x1   :  { %v1996_v0 = vld [vmem:[%s2542_s1 + $0x40] sm:$0xff]   ;;  %v2000_v4 = vld [vmem:[%s2542_s1 + $0x48] sm:$0xff]   ;;  %v2004_v8 = vld [vmem:[%s2542_s1 + $0x50] sm:$0xff]  }
   0x2   :  { %v1997_v1 = vld [vmem:[%s2542_s1 + $0xc0] sm:$0xff]   ;;  %1740 = vmatprep.subr.bf16.mxu0 %v1996_v0  ;;  %v2001_v5 = vld [vmem:[%s2542_s1 + $0xc8] sm:$0xff]   ;;  %v2005_v9 = vld [vmem:[%s2542_s1 + $0xd0] sm:$0xff]  }
   0x3   :  { %v1998_v2 = vld [vmem:[%s2542_s1] sm:$0xff]   ;;  %1804 = vmatprep.subr.bf16.mxu1 %v1997_v1  ;;  %v2002_v6 = vld [vmem:[%s2542_s1 + $0x8] sm:$0xff]   ;;  %v2006_v10 = vld [vmem:[%s2542_s1 + $0x10] sm:$0xff]  }
   0x4   :  { %v1999_v3 = vld [vmem:[%s2542_s1 + $0x80] sm:$0xff]   ;;  %1741 = vmatpush3.bf16.msra.mxu0 %v1998_v2  ;;  %v2003_v7 = vld [vmem:[%s2542_s1 + $0x88] sm:$0xff]   ;;  %v2007_v11 = vld [vmem:[%s2542_s1 + $0x90] sm:$0xff]  }
   0x5   :  { %1805 = vmatpush3.bf16.msra.mxu1 %v1999_v3  ;;  %1742 = vmatprep.subr.bf16.mxu0 %v2000_v4  ;;  %v2008_v12 = vld [vmem:[%s2542_s1 + $0x58] sm:$0xff]   ;;  %v2012_v16 = vld [vmem:[%s2542_s1 + $0x60] sm:$0xff]   ;;  %v2016_v20 = vld [vmem:[%s2542_s1 + $0x68] sm:$0xff]  }
   0x6   :  { %1806 = vmatprep.subr.bf16.mxu1 %v2001_v5  ;;  %v2009_v13 = vld [vmem:[%s2542_s1 + $0xd8] sm:$0xff]   ;;  %v2013_v17 = vld [vmem:[%s2542_s1 + $0xe0] sm:$0xff]   ;;  %v2017_v21 = vld [vmem:[%s2542_s1 + $0xe8] sm:$0xff]  }
   0x7   :  { %v2010_v14 = vld [vmem:[%s2542_s1 + $0x18] sm:$0xff]   ;;  %v2014_v18 = vld [vmem:[%s2542_s1 + $0x20] sm:$0xff]   ;;  %v2018_v22 = vld [vmem:[%s2542_s1 + $0x28] sm:$0xff]  }
   0x8   :  { %1743 = vmatpush3.bf16.msra.mxu0 %v2002_v6  ;;  %v2011_v15 = vld [vmem:[%s2542_s1 + $0x98] sm:$0xff]   ;;  %v2015_v19 = vld [vmem:[%s2542_s1 + $0xa0] sm:$0xff]   ;;  %v2019_v23 = vld [vmem:[%s2542_s1 + $0xa8] sm:$0xff]  }
   0x9   :  { %1807 = vmatpush3.bf16.msra.mxu1 %v2003_v7  ;;  %1744 = vmatprep.subr.bf16.mxu0 %v2004_v8  ;;  %v2020_v24 = vld [vmem:[%s2542_s1 + $0x70] sm:$0xff]   ;;  %v2024_v28 = vld [vmem:[%s2542_s1 + $0x78] sm:$0xff]   ;;  %v50_v32 = vld [vmem:[%s2543_s0] sm:$0xff] }
   0xa   :  { %1808 = vmatprep.subr.bf16.mxu1 %v2005_v9  ;;  %v2021_v25 = vld [vmem:[%s2542_s1 + $0xf0] sm:$0xff]   ;;  %v2025_v29 = vld [vmem:[%s2542_s1 + $0xf8] sm:$0xff]   ;;  %v54_v33 = vld [vmem:[%s2543_s0 + $0x20] sm:$0xff] }
   0xb   :  { %v2022_v26 = vld [vmem:[%s2542_s1 + $0x30] sm:$0xff]   ;;  %v2026_v30 = vld [vmem:[%s2542_s1 + $0x38] sm:$0xff]   ;;  %v51_v34 = vld [vmem:[%s2543_s0 + $0x8] sm:$0xff]  ;;  %v1533_v35 = vcombine.low %v50_v32, %v54_v33  ;;  %v1534_v36 = vcombine.high %v50_v32, %v54_v33 }
   0xc   :  { %1745 = vmatpush3.bf16.msra.mxu0 %v2006_v10  ;;  %v2023_v27 = vld [vmem:[%s2542_s1 + $0xb0] sm:$0xff]   ;;  %v2027_v31 = vld [vmem:[%s2542_s1 + $0xb8] sm:$0xff]   ;;  %v55_v37 = vld [vmem:[%s2543_s0 + $0x28] sm:$0xff] }
   0xd   :  { %1809 = vmatpush3.bf16.msra.mxu1 %v2007_v11  ;;  %1746 = vmatprep.subr.bf16.mxu0 %v2008_v12  ;;  %v1535_v38 = vcombine.low %v51_v34, %v55_v37  ;;  %v1536_v39 = vcombine.high %v51_v34, %v55_v37  ;;  %v2028_v40 = vld [vmem:[%s2542_s1 + $0x140] sm:$0xff]   ;;  %v59_v47 = vld [vmem:[%s2543_s0 + $0x48] sm:$0xff]  ;;  %v2036_v62 = vld [vmem:[%s2542_s1 + $0x150] sm:$0xff]  }
   0xe   :  { %1810 = vmatprep.subr.bf16.mxu1 %v2009_v13  ;;  %978 = vmatprep.mubr.bf16.mxu0 %v1534_v36  ;;  %v2029_v41 = vld [vmem:[%s2542_s1 + $0x100] sm:$0xff]   ;;  %v63_v48 = vld [vmem:[%s2543_s0 + $0x68] sm:$0xff]  ;;  %v2037_v63 = vld [vmem:[%s2542_s1 + $0x110] sm:$0xff]  }
   0xf   :  { %1075 = vmatprep.mubr.bf16.mxu1 %v1536_v39  ;;  %v2030_v42 = vld [vmem:[%s2542_s1 + $0x1c0] sm:$0xff]   ;;  %v1544_v49 = vcombine.high %v59_v47, %v63_v48  ;;  %v2032_v50 = vld [vmem:[%s2542_s1 + $0x148] sm:$0xff]   ;;  %v1543_v53 = vcombine.low %v59_v47, %v63_v48  ;;  %v2038_v0 = vld [vmem:[%s2542_s1 + $0x1d0] sm:$0xff]  }
  0x10   :  { %1747 = vmatpush3.bf16.msra.mxu0 %v2010_v14  ;;  %v2031_v43 = vld [vmem:[%s2542_s1 + $0x180] sm:$0xff]   ;;  %v2033_v52 = vld [vmem:[%s2542_s1 + $0x108] sm:$0xff]   ;;  %v2039_v1 = vld [vmem:[%s2542_s1 + $0x190] sm:$0xff]  }
  0x11   :  { %1811 = vmatpush3.bf16.msra.mxu1 %v2011_v15  ;;  %1748 = vmatprep.subr.bf16.mxu0 %v2012_v16  ;;  %v58_v44 = vld [vmem:[%s2543_s0 + $0x40] sm:$0xff]  ;;  %v2034_v54 = vld [vmem:[%s2542_s1 + $0x1c8] sm:$0xff]   ;;  %v2040_v10 = vld [vmem:[%s2542_s1 + $0x158] sm:$0xff]  }
  0x12   :  { %1812 = vmatprep.subr.bf16.mxu1 %v2013_v17  ;;  %v62_v45 = vld [vmem:[%s2543_s0 + $0x60] sm:$0xff]  ;;  %v2035_v55 = vld [vmem:[%s2542_s1 + $0x188] sm:$0xff]   ;;  %v2041_v11 = vld [vmem:[%s2542_s1 + $0x118] sm:$0xff]  }
  0x13   :  { %v1542_v46 = vcombine.high %v58_v44, %v62_v45  ;;  %v1541_v51 = vcombine.low %v58_v44, %v62_v45  ;;  %v66_v56 = vld [vmem:[%s2543_s0 + $0x80] sm:$0xff]  ;;  %v67_v58 = vld [vmem:[%s2543_s0 + $0x88] sm:$0xff]  ;;  %v2042_v12 = vld [vmem:[%s2542_s1 + $0x1d8] sm:$0xff]  }
  0x14   :  { %1749 = vmatpush3.bf16.msra.mxu0 %v2014_v18  ;;  %v70_v57 = vld [vmem:[%s2543_s0 + $0xa0] sm:$0xff]  ;;  %v71_v59 = vld [vmem:[%s2543_s0 + $0xa8] sm:$0xff]  ;;  %v2043_v13 = vld [vmem:[%s2542_s1 + $0x198] sm:$0xff]  }
  0x15   :  { %1813 = vmatpush3.bf16.msra.mxu1 %v2015_v19  ;;  %1750 = vmatprep.subr.bf16.mxu0 %v2016_v20  ;;  %v1550_v60 = vcombine.high %v66_v56, %v70_v57  ;;  %v1552_v61 = vcombine.high %v67_v58, %v71_v59  ;;  %v1549_v2 = vcombine.low %v66_v56, %v70_v57  ;;  %v74_v3 = vld [vmem:[%s2543_s0 + $0xc0] sm:$0xff]  ;;  %v75_v5 = vld [vmem:[%s2543_s0 + $0xc8] sm:$0xff]  ;;  %v2053_v39 = vld [vmem:[%s2542_s1 + $0x130] sm:$0xff]  }
  0x16   :  { %1814 = vmatprep.subr.bf16.mxu1 %v2017_v21  ;;  %v78_v4 = vld [vmem:[%s2543_s0 + $0xe0] sm:$0xff]  ;;  %v1551_v6 = vcombine.low %v67_v58, %v71_v59  ;;  %v79_v8 = vld [vmem:[%s2543_s0 + $0xe8] sm:$0xff]  ;;  %v2057_v48 = vld [vmem:[%s2542_s1 + $0x138] sm:$0xff]  }
  0x17   :  { %v1558_v7 = vcombine.high %v74_v3, %v78_v4  ;;  %v1560_v9 = vcombine.high %v75_v5, %v79_v8  ;;  %v82_v14 = vld [vmem:[%s2543_s0 + $0x100] sm:$0xff]  ;;  %v83_v16 = vld [vmem:[%s2543_s0 + $0x108] sm:$0xff]  ;;  %v1557_v19 = vcombine.low %v74_v3, %v78_v4  ;;  %v1559_v21 = vcombine.low %v75_v5, %v79_v8  ;;  %v61_v8 = vld [vmem:[%s2543_s0 + $0x58] sm:$0xff] }
  0x18   :  { %1751 = vmatpush3.bf16.msra.mxu0 %v2018_v22  ;;  %v86_v15 = vld [vmem:[%s2543_s0 + $0x120] sm:$0xff]  ;;  %v87_v17 = vld [vmem:[%s2543_s0 + $0x128] sm:$0xff] }
  0x19   :  { %1815 = vmatpush3.bf16.msra.mxu1 %v2019_v23  ;;  %1752 = vmatprep.subr.bf16.mxu0 %v2020_v24  ;;  %v2044_v18 = vld [vmem:[%s2542_s1 + $0x160] sm:$0xff]   ;;  %v1566_v22 = vcombine.high %v82_v14, %v86_v15  ;;  %v1568_v24 = vcombine.high %v83_v16, %v87_v17  ;;  %v2050_v32 = vld [vmem:[%s2542_s1 + $0x1e8] sm:$0xff]   ;;  %v1565_v34 = vcombine.low %v82_v14, %v86_v15  ;;  %v68_v14 = vld [vmem:[%s2543_s0 + $0x90] sm:$0xff] }
  0x1a   :  { %1816 = vmatprep.subr.bf16.mxu1 %v2021_v25  ;;  %v2045_v20 = vld [vmem:[%s2542_s1 + $0x120] sm:$0xff]   ;;  %v2051_v33 = vld [vmem:[%s2542_s1 + $0x1a8] sm:$0xff]   ;;  %v72_v15 = vld [vmem:[%s2543_s0 + $0xb0] sm:$0xff] }
  0x1b   :  { %v2046_v23 = vld [vmem:[%s2542_s1 + $0x1e0] sm:$0xff]   ;;  %v99_v44 = vld [vmem:[%s2543_s0 + $0x188] sm:$0xff] }
  0x1c   :  { %1753 = vmatpush3.bf16.msra.mxu0 %v2022_v26  ;;  %v2047_v25 = vld [vmem:[%s2542_s1 + $0x1a0] sm:$0xff]   ;;  %v103_v45 = vld [vmem:[%s2543_s0 + $0x1a8] sm:$0xff] }
  0x1d   :  { %1817 = vmatpush3.bf16.msra.mxu1 %v2023_v27  ;;  %1754 = vmatprep.subr.bf16.mxu0 %v2024_v28  ;;  %v90_v26 = vld [vmem:[%s2543_s0 + $0x140] sm:$0xff]  ;;  %v2048_v28 = vld [vmem:[%s2542_s1 + $0x168] sm:$0xff]   ;;  %v1583_v59 = vcombine.low %v99_v44, %v103_v45 }
  0x1e   :  { %1818 = vmatprep.subr.bf16.mxu1 %v2025_v29  ;;  %v94_v27 = vld [vmem:[%s2543_s0 + $0x160] sm:$0xff]  ;;  %v91_v29 = vld [vmem:[%s2543_s0 + $0x148] sm:$0xff] }
  0x1f   :  { %v1574_v36 = vcombine.high %v90_v26, %v94_v27  ;;  %v1573_v47 = vcombine.low %v90_v26, %v94_v27  ;;  %v107_v56 = vld [vmem:[%s2543_s0 + $0x1c8] sm:$0xff]  ;;  %v1553_v26 = vcombine.low %v68_v14, %v72_v15 }
  0x20   :  { %1755 = vmatpush3.bf16.msra.mxu0 %v2026_v30  ;;  %v95_v30 = vld [vmem:[%s2543_s0 + $0x168] sm:$0xff] }
  0x21   :  { %1819 = vmatpush3.bf16.msra.mxu1 %v2027_v31  ;;  %1868 = vmatprep.subr.bf16.mxu0 %v2028_v40  ;;  %v2049_v31 = vld [vmem:[%s2542_s1 + $0x128] sm:$0xff]   ;;  %v1576_v37 = vcombine.high %v91_v29, %v95_v30  ;;  %v2054_v40 = vld [vmem:[%s2542_s1 + $0x1f0] sm:$0xff]  }
  0x22   :  { %1932 = vmatprep.subr.bf16.mxu1 %v2030_v42  ;;  %v102_v42 = vld [vmem:[%s2543_s0 + $0x1a0] sm:$0xff]  ;;  %v111_v57 = vld [vmem:[%s2543_s0 + $0x1e8] sm:$0xff] }
  0x23   :  { %979 = vmatmul.mubr.bf16.vlgmr.msra.gmra.mrb[0].mxu0 %v1533_v35  ;;  %v1567_v35 = vcombine.low %v83_v16, %v87_v17  ;;  %v1591_v3 = vcombine.low %v107_v56, %v111_v57  ;;  %v69_v16 = vld [vmem:[%s2543_s0 + $0x98] sm:$0xff] }
  0x24   :  { %1076 = vmatmul.mubr.bf16.vlgmr.msra.gmra.mrb[0].mxu1 %v1535_v38  ;;  %1869 = vmatpush3.bf16.msra.mxu0 %v2029_v41  ;;  %v2052_v38 = vld [vmem:[%s2542_s1 + $0x170] sm:$0xff]   ;;  %v98_v41 = vld [vmem:[%s2543_s0 + $0x180] sm:$0xff]  ;;  %v73_v17 = vld [vmem:[%s2543_s0 + $0xb8] sm:$0xff] }
  0x25   :  { %1933 = vmatpush3.bf16.msra.mxu1 %v2031_v43  ;;  %986 = vmatprep.mubr.bf16.mxu0 %v1542_v46  ;;  %v2055_v43 = vld [vmem:[%s2542_s1 + $0x1b0] sm:$0xff]   ;;  %v2056_v46 = vld [vmem:[%s2542_s1 + $0x178] sm:$0xff]   ;;  %v1581_v58 = vcombine.low %v98_v41, %v102_v42  ;;  %v1555_v27 = vcombine.low %v69_v16, %v73_v17 }
  0x26   :  { %1083 = vmatprep.mubr.bf16.mxu1 %v1544_v49  ;;  %1870 = vmatprep.subr.bf16.mxu0 %v2032_v50  ;;  %v1575_v49 = vcombine.low %v91_v29, %v95_v30  ;;  %v1582_v50 = vcombine.high %v98_v41, %v102_v42  ;;  %v84_v30 = vld [vmem:[%s2543_s0 + $0x110] sm:$0xff]  ;;  %v97_v41 = vld [vmem:[%s2543_s0 + $0x178] sm:$0xff] }
  0x27   :  { %1934 = vmatprep.subr.bf16.mxu1 %v2034_v54  ;;  %v106_v54 = vld [vmem:[%s2543_s0 + $0x1c0] sm:$0xff] }
  0x28   :  { %1871 = vmatpush3.bf16.msra.mxu0 %v2033_v52  ;;  %v1584_v52 = vcombine.high %v99_v44, %v103_v45 }
  0x29   :  { %1935 = vmatpush3.bf16.msra.mxu1 %v2035_v55  ;;  %1872 = vmatprep.subr.bf16.mxu0 %v2036_v62  ;;  %v110_v55 = vld [vmem:[%s2543_s0 + $0x1e0] sm:$0xff]  ;;  %v52_v62 = vld [vmem:[%s2543_s0 + $0x10] sm:$0xff] }
  0x2a   :  { %1936 = vmatprep.subr.bf16.mxu1 %v2038_v0  ;;  %v53_v0 = vld [vmem:[%s2543_s0 + $0x18] sm:$0xff] }
  0x2b   :  { %987 = vmatmul.mubr.bf16.gmra.mrb[4].mxu0 %v1541_v51  ;;  %v2058_v51 = vld [vmem:[%s2542_s1 + $0x1f8] sm:$0xff]  }
  0x2c   :  { %1084 = vmatmul.mubr.bf16.gmra.mrb[4].mxu1 %v1543_v53  ;;  %994 = vmatprep.mubr.bf16.mxu0 %v1550_v60  ;;  %v2059_v53 = vld [vmem:[%s2542_s1 + $0x1b8] sm:$0xff]   ;;  %v1590_v60 = vcombine.high %v106_v54, %v110_v55 }
  0x2d   :  { %1091 = vmatprep.mubr.bf16.mxu1 %v1552_v61  ;;  %1873 = vmatpush3.bf16.msra.mxu0 %v2037_v63  ;;  %v1592_v61 = vcombine.high %v107_v56, %v111_v57  ;;  %v56_v63 = vld [vmem:[%s2543_s0 + $0x30] sm:$0xff]  ;;  %v109_v56 = vld [vmem:[%s2543_s0 + $0x1d8] sm:$0xff] }
  0x2e   :  { %1937 = vmatpush3.bf16.msra.mxu1 %v2039_v1  ;;  %1874 = vmatprep.subr.bf16.mxu0 %v2040_v10  ;;  %v57_v1 = vld [vmem:[%s2543_s0 + $0x38] sm:$0xff]  ;;  %v1538_v4 = vcombine.high %v52_v62, %v56_v63  ;;  %v1537_v10 = vcombine.low %v52_v62, %v56_v63 }
  0x2f   :  { %1938 = vmatprep.subr.bf16.mxu1 %v2042_v12  ;;  %v1540_v5 = vcombine.high %v53_v0, %v57_v1  ;;  %v113_v57 = vld [vmem:[%s2543_s0 + $0x1f8] sm:$0xff] }
  0x30   :  { %v1595_v63 = vcombine.low %v109_v56, %v113_v57 }
  0x31   :  { %1875 = vmatpush3.bf16.msra.mxu0 %v2041_v11  ;;  %v1539_v11 = vcombine.low %v53_v0, %v57_v1 }
  0x32   :  { %1939 = vmatpush3.bf16.msra.mxu1 %v2043_v13  ;;  %1876 = vmatprep.subr.bf16.mxu0 %v2044_v18 }
  0x33   :  { %995 = vmatmul.mubr.bf16.gmra.mrb[8].mxu0 %v1549_v2  ;;  %1940 = vmatprep.subr.bf16.mxu1 %v2046_v23  ;;  %v1589_v2 = vcombine.low %v106_v54, %v110_v55  ;;  %v80_v23 = vld [vmem:[%s2543_s0 + $0xf0] sm:$0xff] }
  0x34   :  { %1092 = vmatmul.mubr.bf16.gmra.mrb[8].mxu1 %v1551_v6  ;;  %1002 = vmatprep.mubr.bf16.mxu0 %v1558_v7  ;;  %v60_v6 = vld [vmem:[%s2543_s0 + $0x50] sm:$0xff] }
  0x35   :  { %1099 = vmatprep.mubr.bf16.mxu1 %v1560_v9  ;;  %1877 = vmatpush3.bf16.msra.mxu0 %v2045_v20  ;;  %v64_v7 = vld [vmem:[%s2543_s0 + $0x70] sm:$0xff]  ;;  %v65_v9 = vld [vmem:[%s2543_s0 + $0x78] sm:$0xff]  ;;  %v1554_v20 = vcombine.high %v68_v14, %v72_v15 }
  0x36   :  { %1941 = vmatpush3.bf16.msra.mxu1 %v2047_v25  ;;  %1878 = vmatprep.subr.bf16.mxu0 %v2048_v28  ;;  %v1546_v12 = vcombine.high %v60_v6, %v64_v7  ;;  %v1548_v13 = vcombine.high %v61_v8, %v65_v9  ;;  %v1545_v18 = vcombine.low %v60_v6, %v64_v7  ;;  %v81_v25 = vld [vmem:[%s2543_s0 + $0xf8] sm:$0xff]  ;;  %v108_v54 = vld [vmem:[%s2543_s0 + $0x1d0] sm:$0xff] }
  0x37   :  { %1942 = vmatprep.subr.bf16.mxu1 %v2050_v32  ;;  %v85_v32 = vld [vmem:[%s2543_s0 + $0x118] sm:$0xff]  ;;  %v112_v55 = vld [vmem:[%s2543_s0 + $0x1f0] sm:$0xff] }
  0x38   :  { %v1593_v62 = vcombine.low %v108_v54, %v112_v55 }
  0x39   :  { %1879 = vmatpush3.bf16.msra.mxu0 %v2049_v31  ;;  %v88_v31 = vld [vmem:[%s2543_s0 + $0x130] sm:$0xff] }
  0x3a   :  { %1943 = vmatpush3.bf16.msra.mxu1 %v2051_v33  ;;  %1880 = vmatprep.subr.bf16.mxu0 %v2052_v38  ;;  %v89_v33 = vld [vmem:[%s2543_s0 + $0x138] sm:$0xff]  ;;  %v92_v38 = vld [vmem:[%s2543_s0 + $0x150] sm:$0xff]  ;;  %v1569_v42 = vcombine.low %v84_v30, %v88_v31 }
  0x3b   :  { %1003 = vmatmul.mubr.bf16.gmra.mrb[12].mxu0 %v1557_v19  ;;  %1944 = vmatprep.subr.bf16.mxu1 %v2054_v40  ;;  %v1547_v19 = vcombine.low %v61_v8, %v65_v9  ;;  %v93_v40 = vld [vmem:[%s2543_s0 + $0x158] sm:$0xff] }
  0x3c   :  { %1100 = vmatmul.mubr.bf16.gmra.mrb[12].mxu1 %v1559_v21  ;;  %1010 = vmatprep.mubr.bf16.mxu0 %v1566_v22  ;;  %v1556_v21 = vcombine.high %v69_v16, %v73_v17  ;;  %v76_v22 = vld [vmem:[%s2543_s0 + $0xd0] sm:$0xff]  ;;  %v1580_v45 = vcombine.high %v93_v40, %v97_v41 }
  0x3d   :  { %1107 = vmatprep.mubr.bf16.mxu1 %v1568_v24  ;;  %1881 = vmatpush3.bf16.msra.mxu0 %v2053_v39  ;;  %v77_v24 = vld [vmem:[%s2543_s0 + $0xd8] sm:$0xff]  ;;  %v1562_v28 = vcombine.high %v76_v22, %v80_v23  ;;  %v96_v39 = vld [vmem:[%s2543_s0 + $0x170] sm:$0xff] }
  0x3e   :  { %1945 = vmatpush3.bf16.msra.mxu1 %v2055_v43  ;;  %1882 = vmatprep.subr.bf16.mxu0 %v2056_v46  ;;  %v1564_v29 = vcombine.high %v77_v24, %v81_v25  ;;  %v1571_v43 = vcombine.low %v85_v32, %v89_v33  ;;  %v1578_v44 = vcombine.high %v92_v38, %v96_v39  ;;  %v100_v46 = vld [vmem:[%s2543_s0 + $0x190] sm:$0xff] }
  0x3f   :  { %1946 = vmatprep.subr.bf16.mxu1 %v2058_v51  ;;  %v1579_v51 = vcombine.low %v93_v40, %v97_v41 }
  0x41   :  { %1883 = vmatpush3.bf16.msra.mxu0 %v2057_v48  ;;  %v101_v48 = vld [vmem:[%s2543_s0 + $0x198] sm:$0xff] }
  0x42   :  { %1947 = vmatpush3.bf16.msra.mxu1 %v2059_v53 }
  0x43   :  { %1011 = vmatmul.mubr.bf16.gmra.mrb[16].mxu0 %v1565_v34  ;;  %v1561_v34 = vcombine.low %v76_v22, %v80_v23 }
  0x44   :  { %1108 = vmatmul.mubr.bf16.gmra.mrb[16].mxu1 %v1567_v35  ;;  %1018 = vmatprep.mubr.bf16.mxu0 %v1574_v36  ;;  %v1563_v35 = vcombine.low %v77_v24, %v81_v25  ;;  %v1570_v36 = vcombine.high %v84_v30, %v88_v31 }
  0x45   :  { %1115 = vmatprep.mubr.bf16.mxu1 %v1576_v37  ;;  %v1572_v37 = vcombine.high %v85_v32, %v89_v33 }
  0x4b   :  { %1019 = vmatmul.mubr.bf16.gmra.mrb[20].mxu0 %v1573_v47  ;;  %v104_v47 = vld [vmem:[%s2543_s0 + $0x1b0] sm:$0xff] }
  0x4c   :  { %1116 = vmatmul.mubr.bf16.gmra.mrb[20].mxu1 %v1575_v49  ;;  %1026 = vmatprep.mubr.bf16.mxu0 %v1582_v50  ;;  %v105_v49 = vld [vmem:[%s2543_s0 + $0x1b8] sm:$0xff]  ;;  %v1577_v50 = vcombine.low %v92_v38, %v96_v39 }
  0x4d   :  { %1123 = vmatprep.mubr.bf16.mxu1 %v1584_v52  ;;  %v1586_v52 = vcombine.high %v100_v46, %v104_v47  ;;  %v1588_v53 = vcombine.high %v101_v48, %v105_v49 }
  0x53   :  { %1027 = vmatmul.mubr.bf16.gmra.mrb[24].mxu0 %v1581_v58  ;;  %v1585_v58 = vcombine.low %v100_v46, %v104_v47 }
  0x54   :  { %1124 = vmatmul.mubr.bf16.gmra.mrb[24].mxu1 %v1583_v59  ;;  %1034 = vmatprep.mubr.bf16.mxu0 %v1590_v60  ;;  %v1587_v59 = vcombine.low %v101_v48, %v105_v49  ;;  %v1594_v60 = vcombine.high %v108_v54, %v112_v55 }
  0x55   :  { %1131 = vmatprep.mubr.bf16.mxu1 %v1592_v61  ;;  %v1596_v61 = vcombine.high %v109_v56, %v113_v57 }
  0x5b   :  { %1035 = vmatmul.mubr.bf16.gmra.mrb[28].mxu0 %v1589_v2 }
  0x5c   :  { %1132 = vmatmul.mubr.bf16.gmra.mrb[28].mxu1 %v1591_v3  ;;  %1172 = vmatprep.mubr.bf16.mxu0 %v1538_v4 }
  0x5d   :  { %1269 = vmatprep.mubr.bf16.mxu1 %v1540_v5 }
  0x63   :  { %1173 = vmatmul.mubr.bf16.vlgmr.msra.gmra.mrb[32].mxu0 %v1537_v10 }
  0x64   :  { %1270 = vmatmul.mubr.bf16.vlgmr.msra.gmra.mrb[32].mxu1 %v1539_v11  ;;  %1180 = vmatprep.mubr.bf16.mxu0 %v1546_v12 }
  0x65   :  { %1277 = vmatprep.mubr.bf16.mxu1 %v1548_v13 }
  0x6b   :  { %1181 = vmatmul.mubr.bf16.gmra.mrb[36].mxu0 %v1545_v18 }
  0x6c   :  { %1278 = vmatmul.mubr.bf16.gmra.mrb[36].mxu1 %v1547_v19  ;;  %1188 = vmatprep.mubr.bf16.mxu0 %v1554_v20 }
  0x6d   :  { %1285 = vmatprep.mubr.bf16.mxu1 %v1556_v21 }
  0x73   :  { %1189 = vmatmul.mubr.bf16.gmra.mrb[40].mxu0 %v1553_v26 }
  0x74   :  { %1286 = vmatmul.mubr.bf16.gmra.mrb[40].mxu1 %v1555_v27  ;;  %1196 = vmatprep.mubr.bf16.mxu0 %v1562_v28 }
  0x75   :  { %1293 = vmatprep.mubr.bf16.mxu1 %v1564_v29 }
  0x7b   :  { %1197 = vmatmul.mubr.bf16.gmra.mrb[44].mxu0 %v1561_v34 }
  0x7c   :  { %1294 = vmatmul.mubr.bf16.gmra.mrb[44].mxu1 %v1563_v35  ;;  %1204 = vmatprep.mubr.bf16.mxu0 %v1570_v36 }
  0x7d   :  { %1301 = vmatprep.mubr.bf16.mxu1 %v1572_v37 }
  0x83   :  { %1205 = vmatmul.mubr.bf16.gmra.mrb[48].mxu0 %v1569_v42 }
  0x84   :  { %1302 = vmatmul.mubr.bf16.gmra.mrb[48].mxu1 %v1571_v43  ;;  %1212 = vmatprep.mubr.bf16.mxu0 %v1578_v44 }
  0x85   :  { %1309 = vmatprep.mubr.bf16.mxu1 %v1580_v45 }
  0x8b   :  { %1213 = vmatmul.mubr.bf16.gmra.mrb[52].mxu0 %v1577_v50 }
  0x8c   :  { %1310 = vmatmul.mubr.bf16.gmra.mrb[52].mxu1 %v1579_v51  ;;  %1220 = vmatprep.mubr.bf16.mxu0 %v1586_v52 }
  0x8d   :  { %1317 = vmatprep.mubr.bf16.mxu1 %v1588_v53 }
  0x93   :  { %1221 = vmatmul.mubr.bf16.gmra.mrb[56].mxu0 %v1585_v58 }
  0x94   :  { %1318 = vmatmul.mubr.bf16.gmra.mrb[56].mxu1 %v1587_v59  ;;  %1228 = vmatprep.mubr.bf16.mxu0 %v1594_v60 }
  0x95   :  { %1325 = vmatprep.mubr.bf16.mxu1 %v1596_v61 }
  0x9b   :  { %1229 = vmatmul.mubr.bf16.gmra.mrb[60].mxu0 %v1593_v62 }
  0x9c   :  { %1326 = vmatmul.mubr.bf16.gmra.mrb[60].mxu1 %v1595_v63 }
  0xf6   :  { %v1756_v0 = vpop.f32.mrb[0].mxu0 }
  0xf7   :  { %v1820_v1 = vpop.f32.mrb[0].mxu1  ;;  %v1757_v2 = vpop.f32.mrb[1].mxu0 }
  0xf8   :  { %v1758_v3 = vadd.f32 %v1757_v2, %v1756_v0  ;;  %v1821_v4 = vpop.f32.mrb[1].mxu1  ;;  %v1759_v5 = vpop.f32.mrb[2].mxu0 }
  0xf9   :  { %v1822_v6 = vadd.f32 %v1821_v4, %v1820_v1  ;;  %v1823_v7 = vpop.f32.mrb[2].mxu1  ;;  %v1760_v8 = vpop.f32.mrb[3].mxu0 }
  0xfa   :  { %v1761_v9 = vadd.f32 %v1760_v8, %v1759_v5  ;;  %v1824_v10 = vpop.f32.mrb[3].mxu1 }
  0xfb   :  { %v2464_v11 = vadd.f32 %v1822_v6, %v1758_v3  ;;  %v1825_v12 = vadd.f32 %v1824_v10, %v1823_v7 }
  0xfd   :  { %v2466_v13 = vadd.f32 %v1825_v12, %v1761_v9 }
  0xfe   :  { %v1762_v14 = vpop.f32.mrb[4].mxu0 }
  0xff   :  { %v1826_v15 = vpop.f32.mrb[4].mxu1  ;;  %v1763_v16 = vpop.f32.mrb[5].mxu0 }
 0x100   :  { %v1764_v17 = vadd.f32 %v1763_v16, %v1762_v14  ;;  %v1827_v18 = vpop.f32.mrb[5].mxu1  ;;  %v1765_v19 = vpop.f32.mrb[6].mxu0 }
 0x101   :  { %v1828_v20 = vadd.f32 %v1827_v18, %v1826_v15  ;;  %v1829_v21 = vpop.f32.mrb[6].mxu1  ;;  %v1766_v22 = vpop.f32.mrb[7].mxu0 }
 0x102   :  { %v1767_v23 = vadd.f32 %v1766_v22, %v1765_v19  ;;  %v1830_v24 = vpop.f32.mrb[7].mxu1 }
 0x103   :  { %v2468_v25 = vadd.f32 %v1828_v20, %v1764_v17  ;;  %v1831_v26 = vadd.f32 %v1830_v24, %v1829_v21 }
 0x105   :  { %v2470_v27 = vadd.f32 %v1831_v26, %v1767_v23 }
 0x106   :  { %v1768_v28 = vpop.f32.mrb[8].mxu0 }
 0x107   :  { %v1832_v29 = vpop.f32.mrb[8].mxu1  ;;  %v1769_v30 = vpop.f32.mrb[9].mxu0 }
 0x108   :  { %v1770_v31 = vadd.f32 %v1769_v30, %v1768_v28  ;;  %v1833_v32 = vpop.f32.mrb[9].mxu1  ;;  %v1771_v33 = vpop.f32.mrb[10].mxu0 }
 0x109   :  { %v1834_v34 = vadd.f32 %v1833_v32, %v1832_v29  ;;  %v1835_v35 = vpop.f32.mrb[10].mxu1  ;;  %v1772_v36 = vpop.f32.mrb[11].mxu0 }
 0x10a   :  { %v1773_v37 = vadd.f32 %v1772_v36, %v1771_v33  ;;  %v1836_v38 = vpop.f32.mrb[11].mxu1 }
 0x10b   :  { %v2472_v39 = vadd.f32 %v1834_v34, %v1770_v31  ;;  %v1837_v40 = vadd.f32 %v1836_v38, %v1835_v35 }
 0x10d   :  { %v2474_v41 = vadd.f32 %v1837_v40, %v1773_v37 }
 0x10e   :  { %v1774_v42 = vpop.f32.mrb[12].mxu0 }
 0x10f   :  { %v1838_v43 = vpop.f32.mrb[12].mxu1  ;;  %v1775_v44 = vpop.f32.mrb[13].mxu0 }
 0x110   :  { %v1776_v45 = vadd.f32 %v1775_v44, %v1774_v42  ;;  %v1839_v46 = vpop.f32.mrb[13].mxu1  ;;  %v1777_v47 = vpop.f32.mrb[14].mxu0 }
 0x111   :  { %v1840_v48 = vadd.f32 %v1839_v46, %v1838_v43  ;;  %v1841_v49 = vpop.f32.mrb[14].mxu1  ;;  %v1778_v50 = vpop.f32.mrb[15].mxu0 }
 0x112   :  { %v1779_v51 = vadd.f32 %v1778_v50, %v1777_v47  ;;  %v1842_v52 = vpop.f32.mrb[15].mxu1 }
 0x113   :  { %v2476_v53 = vadd.f32 %v1840_v48, %v1776_v45  ;;  %v1843_v54 = vadd.f32 %v1842_v52, %v1841_v49 }
 0x115   :  { %v2478_v55 = vadd.f32 %v1843_v54, %v1779_v51 }
 0x116   :  { %v1780_v56 = vpop.f32.mrb[16].mxu0 }
 0x117   :  { %v1844_v57 = vpop.f32.mrb[16].mxu1  ;;  %v1781_v58 = vpop.f32.mrb[17].mxu0 }
 0x118   :  { %v1782_v59 = vadd.f32 %v1781_v58, %v1780_v56  ;;  %v1845_v60 = vpop.f32.mrb[17].mxu1  ;;  %v1783_v61 = vpop.f32.mrb[18].mxu0 }
 0x119   :  { %v1846_v62 = vadd.f32 %v1845_v60, %v1844_v57  ;;  %v1847_v63 = vpop.f32.mrb[18].mxu1  ;;  %v1784_v0 = vpop.f32.mrb[19].mxu0 }
 0x11a   :  { %v1785_v1 = vadd.f32 %v1784_v0, %v1783_v61  ;;  %v1848_v2 = vpop.f32.mrb[19].mxu1 }
 0x11b   :  { %v2480_v3 = vadd.f32 %v1846_v62, %v1782_v59  ;;  %v1849_v4 = vadd.f32 %v1848_v2, %v1847_v63 }
 0x11d   :  { %v2482_v5 = vadd.f32 %v1849_v4, %v1785_v1 }
 0x11e   :  { %v1786_v6 = vpop.f32.mrb[20].mxu0 }
 0x11f   :  { %v1850_v7 = vpop.f32.mrb[20].mxu1  ;;  %v1787_v8 = vpop.f32.mrb[21].mxu0 }
 0x120   :  { %v1788_v9 = vadd.f32 %v1787_v8, %v1786_v6  ;;  %v1851_v10 = vpop.f32.mrb[21].mxu1  ;;  %v1789_v12 = vpop.f32.mrb[22].mxu0 }
 0x121   :  { %v1852_v14 = vadd.f32 %v1851_v10, %v1850_v7  ;;  %v1853_v15 = vpop.f32.mrb[22].mxu1  ;;  %v1790_v16 = vpop.f32.mrb[23].mxu0 }
 0x122   :  { %v1791_v17 = vadd.f32 %v1790_v16, %v1789_v12  ;;  %v1854_v18 = vpop.f32.mrb[23].mxu1 }
 0x123   :  { %v2484_v19 = vadd.f32 %v1852_v14, %v1788_v9  ;;  %v1855_v20 = vadd.f32 %v1854_v18, %v1853_v15 }
 0x125   :  { %v2486_v21 = vadd.f32 %v1855_v20, %v1791_v17 }
 0x126   :  { %v1792_v22 = vpop.f32.mrb[24].mxu0 }
 0x127   :  { %v1856_v23 = vpop.f32.mrb[24].mxu1  ;;  %v1793_v24 = vpop.f32.mrb[25].mxu0 }
 0x128   :  { %v1794_v26 = vadd.f32 %v1793_v24, %v1792_v22  ;;  %v1857_v28 = vpop.f32.mrb[25].mxu1  ;;  %v1795_v29 = vpop.f32.mrb[26].mxu0 }
 0x129   :  { %v1858_v30 = vadd.f32 %v1857_v28, %v1856_v23  ;;  %v1859_v31 = vpop.f32.mrb[26].mxu1  ;;  %v1796_v32 = vpop.f32.mrb[27].mxu0 }
 0x12a   :  { %v1797_v33 = vadd.f32 %v1796_v32, %v1795_v29  ;;  %v1860_v34 = vpop.f32.mrb[27].mxu1 }
 0x12b   :  { %v2488_v35 = vadd.f32 %v1858_v30, %v1794_v26  ;;  %v1861_v36 = vadd.f32 %v1860_v34, %v1859_v31 }
 0x12d   :  { %v2490_v37 = vadd.f32 %v1861_v36, %v1797_v33 }
 0x12e   :  { %v1798_v38 = vpop.f32.mrb[28].mxu0 }
 0x12f   :  { %v1862_v40 = vpop.f32.mrb[28].mxu1  ;;  %v1799_v42 = vpop.f32.mrb[29].mxu0 }
 0x130   :  { %v1800_v43 = vadd.f32 %v1799_v42, %v1798_v38  ;;  %v1863_v44 = vpop.f32.mrb[29].mxu1  ;;  %v1801_v45 = vpop.f32.mrb[30].mxu0 }
 0x131   :  { %v1864_v46 = vadd.f32 %v1863_v44, %v1862_v40  ;;  %v1865_v47 = vpop.f32.mrb[30].mxu1  ;;  %v1802_v48 = vpop.f32.mrb[31].mxu0 }
 0x132   :  { %v1803_v49 = vadd.f32 %v1802_v48, %v1801_v45  ;;  %v1866_v50 = vpop.f32.mrb[31].mxu1 }
 0x133   :  { %v2492_v51 = vadd.f32 %v1864_v46, %v1800_v43  ;;  %v1867_v52 = vadd.f32 %v1866_v50, %v1865_v47 }
 0x135   :  { %v2494_v54 = vadd.f32 %v1867_v52, %v1803_v49 }
 0x136   :  { %v1884_v56 = vpop.f32.mrb[32].mxu0 }
 0x137   :  { %v1948_v57 = vpop.f32.mrb[32].mxu1  ;;  %v1885_v58 = vpop.f32.mrb[33].mxu0 }
 0x138   :  { %v1886_v59 = vadd.f32 %v1885_v58, %v1884_v56  ;;  %v1949_v60 = vpop.f32.mrb[33].mxu1  ;;  %v1887_v61 = vpop.f32.mrb[34].mxu0 }
 0x139   :  { %v1950_v62 = vadd.f32 %v1949_v60, %v1948_v57  ;;  %v1951_v63 = vpop.f32.mrb[34].mxu1  ;;  %v1888_v0 = vpop.f32.mrb[35].mxu0 }
 0x13a   :  { %v1175_v1 = vadd.f32 %v1886_v59, %v2464_v11  ;;  %v1889_v2 = vadd.f32 %v1888_v0, %v1887_v61  ;;  %v1952_v4 = vpop.f32.mrb[35].mxu1 }
 0x13b   :  { %v1953_v6 = vadd.f32 %v1952_v4, %v1951_v63 }
 0x13c   :  { %v1272_v7 = vadd.f32 %v1950_v62, %v1175_v1  ;;  %v1178_v8 = vadd.f32 %v1889_v2, %v2466_v13 }
 0x13e   :  { %v1275_v9 = vadd.f32 %v1953_v6, %v1178_v8  ;;  %v1890_v10 = vpop.f32.mrb[36].mxu0  ;;  %v1486_v12 = vmul.f32 %v1272_v7, %v1272_v7 }
 0x13f   :  { %v1954_v14 = vpop.f32.mrb[36].mxu1  ;;  %v1891_v15 = vpop.f32.mrb[37].mxu0 }
 0x140   :  { %v1696_v16 = vpack.c.bf16 %v1275_v9, %v1272_v7  ;;  %v1465_v17 = vadd.f32 %v1275_v9, %v1272_v7  ;;  %v1487_v18 = vmul.f32 %v1275_v9, %v1275_v9  ;;  %v1892_v20 = vadd.f32 %v1891_v15, %v1890_v10  ;;  %v1955_v22 = vpop.f32.mrb[37].mxu1  ;;  %v1893_v23 = vpop.f32.mrb[38].mxu0 }
 0x141   :  { %v1956_v24 = vadd.f32 %v1955_v22, %v1954_v14  ;;  %v1957_v26 = vpop.f32.mrb[38].mxu1  ;;  %v1894_v11 = vpop.f32.mrb[39].mxu0 }
 0x142   :  { %1697 = vst [vmem:[%s2544_s2] sm:$0xff] %v1696_v16   ;;  %v1502_v28 = vadd.f32 %v1487_v18, %v1486_v12  ;;  %v1183_v13 = vadd.f32 %v1892_v20, %v2468_v25  ;;  %v1895_v29 = vadd.f32 %v1894_v11, %v1893_v23  ;;  %v1958_v30 = vpop.f32.mrb[39].mxu1 }
 0x143   :  { %v1959_v31 = vadd.f32 %v1958_v30, %v1957_v26 }
 0x144   :  { %v1280_v32 = vadd.f32 %v1956_v24, %v1183_v13  ;;  %v1186_v33 = vadd.f32 %v1895_v29, %v2470_v27 }
 0x146   :  { %v1466_v34 = vadd.f32 %v1465_v17, %v1280_v32  ;;  %v1488_v36 = vmul.f32 %v1280_v32, %v1280_v32  ;;  %v1283_v38 = vadd.f32 %v1959_v31, %v1186_v33  ;;  %v1896_v40 = vpop.f32.mrb[40].mxu0 }
 0x147   :  { %v1960_v42 = vpop.f32.mrb[40].mxu1  ;;  %v1897_v43 = vpop.f32.mrb[41].mxu0 }
 0x148   :  { %v1503_v44 = vadd.f32 %v1502_v28, %v1488_v36  ;;  %v1701_v45 = vpack.c.bf16 %v1283_v38, %v1280_v32  ;;  %v1467_v46 = vadd.f32 %v1466_v34, %v1283_v38  ;;  %v1489_v47 = vmul.f32 %v1283_v38, %v1283_v38  ;;  %v1961_v48 = vpop.f32.mrb[41].mxu1  ;;  %v1899_v49 = vpop.f32.mrb[42].mxu0 }
 0x149   :  { %v1898_v50 = vadd.f32 %v1897_v43, %v1896_v40  ;;  %v1962_v25 = vadd.f32 %v1961_v48, %v1960_v42  ;;  %v1963_v52 = vpop.f32.mrb[42].mxu1  ;;  %v1900_v56 = vpop.f32.mrb[43].mxu0 }
 0x14a   :  { %1733 = vst [vmem:[%s2544_s2 + $0x8] sm:$0xff] %v1701_v45   ;;  %v1504_v27 = vadd.f32 %v1503_v44, %v1489_v47  ;;  %v1901_v57 = vadd.f32 %v1900_v56, %v1899_v49  ;;  %v1964_v58 = vpop.f32.mrb[43].mxu1 }
 0x14b   :  { %v1191_v59 = vadd.f32 %v1898_v50, %v2472_v39  ;;  %v1965_v60 = vadd.f32 %v1964_v58, %v1963_v52 }
 0x14c   :  { %v1194_v61 = vadd.f32 %v1901_v57, %v2474_v41 }
 0x14d   :  { %v1288_v62 = vadd.f32 %v1962_v25, %v1191_v59 }
 0x14e   :  { %v1291_v63 = vadd.f32 %v1965_v60, %v1194_v61  ;;  %v1902_v0 = vpop.f32.mrb[44].mxu0 }
 0x14f   :  { %v1468_v1 = vadd.f32 %v1467_v46, %v1288_v62  ;;  %v1490_v2 = vmul.f32 %v1288_v62, %v1288_v62  ;;  %v1966_v4 = vpop.f32.mrb[44].mxu1  ;;  %v1903_v6 = vpop.f32.mrb[45].mxu0 }
 0x150   :  { %v1706_v7 = vpack.c.bf16 %v1291_v63, %v1288_v62  ;;  %v1491_v8 = vmul.f32 %v1291_v63, %v1291_v63  ;;  %v1904_v9 = vadd.f32 %v1903_v6, %v1902_v0  ;;  %v1967_v10 = vpop.f32.mrb[45].mxu1  ;;  %v1905_v12 = vpop.f32.mrb[46].mxu0 }
 0x151   :  { %v1505_v14 = vadd.f32 %v1504_v27, %v1490_v2  ;;  %v1469_v15 = vadd.f32 %v1468_v1, %v1291_v63  ;;  %v1968_v16 = vadd.f32 %v1967_v10, %v1966_v4  ;;  %v1969_v17 = vpop.f32.mrb[46].mxu1  ;;  %v1906_v39 = vpop.f32.mrb[47].mxu0 }
 0x152   :  { %1734 = vst [vmem:[%s2544_s2 + $0x10] sm:$0xff] %v1706_v7   ;;  %v1199_v41 = vadd.f32 %v1904_v9, %v2476_v53  ;;  %v1907_v18 = vadd.f32 %v1906_v39, %v1905_v12  ;;  %v1970_v20 = vpop.f32.mrb[47].mxu1 }
 0x153   :  { %v1506_v22 = vadd.f32 %v1505_v14, %v1491_v8  ;;  %v1971_v23 = vadd.f32 %v1970_v20, %v1969_v17 }
 0x154   :  { %v1296_v24 = vadd.f32 %v1968_v16, %v1199_v41  ;;  %v1202_v26 = vadd.f32 %v1907_v18, %v2478_v55 }
 0x156   :  { %v1470_v11 = vadd.f32 %v1469_v15, %v1296_v24  ;;  %v1492_v28 = vmul.f32 %v1296_v24, %v1296_v24  ;;  %v1299_v13 = vadd.f32 %v1971_v23, %v1202_v26  ;;  %v1908_v29 = vpop.f32.mrb[48].mxu0 }
 0x157   :  { %v1972_v30 = vpop.f32.mrb[48].mxu1  ;;  %v1909_v31 = vpop.f32.mrb[49].mxu0 }
 0x158   :  { %v1507_v32 = vadd.f32 %v1506_v22, %v1492_v28  ;;  %v1711_v33 = vpack.c.bf16 %v1299_v13, %v1296_v24  ;;  %v1471_v34 = vadd.f32 %v1470_v11, %v1299_v13  ;;  %v1493_v36 = vmul.f32 %v1299_v13, %v1299_v13  ;;  %v1973_v38 = vpop.f32.mrb[49].mxu1  ;;  %v1911_v40 = vpop.f32.mrb[50].mxu0 }
 0x159   :  { %v1910_v53 = vadd.f32 %v1909_v31, %v1908_v29  ;;  %v1974_v42 = vadd.f32 %v1973_v38, %v1972_v30  ;;  %v1975_v43 = vpop.f32.mrb[50].mxu1  ;;  %v1912_v44 = vpop.f32.mrb[51].mxu0 }
 0x15a   :  { %1735 = vst [vmem:[%s2544_s2 + $0x18] sm:$0xff] %v1711_v33   ;;  %v1508_v55 = vadd.f32 %v1507_v32, %v1493_v36  ;;  %v1913_v45 = vadd.f32 %v1912_v44, %v1911_v40  ;;  %v1976_v46 = vpop.f32.mrb[51].mxu1 }
 0x15b   :  { %v1207_v47 = vadd.f32 %v1910_v53, %v2480_v3  ;;  %v1977_v48 = vadd.f32 %v1976_v46, %v1975_v43 }
 0x15c   :  { %v1210_v49 = vadd.f32 %v1913_v45, %v2482_v5 }
 0x15d   :  { %v1304_v50 = vadd.f32 %v1974_v42, %v1207_v47 }
 0x15e   :  { %v1307_v25 = vadd.f32 %v1977_v48, %v1210_v49  ;;  %v1914_v52 = vpop.f32.mrb[52].mxu0 }
 0x15f   :  { %v1472_v56 = vadd.f32 %v1471_v34, %v1304_v50  ;;  %v1494_v27 = vmul.f32 %v1304_v50, %v1304_v50  ;;  %v1978_v57 = vpop.f32.mrb[52].mxu1  ;;  %v1915_v58 = vpop.f32.mrb[53].mxu0 }
 0x160   :  { %v1716_v59 = vpack.c.bf16 %v1307_v25, %v1304_v50  ;;  %v1495_v60 = vmul.f32 %v1307_v25, %v1307_v25  ;;  %v1916_v61 = vadd.f32 %v1915_v58, %v1914_v52  ;;  %v1979_v62 = vpop.f32.mrb[53].mxu1  ;;  %v1917_v63 = vpop.f32.mrb[54].mxu0 }
 0x161   :  { %v1509_v0 = vadd.f32 %v1508_v55, %v1494_v27  ;;  %v1473_v1 = vadd.f32 %v1472_v56, %v1307_v25  ;;  %v1980_v2 = vadd.f32 %v1979_v62, %v1978_v57  ;;  %v1981_v4 = vpop.f32.mrb[54].mxu1  ;;  %v1918_v3 = vpop.f32.mrb[55].mxu0 }
 0x162   :  { %1736 = vst [vmem:[%s2544_s2 + $0x20] sm:$0xff] %v1716_v59   ;;  %v1215_v5 = vadd.f32 %v1916_v61, %v2484_v19  ;;  %v1919_v6 = vadd.f32 %v1918_v3, %v1917_v63  ;;  %v1982_v7 = vpop.f32.mrb[55].mxu1 }
 0x163   :  { %v1510_v8 = vadd.f32 %v1509_v0, %v1495_v60  ;;  %v1983_v9 = vadd.f32 %v1982_v7, %v1981_v4 }
 0x164   :  { %v1312_v10 = vadd.f32 %v1980_v2, %v1215_v5  ;;  %v1218_v12 = vadd.f32 %v1919_v6, %v2486_v21 }
 0x166   :  { %v1474_v14 = vadd.f32 %v1473_v1, %v1312_v10  ;;  %v1496_v15 = vmul.f32 %v1312_v10, %v1312_v10  ;;  %v1315_v16 = vadd.f32 %v1983_v9, %v1218_v12  ;;  %v1920_v17 = vpop.f32.mrb[56].mxu0 }
 0x167   :  { %v1984_v39 = vpop.f32.mrb[56].mxu1  ;;  %v1921_v41 = vpop.f32.mrb[57].mxu0 }
 0x168   :  { %v1511_v18 = vadd.f32 %v1510_v8, %v1496_v15  ;;  %v1721_v20 = vpack.c.bf16 %v1315_v16, %v1312_v10  ;;  %v1475_v22 = vadd.f32 %v1474_v14, %v1315_v16  ;;  %v1497_v23 = vmul.f32 %v1315_v16, %v1315_v16  ;;  %v1985_v24 = vpop.f32.mrb[57].mxu1  ;;  %v1923_v26 = vpop.f32.mrb[58].mxu0 }
 0x169   :  { %v1922_v19 = vadd.f32 %v1921_v41, %v1920_v17  ;;  %v1986_v11 = vadd.f32 %v1985_v24, %v1984_v39  ;;  %v1987_v28 = vpop.f32.mrb[58].mxu1  ;;  %v1924_v13 = vpop.f32.mrb[59].mxu0 }
 0x16a   :  { %1737 = vst [vmem:[%s2544_s2 + $0x28] sm:$0xff] %v1721_v20   ;;  %v1512_v21 = vadd.f32 %v1511_v18, %v1497_v23  ;;  %v1925_v29 = vadd.f32 %v1924_v13, %v1923_v26  ;;  %v1988_v30 = vpop.f32.mrb[59].mxu1 }
 0x16b   :  { %v1223_v31 = vadd.f32 %v1922_v19, %v2488_v35  ;;  %v1989_v32 = vadd.f32 %v1988_v30, %v1987_v28 }
 0x16c   :  { %v1226_v33 = vadd.f32 %v1925_v29, %v2490_v37 }
 0x16d   :  { %v1320_v34 = vadd.f32 %v1986_v11, %v1223_v31 }
 0x16e   :  { %v1323_v36 = vadd.f32 %v1989_v32, %v1226_v33  ;;  %v1926_v38 = vpop.f32.mrb[60].mxu0 }
 0x16f   :  { %v1476_v40 = vadd.f32 %v1475_v22, %v1320_v34  ;;  %v1498_v53 = vmul.f32 %v1320_v34, %v1320_v34  ;;  %v1990_v42 = vpop.f32.mrb[60].mxu1  ;;  %v1927_v43 = vpop.f32.mrb[61].mxu0 }
 0x170   :  { %v1726_v44 = vpack.c.bf16 %v1323_v36, %v1320_v34  ;;  %v1499_v55 = vmul.f32 %v1323_v36, %v1323_v36  ;;  %v1928_v45 = vadd.f32 %v1927_v43, %v1926_v38  ;;  %v1991_v46 = vpop.f32.mrb[61].mxu1  ;;  %v1929_v47 = vpop.f32.mrb[62].mxu0 }
 0x171   :  { %v1513_v48 = vadd.f32 %v1512_v21, %v1498_v53  ;;  %v1477_v49 = vadd.f32 %v1476_v40, %v1323_v36  ;;  %v1992_v50 = vadd.f32 %v1991_v46, %v1990_v42  ;;  %v1993_v25 = vpop.f32.mrb[62].mxu1  ;;  %v1930_v35 = vpop.f32.mrb[63].mxu0 }
 0x172   :  { %1738 = vst [vmem:[%s2544_s2 + $0x30] sm:$0xff] %v1726_v44   ;;  %v1231_v37 = vadd.f32 %v1928_v45, %v2492_v51  ;;  %v1931_v52 = vadd.f32 %v1930_v35, %v1929_v47  ;;  %v1994_v56 = vpop.f32.mrb[63].mxu1 }
 0x173   :  { %v1514_v27 = vadd.f32 %v1513_v48, %v1499_v55  ;;  %v1995_v57 = vadd.f32 %v1994_v56, %v1993_v25 }
 0x174   :  { %v1328_v58 = vadd.f32 %v1992_v50, %v1231_v37  ;;  %v1234_v59 = vadd.f32 %v1931_v52, %v2494_v54 }
 0x176   :  { %v1478_v60 = vadd.f32 %v1477_v49, %v1328_v58  ;;  %v1500_v61 = vmul.f32 %v1328_v58, %v1328_v58  ;;  %v1331_v62 = vadd.f32 %v1995_v57, %v1234_v59 }
 0x178   :  { %v1515_v63 = vadd.f32 %v1514_v27, %v1500_v61  ;;  %v1731_v0 = vpack.c.bf16 %v1331_v62, %v1328_v58  ;;  %v1479_v1 = vadd.f32 %v1478_v60, %v1331_v62  ;;  %v1501_v2 = vmul.f32 %v1331_v62, %v1331_v62 }
 0x17a   :  { %1739 = vst [vmem:[%s2544_s2 + $0x38] sm:$0xff] %v1731_v0   ;;  %v1480_v4 = vrot.slane %v1479_v1, 4  ;;  %v1516_v51 = vadd.f32 %v1515_v63, %v1501_v2 }
 0x17c   :  { %v1481_v3 = vadd.f32 %v1480_v4, %v1479_v1  ;;  %v1517_v5 = vrot.slane %v1516_v51, 4 }
 0x17e   :  { %v1482_v6 = vrot.slane %v1481_v3, 2  ;;  %v1518_v7 = vadd.f32 %v1517_v5, %v1516_v51 }
 0x180   :  { %v1483_v8 = vadd.f32 %v1482_v6, %v1481_v3  ;;  %v1519_v9 = vrot.slane %v1518_v7, 2 }
 0x182   :  { %v1484_v54 = vrot.slane %v1483_v8, 1  ;;  %v1520_v10 = vadd.f32 %v1519_v9, %v1518_v7 }
 0x184   :  { %v1485_v12 = vadd.f32 %v1484_v54, %v1483_v8  ;;  %v1521_v14 = vrot.slane %v1520_v10, 1 }
 0x186   :  { %v1522_v15 = vadd.f32 %v1521_v14, %v1520_v10  ;;  %1523 = vst [vmem:[%s2545_s3] sm:$0x1] %v1485_v12 }
 0x188   :  { %1524 = vst [vmem:[%s2545_s3 + $0x1] sm:$0x1] %v1522_v15 }

// kernel: discriminator_forward.12
= control target key start
LH: loop header
LB: loop body
LE: loop exit
PB: predicated region body
PF: predicated region fallthrough
CT: control target
= control target key end

     0   :  { %v25_v0 = vlaneseq  ;;  %s174_s0 = inlined_call_operand.vmem [shape: bf16[32,256], index: 0, kind: input, shape index: {}]   ;;  %s175_s1 = inlined_call_operand.vmem [shape: f32[2,256], index: 1, kind: input, shape index: {}]   ;;  %s176_s2 = inlined_call_operand.vmem [shape: bf16[32,256], index: 2, kind: output, shape index: {}]  }
   0x1   :  { %v11_v1 = vld [vmem:[%s174_s0] sm:$0xff]  ;;  %v12_v2 = vld [vmem:[%s174_s0 + $0x8] sm:$0xff]  ;;  %v13_v4 = vld [vmem:[%s174_s0 + $0x10] sm:$0xff] }
   0x2   :  { %v26_v3 = vshrl.u32 %v25_v0, 7  ;;  %v14_v5 = vld [vmem:[%s174_s0 + $0x18] sm:$0xff]  ;;  %v15_v6 = vunpack.c.l.bf16 %v11_v1  ;;  %v16_v7 = vunpack.c.h.bf16 %v11_v1  ;;  %v23_v8 = vld [vmem:[%s175_s1] ss:$2 sm:$0x3]  ;;  %v17_v12 = vunpack.c.l.bf16 %v12_v2 }
   0x3   :  { %v120_v9 = vld [vmem:[%s175_s1 + $0x1] ss:$2 sm:$0x3]  ;;  %v18_v13 = vunpack.c.h.bf16 %v12_v2  ;;  %v19_v14 = vunpack.c.l.bf16 %v13_v4  ;;  %v20_v15 = vunpack.c.h.bf16 %v13_v4  ;;  %v21_v16 = vunpack.c.l.bf16 %v14_v5 }
   0x4   :  { %v27_v10 = vsub.s32 0, %v26_v3  ;;  %v31_v11 = vsub.s32 1, %v26_v3  ;;  %v22_v17 = vunpack.c.h.bf16 %v14_v5 }
   0x6   :  { %v28_v18 = vrot.slane %v23_v8, %v27_v10  ;;  %v32_v19 = vrot.slane %v23_v8, %v31_v11  ;;  %v49_v20 = vrot.slane %v120_v9, %v27_v10  ;;  %v53_v21 = vrot.slane %v120_v9, %v31_v11 }
   0x8   :  { %v35_v22 = vmul.f32 %v28_v18, %v15_v6  ;;  %v36_v23 = vmul.f32 %v32_v19, %v16_v7  ;;  %v37_v24 = vmul.f32 %v28_v18, %v17_v12  ;;  %v38_v25 = vmul.f32 %v32_v19, %v18_v13 }
   0x9   :  { %v39_v26 = vmul.f32 %v28_v18, %v19_v14  ;;  %v40_v27 = vmul.f32 %v32_v19, %v20_v15  ;;  %v41_v28 = vmul.f32 %v28_v18, %v21_v16  ;;  %v42_v29 = vmul.f32 %v32_v19, %v22_v17 }
   0xa   :  { %v56_v30 = vadd.f32 %v49_v20, %v35_v22  ;;  %v57_v31 = vadd.f32 %v53_v21, %v36_v23  ;;  %v58_v32 = vadd.f32 %v49_v20, %v37_v24  ;;  %v59_v33 = vadd.f32 %v53_v21, %v38_v25 }
   0xb   :  { %v60_v34 = vadd.f32 %v49_v20, %v39_v26  ;;  %v61_v35 = vadd.f32 %v53_v21, %v40_v27  ;;  %v62_v36 = vadd.f32 %v49_v20, %v41_v28  ;;  %v63_v37 = vadd.f32 %v53_v21, %v42_v29 }
   0xc   :  { %vm64_vm0 = vcmp.ge.f32.partialorder %v56_v30, 0.0  ;;  %vm65_vm1 = vcmp.ge.f32.partialorder %v57_v31, 0.0  ;;  %v72_v38 = vmul.f32 0.2, %v56_v30  ;;  %v73_v39 = vmul.f32 0.2, %v57_v31 }
   0xd   :  { %vm66_vm2 = vcmp.ge.f32.partialorder %v58_v32, 0.0  ;;  %vm67_vm3 = vcmp.ge.f32.partialorder %v59_v33, 0.0  ;;  %v74_v40 = vmul.f32 0.2, %v58_v32  ;;  %v75_v41 = vmul.f32 0.2, %v59_v33 }
   0xe   :  { %v80_v42 = vsel %vm64_vm0, %v56_v30, %v72_v38  ;;  %v81_v43 = vsel %vm65_vm1, %v57_v31, %v73_v39  ;;  %vm68_vm4 = vcmp.ge.f32.partialorder %v60_v34, 0.0  ;;  %vm69_vm5 = vcmp.ge.f32.partialorder %v61_v35, 0.0 }
   0xf   :  { %v125_v44 = vpack.c.bf16 %v81_v43, %v80_v42  ;;  %v82_v45 = vsel %vm66_vm2, %v58_v32, %v74_v40  ;;  %v83_v46 = vsel %vm67_vm3, %v59_v33, %v75_v41  ;;  %v76_v47 = vmul.f32 0.2, %v60_v34 }
  0x10   :  { %v126_v48 = vpack.c.bf16 %v83_v46, %v82_v45  ;;  %v77_v49 = vmul.f32 0.2, %v61_v35  ;;  %vm70_vm6 = vcmp.ge.f32.partialorder %v62_v36, 0.0  ;;  %vm71_vm7 = vcmp.ge.f32.partialorder %v63_v37, 0.0 }
  0x11   :  { %112 = vst [vmem:[%s176_s2] sm:$0xff] %v125_v44  ;;  %v84_v50 = vsel %vm68_vm4, %v60_v34, %v76_v47  ;;  %v78_v51 = vmul.f32 0.2, %v62_v36  ;;  %v79_v52 = vmul.f32 0.2, %v63_v37 }
  0x12   :  { %113 = vst [vmem:[%s176_s2 + $0x8] sm:$0xff] %v126_v48  ;;  %v85_v53 = vsel %vm69_vm5, %v61_v35, %v77_v49 }
  0x13   :  { %v127_v54 = vpack.c.bf16 %v85_v53, %v84_v50  ;;  %v86_v55 = vsel %vm70_vm6, %v62_v36, %v78_v51  ;;  %v87_v56 = vsel %vm71_vm7, %v63_v37, %v79_v52 }
  0x14   :  { %v128_v57 = vpack.c.bf16 %v87_v56, %v86_v55 }
  0x15   :  { %114 = vst [vmem:[%s176_s2 + $0x10] sm:$0xff] %v127_v54 }
  0x16   :  { %115 = vst [vmem:[%s176_s2 + $0x18] sm:$0xff] %v128_v57 }

// kernel: discriminator_forward.11
= control target key start
LH: loop header
LB: loop body
LE: loop exit
PB: predicated region body
PF: predicated region fallthrough
CT: control target
= control target key end

     0   :  { %s2217_s12 = smov 0   ;;  %s2219_s13 = smov 0   ;;  %s2484_s0 = inlined_call_operand.vmem [shape: bf16[32,2048], index: 0, kind: input, shape index: {}]   ;;  %s2485_s1 = inlined_call_operand.vmem [shape: bf16[2048,256], index: 1, kind: input, shape index: {}]   ;;  %s2486_s2 = inlined_call_operand.vmem [shape: bf16[32,256], index: 2, kind: output, shape index: {0}]   ;;  %s2487_s3 = inlined_call_operand.vmem [shape: f32[1,2,256], index: 3, kind: output, shape index: {1}]  }
   0x1   :  { %s2221_s14 = smov 0   ;;  %s2223_s15 = smov 0  }
   0x2   :  { %s2225_s16 = smov 0  }
   0x3 LB: > { %s26_s17 = sadd.s32 1, %s2189_s15  ;;  %p49_p1 = scmp.ne.s32.totalorder %s2181_s13, %s2177_s12  ;;  %s2193_s16 = sphi %s2225_s16, %s14_s16   ;;  %s2189_s15 = sphi %s2223_s15, %s2491_s15   ;;  %s2185_s14 = sphi %s2221_s14, %s2490_s14   ;;  %s2181_s13 = sphi %s2219_s13, %s2489_s13   ;;  %s2177_s12 = sphi %s2217_s12, %s2488_s12  }
   0x4   : > { %p27_p0 = scmp.ge.s32.totalorder %s26_s17, 2  ;;  %p50_p2 = scmp.eq.s32.totalorder %s2193_s16, 0 }
   0x5   : > { %s42_s19 = sadd.s32 1, %s2181_s13  ;;  %p1725_p5 = scmp.ge.s32.totalorder %s2193_s16, 2 }
   0x6   : > { %s2493_s17 = smov (%p27_p0, %s26_s17), 0  ;;  %p51_p3 = por %p50_p2, %p49_p1 }
   0x7   : > { %s38_s18 = ssub.s32 %s2189_s15, %s2493_s17  ;;  %159 = sbr.rel (%p1725_p5) target bundleno = 26 (0x1a), region = 16 }
   0x8   : > { %p40_p4 = scmp.eq.s32.totalorder %s38_s18, 0 }
   0xa   : > { %s2252_s20 = scalar_select %p40_p4, %s2181_s13, %s42_s19  }
   0xe   : > { %162 = sbr.rel (!%p51_p3) target bundleno = 26 (0x1a), region = 20  ;;  %s164_s21 = sand.u32 (%p51_p3), 1, %s2181_s13  }
   0xf   : > { %s1891_s22 = sshll.u32 (%p51_p3), %s2189_s15, 5  ;;  %s1726_s23 = sshll.u32 (%p51_p3), %s164_s21, 7 }
  0x10   : > { %s2260_s26 = scalar_lea.vmem (%p51_p3), %s2484_s0, %s1891_s22  ;;  %s166_s27 = scalar_lea.vmem (%p51_p3), [#allocation3], %s1726_s23 }
  0x11   : > { %v185_v0 = vld [vmem:[%s2260_s26] sm:$0xff] (%p51_p3)  ;;  %v187_v1 = vld [vmem:[%s2260_s26 + $0x8] sm:$0xff] (%p51_p3)  ;;  %v189_v2 = vld [vmem:[%s2260_s26 + $0x10] sm:$0xff] (%p51_p3) }
  0x12   : > { %186 = vst [vmem:[%s166_s27] sm:$0xff] (%p51_p3), %v185_v0  ;;  %188 = vst [vmem:[%s166_s27 + $0x8] sm:$0xff] (%p51_p3), %v187_v1  ;;  %v191_v3 = vld [vmem:[%s2260_s26 + $0x18] sm:$0xff] (%p51_p3)  ;;  %v193_v4 = vld [vmem:[%s2260_s26 + $0x40] sm:$0xff] (%p51_p3) }
  0x13   : > { %190 = vst [vmem:[%s166_s27 + $0x10] sm:$0xff] (%p51_p3), %v189_v2  ;;  %v195_v5 = vld [vmem:[%s2260_s26 + $0x48] sm:$0xff] (%p51_p3)  ;;  %192 = vst [vmem:[%s166_s27 + $0x18] sm:$0xff] (%p51_p3), %v191_v3  ;;  %v197_v6 = vld [vmem:[%s2260_s26 + $0x50] sm:$0xff] (%p51_p3) }
  0x14   : > { %194 = vst [vmem:[%s166_s27 + $0x20] sm:$0xff] (%p51_p3), %v193_v4  ;;  %196 = vst [vmem:[%s166_s27 + $0x28] sm:$0xff] (%p51_p3), %v195_v5  ;;  %v199_v7 = vld [vmem:[%s2260_s26 + $0x58] sm:$0xff] (%p51_p3)  ;;  %v201_v8 = vld [vmem:[%s2260_s26 + $0x80] sm:$0xff] (%p51_p3) }
  0x15   : > { %198 = vst [vmem:[%s166_s27 + $0x30] sm:$0xff] %v197_v6  ;;  %200 = vst [vmem:[%s166_s27 + $0x38] sm:$0xff] %v199_v7  ;;  %v203_v9 = vld [vmem:[%s2260_s26 + $0x88] sm:$0xff]  ;;  %v205_v10 = vld [vmem:[%s2260_s26 + $0x90] sm:$0xff] }
  0x16   : > { %202 = vst [vmem:[%s166_s27 + $0x40] sm:$0xff] %v201_v8  ;;  %v207_v11 = vld [vmem:[%s2260_s26 + $0x98] sm:$0xff]  ;;  %204 = vst [vmem:[%s166_s27 + $0x48] sm:$0xff] %v203_v9  ;;  %v209_v12 = vld [vmem:[%s2260_s26 + $0xc0] sm:$0xff] }
  0x17   : > { %206 = vst [vmem:[%s166_s27 + $0x50] sm:$0xff] %v205_v10  ;;  %208 = vst [vmem:[%s166_s27 + $0x58] sm:$0xff] %v207_v11  ;;  %v211_v13 = vld [vmem:[%s2260_s26 + $0xc8] sm:$0xff]  ;;  %v213_v14 = vld [vmem:[%s2260_s26 + $0xd0] sm:$0xff] }
  0x18   : > { %210 = vst [vmem:[%s166_s27 + $0x60] sm:$0xff] %v209_v12  ;;  %212 = vst [vmem:[%s166_s27 + $0x68] sm:$0xff] %v211_v13  ;;  %v215_v15 = vld [vmem:[%s2260_s26 + $0xd8] sm:$0xff] }
  0x19   : > { %214 = vst [vmem:[%s166_s27 + $0x70] sm:$0xff] %v213_v14  ;;  %216 = vst [vmem:[%s166_s27 + $0x78] sm:$0xff] %v215_v15 }
  0x1a PF: > { %p1729_p6 = scmp.ge.s32.totalorder %s2193_s16, 1  ;;  %p236_p7 = scmp.lt.s32.totalorder %s2193_s16, 3 }
  0x1c   : > { %p237_p8 = pnand %p1729_p6, %p236_p7 }
  0x1d   : > { %s243_s28 = sand.u32 (!%p237_p8), 1, %s2177_s12   ;;  %s1731_s29 = sshll.u32 (!%p237_p8), %s2185_s14, 7 }
  0x1e   : > { %240 = sbr.rel (%p237_p8) target bundleno = 432 (0x1b0), region = 47  ;;  %s1730_s30 = sshll.u32 (!%p237_p8), %s243_s28, 7 }
  0x1f   : > { %p294_p9 = scmp.lt.s32.totalorder (!%p237_p8), %s1731_s29, 255  ;;  %s2287_s8 = scalar_lea.vmem (!%p237_p8), [#allocation3], %s1730_s30 }
  0x20   : > { %p1734_p10 = scmp.ne.s32.totalorder (!%p237_p8), %s2185_s14, 0 }
  0x25   : > { %s2495_s29 = smov (!%p294_p9, %s1731_s29), 255  ;;  %329 = sbr.rel (%p1734_p10) target bundleno = 44 (0x2c), region = 55 }
  0x26   : > { %s1892_s4 = sshll.u32 %s2495_s29, 3  ;;  %v2195_v16 = vmov (!%p1734_p10), 0.0  }
  0x27   : > { %s2285_s7 = scalar_lea.vmem %s2485_s1, %s1892_s4  ;;  %330 = vst [vmem:[#allocation2] sm:$0xff] (!%p1734_p10), %v2195_v16  ;;  %331 = vst [vmem:[#allocation2 + $0x8] sm:$0xff] (!%p1734_p10), %v2195_v16 }
  0x28   : > { %332 = vst [vmem:[#allocation2 + $0x10] sm:$0xff] (!%p1734_p10), %v2195_v16  ;;  %333 = vst [vmem:[#allocation2 + $0x18] sm:$0xff] (!%p1734_p10), %v2195_v16 }
  0x29   : > { %334 = vst [vmem:[#allocation2 + $0x20] sm:$0xff] (!%p1734_p10), %v2195_v16  ;;  %335 = vst [vmem:[#allocation2 + $0x28] sm:$0xff] (!%p1734_p10), %v2195_v16 }
  0x2a   : > { %336 = vst [vmem:[#allocation2 + $0x30] sm:$0xff] (!%p1734_p10), %v2195_v16  ;;  %337 = vst [vmem:[#allocation2 + $0x38] sm:$0xff] (!%p1734_p10), %v2195_v16 }
  0x2c PF: > { %v1963_v17 = vld [vmem:[%s2285_s7 + $0x4] ss:$8 sps:$4 sm:$0xff]   ;;  %v1967_v19 = vld [vmem:[%s2285_s7] ss:$8 sps:$4 sm:$0xff]   ;;  %v1969_v21 = vld [vmem:[%s2285_s7 + $0x14] ss:$8 sps:$4 sm:$0xff]  }
  0x2d   : > { %v1965_v18 = vld [vmem:[%s2285_s7 + $0x204] ss:$8 sps:$4 sm:$0xff]   ;;  %1210 = vmatprep.subr.bf16.mxu1 %v1963_v17  ;;  %v1968_v20 = vld [vmem:[%s2285_s7 + $0x200] ss:$8 sps:$4 sm:$0xff]   ;;  %v1971_v22 = vld [vmem:[%s2285_s7 + $0x214] ss:$8 sps:$4 sm:$0xff]  }
  0x2e   : > { %1316 = vmatprep.subr.bf16.mxu0 %v1965_v18  ;;  %1211 = vmatpush1.bf16.msra.mxu1 %v1967_v19  ;;  %v1973_v23 = vld [vmem:[%s2285_s7 + $0x10] ss:$8 sps:$4 sm:$0xff]   ;;  %v1975_v25 = vld [vmem:[%s2285_s7 + $0x24] ss:$8 sps:$4 sm:$0xff]   ;;  %v1979_v27 = vld [vmem:[%s2285_s7 + $0x20] ss:$8 sps:$4 sm:$0xff]  }
  0x2f   : > { %1317 = vmatpush1.bf16.msra.mxu0 %v1968_v20  ;;  %1212 = vmatprep.subr.bf16.mxu1 %v1969_v21  ;;  %v1974_v24 = vld [vmem:[%s2285_s7 + $0x210] ss:$8 sps:$4 sm:$0xff]   ;;  %v1977_v26 = vld [vmem:[%s2285_s7 + $0x224] ss:$8 sps:$4 sm:$0xff]   ;;  %v1980_v28 = vld [vmem:[%s2285_s7 + $0x220] ss:$8 sps:$4 sm:$0xff]  }
  0x30   : > { %1318 = vmatprep.subr.bf16.mxu0 %v1971_v22  ;;  %v1981_v29 = vld [vmem:[%s2285_s7 + $0x34] ss:$8 sps:$4 sm:$0xff]   ;;  %v1985_v31 = vld [vmem:[%s2285_s7 + $0x30] ss:$8 sps:$4 sm:$0xff]   ;;  %v1987_v33 = vld [vmem:[%s2285_s7 + $0x44] ss:$8 sps:$4 sm:$0xff]  }
  0x31   : > { %v1983_v30 = vld [vmem:[%s2285_s7 + $0x234] ss:$8 sps:$4 sm:$0xff]   ;;  %v1986_v32 = vld [vmem:[%s2285_s7 + $0x230] ss:$8 sps:$4 sm:$0xff]   ;;  %v1989_v34 = vld [vmem:[%s2285_s7 + $0x244] ss:$8 sps:$4 sm:$0xff]  }
  0x32   : > { %1213 = vmatpush1.bf16.msra.mxu1 %v1973_v23  ;;  %v1991_v35 = vld [vmem:[%s2285_s7 + $0x40] ss:$8 sps:$4 sm:$0xff]   ;;  %v1993_v37 = vld [vmem:[%s2285_s7 + $0x54] ss:$8 sps:$4 sm:$0xff]   ;;  %v1997_v39 = vld [vmem:[%s2285_s7 + $0x50] ss:$8 sps:$4 sm:$0xff]  }
  0x33   : > { %1319 = vmatpush1.bf16.msra.mxu0 %v1974_v24  ;;  %1214 = vmatprep.subr.bf16.mxu1 %v1975_v25  ;;  %v1992_v36 = vld [vmem:[%s2285_s7 + $0x240] ss:$8 sps:$4 sm:$0xff]   ;;  %v1995_v38 = vld [vmem:[%s2285_s7 + $0x254] ss:$8 sps:$4 sm:$0xff]   ;;  %v1998_v40 = vld [vmem:[%s2285_s7 + $0x250] ss:$8 sps:$4 sm:$0xff]  }
  0x34   : > { %1320 = vmatprep.subr.bf16.mxu0 %v1977_v26  ;;  %v1999_v41 = vld [vmem:[%s2285_s7 + $0x64] ss:$8 sps:$4 sm:$0xff]   ;;  %v2003_v43 = vld [vmem:[%s2285_s7 + $0x60] ss:$8 sps:$4 sm:$0xff]   ;;  %v2005_v45 = vld [vmem:[%s2285_s7 + $0x74] ss:$8 sps:$4 sm:$0xff]  }
  0x35   : > { %v2001_v42 = vld [vmem:[%s2285_s7 + $0x264] ss:$8 sps:$4 sm:$0xff]   ;;  %v2004_v44 = vld [vmem:[%s2285_s7 + $0x260] ss:$8 sps:$4 sm:$0xff]   ;;  %v2007_v46 = vld [vmem:[%s2285_s7 + $0x274] ss:$8 sps:$4 sm:$0xff]  }
  0x36   : > { %1215 = vmatpush1.bf16.msra.mxu1 %v1979_v27  ;;  %v2009_v47 = vld [vmem:[%s2285_s7 + $0x70] ss:$8 sps:$4 sm:$0xff]   ;;  %v2011_v49 = vld [vmem:[%s2285_s7 + $0x84] ss:$8 sps:$4 sm:$0xff]   ;;  %v2015_v51 = vld [vmem:[%s2285_s7 + $0x80] ss:$8 sps:$4 sm:$0xff]  }
  0x37   : > { %1321 = vmatpush1.bf16.msra.mxu0 %v1980_v28  ;;  %1216 = vmatprep.subr.bf16.mxu1 %v1981_v29  ;;  %v2010_v48 = vld [vmem:[%s2285_s7 + $0x270] ss:$8 sps:$4 sm:$0xff]   ;;  %v2013_v50 = vld [vmem:[%s2285_s7 + $0x284] ss:$8 sps:$4 sm:$0xff]   ;;  %v2016_v52 = vld [vmem:[%s2285_s7 + $0x280] ss:$8 sps:$4 sm:$0xff]  }
  0x38   : > { %1322 = vmatprep.subr.bf16.mxu0 %v1983_v30  ;;  %v2017_v53 = vld [vmem:[%s2285_s7 + $0x94] ss:$8 sps:$4 sm:$0xff]   ;;  %v2021_v55 = vld [vmem:[%s2285_s7 + $0x90] ss:$8 sps:$4 sm:$0xff]   ;;  %v2023_v57 = vld [vmem:[%s2285_s7 + $0xa4] ss:$8 sps:$4 sm:$0xff]  }
  0x39   : > { %v2019_v54 = vld [vmem:[%s2285_s7 + $0x294] ss:$8 sps:$4 sm:$0xff]   ;;  %v2022_v56 = vld [vmem:[%s2285_s7 + $0x290] ss:$8 sps:$4 sm:$0xff]   ;;  %v2025_v58 = vld [vmem:[%s2285_s7 + $0x2a4] ss:$8 sps:$4 sm:$0xff]  }
  0x3a   : > { %1217 = vmatpush1.bf16.msra.mxu1 %v1985_v31  ;;  %v2027_v59 = vld [vmem:[%s2285_s7 + $0xa0] ss:$8 sps:$4 sm:$0xff]   ;;  %v2029_v61 = vld [vmem:[%s2285_s7 + $0xb4] ss:$8 sps:$4 sm:$0xff]   ;;  %v2033_v63 = vld [vmem:[%s2285_s7 + $0xb0] ss:$8 sps:$4 sm:$0xff]  }
  0x3b   : > { %1323 = vmatpush1.bf16.msra.mxu0 %v1986_v32  ;;  %1218 = vmatprep.subr.bf16.mxu1 %v1987_v33  ;;  %v2028_v60 = vld [vmem:[%s2285_s7 + $0x2a0] ss:$8 sps:$4 sm:$0xff]   ;;  %v2031_v62 = vld [vmem:[%s2285_s7 + $0x2b4] ss:$8 sps:$4 sm:$0xff]   ;;  %v2034_v0 = vld [vmem:[%s2285_s7 + $0x2b0] ss:$8 sps:$4 sm:$0xff]  }
  0x3c   : > { %1324 = vmatprep.subr.bf16.mxu0 %v1989_v34  ;;  %v346_v1 = vld [vmem:[%s2287_s8] sm:$0xff]  ;;  %v348_v6 = vld [vmem:[%s2287_s8 + $0x10] sm:$0xff]  ;;  %p1879_p11 = scmp.ne.s32.totalorder %s2185_s14, 1 }
  0x3d   : > { %v350_v2 = vld [vmem:[%s2287_s8 + $0x20] sm:$0xff]  ;;  %v352_v7 = vld [vmem:[%s2287_s8 + $0x30] sm:$0xff] }
  0x3e   : > { %1219 = vmatpush1.bf16.msra.mxu1 %v1991_v35  ;;  %v2035_v3 = vld [vmem:[%s2285_s7 + $0xc4] ss:$8 sps:$4 sm:$0xff]   ;;  %v1736_v5 = vcombine.high %v346_v1, %v350_v2  ;;  %v1740_v8 = vcombine.high %v348_v6, %v352_v7  ;;  %v2039_v9 = vld [vmem:[%s2285_s7 + $0xc0] ss:$8 sps:$4 sm:$0xff]   ;;  %v2041_v11 = vld [vmem:[%s2285_s7 + $0xd4] ss:$8 sps:$4 sm:$0xff]   ;;  %v1735_v25 = vcombine.low %v346_v1, %v350_v2  ;;  %v1739_v27 = vcombine.low %v348_v6, %v352_v7 }
  0x3f   : > { %1325 = vmatpush1.bf16.msra.mxu0 %v1992_v36  ;;  %1220 = vmatprep.subr.bf16.mxu1 %v1993_v37  ;;  %v2037_v4 = vld [vmem:[%s2285_s7 + $0x2c4] ss:$8 sps:$4 sm:$0xff]   ;;  %v2040_v10 = vld [vmem:[%s2285_s7 + $0x2c0] ss:$8 sps:$4 sm:$0xff]   ;;  %v2043_v12 = vld [vmem:[%s2285_s7 + $0x2d4] ss:$8 sps:$4 sm:$0xff]  }
  0x40   : > { %1326 = vmatprep.subr.bf16.mxu0 %v1995_v38  ;;  %1242 = vmatprep.mubr.bf16.mxu1 %v1736_v5  ;;  %v2045_v13 = vld [vmem:[%s2285_s7 + $0xd0] ss:$8 sps:$4 sm:$0xff]   ;;  %v2047_v15 = vld [vmem:[%s2285_s7 + $0xe4] ss:$8 sps:$4 sm:$0xff]   ;;  %v2051_v17 = vld [vmem:[%s2285_s7 + $0xe0] ss:$8 sps:$4 sm:$0xff]  }
  0x41   : > { %1348 = vmatprep.mubr.bf16.mxu0 %v1740_v8  ;;  %v2046_v14 = vld [vmem:[%s2285_s7 + $0x2d0] ss:$8 sps:$4 sm:$0xff]   ;;  %v2049_v16 = vld [vmem:[%s2285_s7 + $0x2e4] ss:$8 sps:$4 sm:$0xff]   ;;  %v2052_v18 = vld [vmem:[%s2285_s7 + $0x2e0] ss:$8 sps:$4 sm:$0xff]  }
  0x42   : > { %1221 = vmatpush1.bf16.msra.mxu1 %v1997_v39  ;;  %v2053_v19 = vld [vmem:[%s2285_s7 + $0xf4] ss:$8 sps:$4 sm:$0xff]   ;;  %v2057_v21 = vld [vmem:[%s2285_s7 + $0xf0] ss:$8 sps:$4 sm:$0xff]   ;;  %v2061_v23 = vld [vmem:[%s2285_s7 + $0x104] ss:$8 sps:$4 sm:$0xff]  }
  0x43   : > { %1327 = vmatpush1.bf16.msra.mxu0 %v1998_v40  ;;  %1222 = vmatprep.subr.bf16.mxu1 %v1999_v41  ;;  %v2055_v20 = vld [vmem:[%s2285_s7 + $0x2f4] ss:$8 sps:$4 sm:$0xff]   ;;  %v2058_v22 = vld [vmem:[%s2285_s7 + $0x2f0] ss:$8 sps:$4 sm:$0xff]   ;;  %v2064_v24 = vld [vmem:[%s2285_s7 + $0x304] ss:$8 sps:$4 sm:$0xff]  }
  0x44   : > { %1328 = vmatprep.subr.bf16.mxu0 %v2001_v42  ;;  %v2059_v26 = vld [vmem:[%s2285_s7 + $0x100] ss:$8 sps:$4 sm:$0xff]   ;;  %v2067_v29 = vld [vmem:[%s2285_s7 + $0x114] ss:$8 sps:$4 sm:$0xff]   ;;  %v2065_v31 = vld [vmem:[%s2285_s7 + $0x110] ss:$8 sps:$4 sm:$0xff]  }
  0x45   : > { %v2062_v28 = vld [vmem:[%s2285_s7 + $0x300] ss:$8 sps:$4 sm:$0xff]   ;;  %v2070_v30 = vld [vmem:[%s2285_s7 + $0x314] ss:$8 sps:$4 sm:$0xff]   ;;  %v2068_v32 = vld [vmem:[%s2285_s7 + $0x310] ss:$8 sps:$4 sm:$0xff]  }
  0x46   : > { %1223 = vmatpush1.bf16.msra.mxu1 %v2003_v43  ;;  %v2073_v33 = vld [vmem:[%s2285_s7 + $0x124] ss:$8 sps:$4 sm:$0xff]   ;;  %v2071_v35 = vld [vmem:[%s2285_s7 + $0x120] ss:$8 sps:$4 sm:$0xff]   ;;  %v2079_v37 = vld [vmem:[%s2285_s7 + $0x134] ss:$8 sps:$4 sm:$0xff]  }
  0x47   : > { %1329 = vmatpush1.bf16.msra.mxu0 %v2004_v44  ;;  %1224 = vmatprep.subr.bf16.mxu1 %v2005_v45  ;;  %v2076_v34 = vld [vmem:[%s2285_s7 + $0x324] ss:$8 sps:$4 sm:$0xff]   ;;  %v2074_v36 = vld [vmem:[%s2285_s7 + $0x320] ss:$8 sps:$4 sm:$0xff]   ;;  %v2082_v38 = vld [vmem:[%s2285_s7 + $0x334] ss:$8 sps:$4 sm:$0xff]  }
  0x48   : > { %1330 = vmatprep.subr.bf16.mxu0 %v2007_v46  ;;  %v2077_v39 = vld [vmem:[%s2285_s7 + $0x130] ss:$8 sps:$4 sm:$0xff]   ;;  %v2085_v41 = vld [vmem:[%s2285_s7 + $0x144] ss:$8 sps:$4 sm:$0xff]   ;;  %v2083_v43 = vld [vmem:[%s2285_s7 + $0x140] ss:$8 sps:$4 sm:$0xff]  }
  0x49   : > { %v2080_v40 = vld [vmem:[%s2285_s7 + $0x330] ss:$8 sps:$4 sm:$0xff]   ;;  %v2088_v42 = vld [vmem:[%s2285_s7 + $0x344] ss:$8 sps:$4 sm:$0xff]   ;;  %v2086_v44 = vld [vmem:[%s2285_s7 + $0x340] ss:$8 sps:$4 sm:$0xff]  }
  0x4a   : > { %1225 = vmatpush1.bf16.msra.mxu1 %v2009_v47  ;;  %v2091_v45 = vld [vmem:[%s2285_s7 + $0x154] ss:$8 sps:$4 sm:$0xff]   ;;  %v354_v47 = vld [vmem:[%s2287_s8 + $0x40] sm:$0xff]  ;;  %v2101_v5 = vld [vmem:[%s2285_s7 + $0x170] ss:$8 sps:$4 sm:$0xff]  }
  0x4b   : > { %1331 = vmatpush1.bf16.msra.mxu0 %v2010_v48  ;;  %1226 = vmatprep.subr.bf16.mxu1 %v2011_v49  ;;  %v2094_v46 = vld [vmem:[%s2285_s7 + $0x354] ss:$8 sps:$4 sm:$0xff]   ;;  %v358_v48 = vld [vmem:[%s2287_s8 + $0x60] sm:$0xff]  ;;  %v2104_v6 = vld [vmem:[%s2285_s7 + $0x370] ss:$8 sps:$4 sm:$0xff]  }
  0x4c   : > { %1332 = vmatprep.subr.bf16.mxu0 %v2013_v50  ;;  %v1744_v49 = vcombine.high %v354_v47, %v358_v48  ;;  %v356_v50 = vld [vmem:[%s2287_s8 + $0x50] sm:$0xff]  ;;  %v2109_v7 = vld [vmem:[%s2285_s7 + $0x184] ss:$8 sps:$4 sm:$0xff]  }
  0x4d   : > { %v2106_v1 = vld [vmem:[%s2285_s7 + $0x374] ss:$8 sps:$4 sm:$0xff]   ;;  %v2112_v8 = vld [vmem:[%s2285_s7 + $0x384] ss:$8 sps:$4 sm:$0xff]  }
  0x4e   : > { %1227 = vmatpush1.bf16.msra.mxu1 %v2015_v51  ;;  %v360_v51 = vld [vmem:[%s2287_s8 + $0x70] sm:$0xff] }
  0x4f   : > { %1333 = vmatpush1.bf16.msra.mxu0 %v2016_v52  ;;  %1228 = vmatprep.subr.bf16.mxu1 %v2017_v53  ;;  %v2089_v52 = vld [vmem:[%s2285_s7 + $0x150] ss:$8 sps:$4 sm:$0xff]  }
  0x50   : > { %1334 = vmatprep.subr.bf16.mxu0 %v2019_v54  ;;  %v2092_v53 = vld [vmem:[%s2285_s7 + $0x350] ss:$8 sps:$4 sm:$0xff]   ;;  %v1748_v54 = vcombine.high %v356_v50, %v360_v51 }
  0x52   : > { %1229 = vmatpush1.bf16.msra.mxu1 %v2021_v55  ;;  %v1743_v55 = vcombine.low %v354_v47, %v358_v48 }
  0x53   : > { %1335 = vmatpush1.bf16.msra.mxu0 %v2022_v56  ;;  %1230 = vmatprep.subr.bf16.mxu1 %v2023_v57  ;;  %v1747_v56 = vcombine.low %v356_v50, %v360_v51  ;;  %v2097_v57 = vld [vmem:[%s2285_s7 + $0x164] ss:$8 sps:$4 sm:$0xff]  }
  0x54   : > { %1336 = vmatprep.subr.bf16.mxu0 %v2025_v58  ;;  %v2100_v58 = vld [vmem:[%s2285_s7 + $0x364] ss:$8 sps:$4 sm:$0xff]  }
  0x55   : > { %v338_v50 = vld [vmem:[#allocation2] sm:$0xff] }
  0x56   : > { %1231 = vmatpush1.bf16.msra.mxu1 %v2027_v59  ;;  %v2095_v59 = vld [vmem:[%s2285_s7 + $0x160] ss:$8 sps:$4 sm:$0xff]  }
  0x57   : > { %1337 = vmatpush1.bf16.msra.mxu0 %v2028_v60  ;;  %1232 = vmatprep.subr.bf16.mxu1 %v2029_v61  ;;  %v2098_v60 = vld [vmem:[%s2285_s7 + $0x360] ss:$8 sps:$4 sm:$0xff]  }
  0x58   : > { %1338 = vmatprep.subr.bf16.mxu0 %v2031_v62  ;;  %v2391_v61 = vld [vmem:[%s2287_s8 + $0x8] sm:$0xff] }
  0x59   : > { %v2394_v62 = vld [vmem:[%s2287_s8 + $0x28] sm:$0xff] }
  0x5a   : > { %1233 = vmatpush1.bf16.msra.mxu1 %v2033_v63  ;;  %v2397_v63 = vld [vmem:[%s2287_s8 + $0x18] sm:$0xff]  ;;  %v1738_v2 = vcombine.high %v2391_v61, %v2394_v62 }
  0x5b   : > { %1339 = vmatpush1.bf16.msra.mxu0 %v2034_v0  ;;  %1234 = vmatprep.subr.bf16.mxu1 %v2035_v3  ;;  %v2103_v0 = vld [vmem:[%s2285_s7 + $0x174] ss:$8 sps:$4 sm:$0xff]  }
  0x5c   : > { %1340 = vmatprep.subr.bf16.mxu0 %v2037_v4  ;;  %v2404_v3 = vld [vmem:[%s2287_s8 + $0x38] sm:$0xff] }
  0x5d   : > { %v1742_v4 = vcombine.high %v2397_v63, %v2404_v3 }
  0x5e   : > { %1235 = vmatpush1.bf16.msra.mxu1 %v2039_v9  ;;  %v2107_v9 = vld [vmem:[%s2285_s7 + $0x180] ss:$8 sps:$4 sm:$0xff]  }
  0x5f   : > { %1341 = vmatpush1.bf16.msra.mxu0 %v2040_v10  ;;  %1236 = vmatprep.subr.bf16.mxu1 %v2041_v11  ;;  %v2110_v10 = vld [vmem:[%s2285_s7 + $0x380] ss:$8 sps:$4 sm:$0xff]   ;;  %v2115_v11 = vld [vmem:[%s2285_s7 + $0x194] ss:$8 sps:$4 sm:$0xff]  }
  0x60   : > { %1342 = vmatprep.subr.bf16.mxu0 %v2043_v12  ;;  %v2118_v12 = vld [vmem:[%s2285_s7 + $0x394] ss:$8 sps:$4 sm:$0xff]  }
  0x62   : > { %1237 = vmatpush1.bf16.msra.mxu1 %v2045_v13  ;;  %v2113_v13 = vld [vmem:[%s2285_s7 + $0x190] ss:$8 sps:$4 sm:$0xff]  }
  0x63   : > { %1343 = vmatpush1.bf16.msra.mxu0 %v2046_v14  ;;  %1238 = vmatprep.subr.bf16.mxu1 %v2047_v15  ;;  %v2116_v14 = vld [vmem:[%s2285_s7 + $0x390] ss:$8 sps:$4 sm:$0xff]   ;;  %v2121_v15 = vld [vmem:[%s2285_s7 + $0x1a4] ss:$8 sps:$4 sm:$0xff]  }
  0x64   : > { %1344 = vmatprep.subr.bf16.mxu0 %v2049_v16  ;;  %v2124_v16 = vld [vmem:[%s2285_s7 + $0x3a4] ss:$8 sps:$4 sm:$0xff]  }
  0x66   : > { %1239 = vmatpush1.bf16.msra.mxu1 %v2051_v17  ;;  %v2119_v17 = vld [vmem:[%s2285_s7 + $0x1a0] ss:$8 sps:$4 sm:$0xff]  }
  0x67   : > { %1345 = vmatpush1.bf16.msra.mxu0 %v2052_v18  ;;  %1240 = vmatprep.subr.bf16.mxu1 %v2053_v19  ;;  %v2122_v18 = vld [vmem:[%s2285_s7 + $0x3a0] ss:$8 sps:$4 sm:$0xff]   ;;  %v2127_v19 = vld [vmem:[%s2285_s7 + $0x1b4] ss:$8 sps:$4 sm:$0xff]  }
  0x68   : > { %1346 = vmatprep.subr.bf16.mxu0 %v2055_v20  ;;  %v2130_v20 = vld [vmem:[%s2285_s7 + $0x3b4] ss:$8 sps:$4 sm:$0xff]  }
  0x6a   : > { %1241 = vmatpush1.bf16.msra.mxu1 %v2057_v21  ;;  %v2125_v21 = vld [vmem:[%s2285_s7 + $0x1b0] ss:$8 sps:$4 sm:$0xff]  }
  0x6b   : > { %1347 = vmatpush1.bf16.msra.mxu0 %v2058_v22  ;;  %1263 = vmatprep.subr.bf16.mxu1 %v2061_v23  ;;  %v2128_v22 = vld [vmem:[%s2285_s7 + $0x3b0] ss:$8 sps:$4 sm:$0xff]   ;;  %v2133_v23 = vld [vmem:[%s2285_s7 + $0x1c4] ss:$8 sps:$4 sm:$0xff]  }
  0x6c   : > { %1369 = vmatprep.subr.bf16.mxu0 %v2064_v24  ;;  %v2136_v24 = vld [vmem:[%s2285_s7 + $0x3c4] ss:$8 sps:$4 sm:$0xff]  }
  0x6d   : > { %1243 = vmatmul.mubr.bf16.vlgmr.msra.gmra.mrb[0].mxu1 %v1735_v25  ;;  %v2131_v25 = vld [vmem:[%s2285_s7 + $0x1c0] ss:$8 sps:$4 sm:$0xff]  }
  0x6e   : > { %1349 = vmatmul.mubr.bf16.vlgmr.msra.gmra.mrb[0].mxu0 %v1739_v27  ;;  %1264 = vmatpush1.bf16.msra.mxu1 %v2059_v26  ;;  %v2134_v26 = vld [vmem:[%s2285_s7 + $0x3c0] ss:$8 sps:$4 sm:$0xff]   ;;  %v2139_v27 = vld [vmem:[%s2285_s7 + $0x1d4] ss:$8 sps:$4 sm:$0xff]  }
  0x6f   : > { %1370 = vmatpush1.bf16.msra.mxu0 %v2062_v28  ;;  %1265 = vmatprep.subr.bf16.mxu1 %v2067_v29  ;;  %v2142_v28 = vld [vmem:[%s2285_s7 + $0x3d4] ss:$8 sps:$4 sm:$0xff]   ;;  %v2137_v29 = vld [vmem:[%s2285_s7 + $0x1d0] ss:$8 sps:$4 sm:$0xff]  }
  0x70   : > { %1371 = vmatprep.subr.bf16.mxu0 %v2070_v30  ;;  %1252 = vmatprep.mubr.bf16.mxu1 %v1744_v49  ;;  %v2140_v30 = vld [vmem:[%s2285_s7 + $0x3d0] ss:$8 sps:$4 sm:$0xff]  }
  0x71   : > { %1358 = vmatprep.mubr.bf16.mxu0 %v1748_v54  ;;  %v339_v54 = vld [vmem:[#allocation2 + $0x8] sm:$0xff] }
  0x72   : > { %1266 = vmatpush1.bf16.msra.mxu1 %v2065_v31  ;;  %v2145_v31 = vld [vmem:[%s2285_s7 + $0x1e4] ss:$8 sps:$4 sm:$0xff]  }
  0x73   : > { %1372 = vmatpush1.bf16.msra.mxu0 %v2068_v32  ;;  %1267 = vmatprep.subr.bf16.mxu1 %v2073_v33  ;;  %v2148_v32 = vld [vmem:[%s2285_s7 + $0x3e4] ss:$8 sps:$4 sm:$0xff]   ;;  %v2143_v33 = vld [vmem:[%s2285_s7 + $0x1e0] ss:$8 sps:$4 sm:$0xff]  }
  0x74   : > { %1373 = vmatprep.subr.bf16.mxu0 %v2076_v34  ;;  %v2146_v34 = vld [vmem:[%s2285_s7 + $0x3e0] ss:$8 sps:$4 sm:$0xff]  }
  0x75   : > { %1253 = vmatmul.mubr.bf16.gmra.mrb[4].mxu1 %v1743_v55 }
  0x76   : > { %1268 = vmatpush1.bf16.msra.mxu1 %v2071_v35  ;;  %1359 = vmatmul.mubr.bf16.gmra.mrb[4].mxu0 %v1747_v56  ;;  %v2151_v35 = vld [vmem:[%s2285_s7 + $0x1f4] ss:$8 sps:$4 sm:$0xff]  }
  0x77   : > { %1374 = vmatpush1.bf16.msra.mxu0 %v2074_v36  ;;  %1269 = vmatprep.subr.bf16.mxu1 %v2079_v37  ;;  %v2154_v36 = vld [vmem:[%s2285_s7 + $0x3f4] ss:$8 sps:$4 sm:$0xff]   ;;  %v2149_v37 = vld [vmem:[%s2285_s7 + $0x1f0] ss:$8 sps:$4 sm:$0xff]  }
  0x78   : > { %1375 = vmatprep.subr.bf16.mxu0 %v2082_v38  ;;  %1295 = vmatprep.mubr.bf16.mxu1 %v1738_v2  ;;  %v2152_v38 = vld [vmem:[%s2285_s7 + $0x3f0] ss:$8 sps:$4 sm:$0xff]  }
  0x79   : > { %1401 = vmatprep.mubr.bf16.mxu0 %v1742_v4 }
  0x7a   : > { %1270 = vmatpush1.bf16.msra.mxu1 %v2077_v39  ;;  %v355_v39 = vld [vmem:[%s2287_s8 + $0x48] sm:$0xff] }
  0x7b   : > { %1376 = vmatpush1.bf16.msra.mxu0 %v2080_v40  ;;  %1271 = vmatprep.subr.bf16.mxu1 %v2085_v41  ;;  %v359_v40 = vld [vmem:[%s2287_s8 + $0x68] sm:$0xff]  ;;  %v357_v41 = vld [vmem:[%s2287_s8 + $0x58] sm:$0xff] }
  0x7c   : > { %1377 = vmatprep.subr.bf16.mxu0 %v2088_v42  ;;  %v361_v42 = vld [vmem:[%s2287_s8 + $0x78] sm:$0xff]  ;;  %v1745_v47 = vcombine.low %v355_v39, %v359_v40 }
  0x7d   : > { %v1749_v48 = vcombine.low %v357_v41, %v361_v42 }
  0x7e   : > { %1272 = vmatpush1.bf16.msra.mxu1 %v2083_v43  ;;  %v1737_v43 = vcombine.low %v2391_v61, %v2394_v62 }
  0x7f   : > { %1378 = vmatpush1.bf16.msra.mxu0 %v2086_v44  ;;  %1273 = vmatprep.subr.bf16.mxu1 %v2091_v45  ;;  %v1741_v44 = vcombine.low %v2397_v63, %v2404_v3  ;;  %v1746_v45 = vcombine.high %v355_v39, %v359_v40  ;;  %v341_v63 = vld [vmem:[#allocation2 + $0x18] sm:$0xff] }
  0x80   : > { %1379 = vmatprep.subr.bf16.mxu0 %v2094_v46  ;;  %v1750_v46 = vcombine.high %v357_v41, %v361_v42 }
  0x82   : > { %1274 = vmatpush1.bf16.msra.mxu1 %v2089_v52 }
  0x83   : > { %1380 = vmatpush1.bf16.msra.mxu0 %v2092_v53  ;;  %1275 = vmatprep.subr.bf16.mxu1 %v2097_v57 }
  0x84   : > { %1381 = vmatprep.subr.bf16.mxu0 %v2100_v58  ;;  %v340_v58 = vld [vmem:[#allocation2 + $0x10] sm:$0xff] }
  0x86   : > { %1276 = vmatpush1.bf16.msra.mxu1 %v2095_v59 }
  0x87   : > { %1382 = vmatpush1.bf16.msra.mxu0 %v2098_v60  ;;  %1277 = vmatprep.subr.bf16.mxu1 %v2103_v0 }
  0x88   : > { %1383 = vmatprep.subr.bf16.mxu0 %v2106_v1 }
  0x8a   : > { %1278 = vmatpush1.bf16.msra.mxu1 %v2101_v5 }
  0x8b   : > { %1384 = vmatpush1.bf16.msra.mxu0 %v2104_v6  ;;  %1279 = vmatprep.subr.bf16.mxu1 %v2109_v7  ;;  %v342_v6 = vld [vmem:[#allocation2 + $0x20] sm:$0xff] }
  0x8c   : > { %1385 = vmatprep.subr.bf16.mxu0 %v2112_v8 }
  0x8e   : > { %1280 = vmatpush1.bf16.msra.mxu1 %v2107_v9 }
  0x8f   : > { %1386 = vmatpush1.bf16.msra.mxu0 %v2110_v10  ;;  %1281 = vmatprep.subr.bf16.mxu1 %v2115_v11  ;;  %v343_v10 = vld [vmem:[#allocation2 + $0x28] sm:$0xff] }
  0x90   : > { %1387 = vmatprep.subr.bf16.mxu0 %v2118_v12 }
  0x92   : > { %1282 = vmatpush1.bf16.msra.mxu1 %v2113_v13 }
  0x93   : > { %1388 = vmatpush1.bf16.msra.mxu0 %v2116_v14  ;;  %1283 = vmatprep.subr.bf16.mxu1 %v2121_v15  ;;  %v344_v14 = vld [vmem:[#allocation2 + $0x30] sm:$0xff] }
  0x94   : > { %1389 = vmatprep.subr.bf16.mxu0 %v2124_v16 }
  0x96   : > { %1284 = vmatpush1.bf16.msra.mxu1 %v2119_v17 }
  0x97   : > { %1390 = vmatpush1.bf16.msra.mxu0 %v2122_v18  ;;  %1285 = vmatprep.subr.bf16.mxu1 %v2127_v19  ;;  %v345_v19 = vld [vmem:[#allocation2 + $0x38] sm:$0xff] }
  0x98   : > { %1391 = vmatprep.subr.bf16.mxu0 %v2130_v20 }
  0x9a   : > { %1286 = vmatpush1.bf16.msra.mxu1 %v2125_v21 }
  0x9b   : > { %1392 = vmatpush1.bf16.msra.mxu0 %v2128_v22  ;;  %1287 = vmatprep.subr.bf16.mxu1 %v2133_v23 }
  0x9c   : > { %1393 = vmatprep.subr.bf16.mxu0 %v2136_v24 }
  0x9e   : > { %1288 = vmatpush1.bf16.msra.mxu1 %v2131_v25 }
  0x9f   : > { %1394 = vmatpush1.bf16.msra.mxu0 %v2134_v26  ;;  %1289 = vmatprep.subr.bf16.mxu1 %v2139_v27 }
  0xa0   : > { %1395 = vmatprep.subr.bf16.mxu0 %v2142_v28 }
  0xa2   : > { %1290 = vmatpush1.bf16.msra.mxu1 %v2137_v29 }
  0xa3   : > { %1396 = vmatpush1.bf16.msra.mxu0 %v2140_v30  ;;  %1291 = vmatprep.subr.bf16.mxu1 %v2145_v31 }
  0xa4   : > { %1397 = vmatprep.subr.bf16.mxu0 %v2148_v32 }
  0xa6   : > { %1292 = vmatpush1.bf16.msra.mxu1 %v2143_v33 }
  0xa7   : > { %1398 = vmatpush1.bf16.msra.mxu0 %v2146_v34  ;;  %1293 = vmatprep.subr.bf16.mxu1 %v2151_v35 }
  0xa8   : > { %1399 = vmatprep.subr.bf16.mxu0 %v2154_v36 }
  0xaa   : > { %1294 = vmatpush1.bf16.msra.mxu1 %v2149_v37 }
  0xab   : > { %1400 = vmatpush1.bf16.msra.mxu0 %v2152_v38 }
  0xad   : > { %1296 = vmatmul.mubr.bf16.vlgmr.msra.gmra.mrb[0].mxu1 %v1737_v43 }
  0xae   : > { %1402 = vmatmul.mubr.bf16.vlgmr.msra.gmra.mrb[0].mxu0 %v1741_v44  ;;  %1305 = vmatprep.mubr.bf16.mxu1 %v1746_v45 }
  0xaf   : > { %1411 = vmatprep.mubr.bf16.mxu0 %v1750_v46 }
  0xb5   : > { %1306 = vmatmul.mubr.bf16.gmra.mrb[4].mxu1 %v1745_v47 }
  0xb6   : > { %1412 = vmatmul.mubr.bf16.gmra.mrb[4].mxu0 %v1749_v48 }
 0x180   : > { %v1297_v49 = vpop.f32.mrb[0].mxu1 }
 0x181   : > { %v1403_v51 = vpop.f32.mrb[0].mxu0  ;;  %v1299_v53 = vpop.f32.mrb[1].mxu1 }
 0x182   : > { %v1897_v52 = vadd.f32 %v1403_v51, %v1297_v49  ;;  %v1405_v55 = vpop.f32.mrb[1].mxu0  ;;  %v1301_v57 = vpop.f32.mrb[2].mxu1 }
 0x183   : > { %v1898_v56 = vadd.f32 %v1405_v55, %v1299_v53  ;;  %v1407_v59 = vpop.f32.mrb[2].mxu0  ;;  %v1303_v62 = vpop.f32.mrb[3].mxu1 }
 0x184   : > { %v1422_v60 = vadd.f32 %v1897_v52, %v338_v50  ;;  %v1899_v61 = vadd.f32 %v1407_v59, %v1301_v57  ;;  %v1409_v0 = vpop.f32.mrb[3].mxu0 }
 0x185   : > { %v1423_v1 = vadd.f32 %v1898_v56, %v339_v54  ;;  %v1900_v2 = vadd.f32 %v1409_v0, %v1303_v62  ;;  %v2196_v0 = vmov (!%p1879_p11), 1966171168  }
 0x186   : > { %1430 = vst [vmem:[#allocation2] sm:$0xff] %v1422_v60  ;;  %v1424_v3 = vadd.f32 %v1899_v61, %v340_v58  ;;  %v1528_v60 = vlaneseq (!%p1879_p11) }
 0x187   : > { %1431 = vst [vmem:[#allocation2 + $0x8] sm:$0xff] %v1423_v1  ;;  %v1425_v4 = vadd.f32 %v1900_v2, %v341_v63  ;;  %v1526_v1 = vunpack.c.l.s4 (!%p1879_p11), %v2196_v0 }
 0x188   : > { %1432 = vst [vmem:[#allocation2 + $0x10] sm:$0xff] %v1424_v3  ;;  %v1307_v5 = vpop.f32.mrb[4].mxu1  ;;  %vm1542_vm0 = vcmp.lt.s32.totalorder (!%p1879_p11), %v1528_v60, 256 }
 0x189   : > { %1433 = vst [vmem:[#allocation2 + $0x18] sm:$0xff] %v1425_v4  ;;  %v1413_v7 = vpop.f32.mrb[4].mxu0  ;;  %v1309_v9 = vpop.f32.mrb[5].mxu1 }
 0x18a   : > { %v1901_v8 = vadd.f32 %v1413_v7, %v1307_v5  ;;  %v1415_v11 = vpop.f32.mrb[5].mxu0  ;;  %v1311_v13 = vpop.f32.mrb[6].mxu1  ;;  %v1529_v7 = vshrl.u32 (!%p1879_p11), %v1528_v60, 7 }
 0x18b   : > { %v1902_v12 = vadd.f32 %v1415_v11, %v1309_v9  ;;  %v1417_v15 = vpop.f32.mrb[6].mxu0  ;;  %v1313_v18 = vpop.f32.mrb[7].mxu1  ;;  %1441 = sbr.rel (%p1879_p11) target bundleno = 432 (0x1b0), region = 59  ;;  %v1527_v11 = vunpack.c.0.s8 (!%p1879_p11), %v1526_v1 }
 0x18c   : > { %v1426_v16 = vadd.f32 %v1901_v8, %v342_v6  ;;  %v1903_v17 = vadd.f32 %v1417_v15, %v1311_v13  ;;  %v1419_v20 = vpop.f32.mrb[7].mxu0 }
 0x18d   : > { %v1427_v21 = vadd.f32 %v1902_v12, %v343_v10  ;;  %v1904_v22 = vadd.f32 %v1419_v20, %v1313_v18  ;;  %v1442_v25 = vld [vmem:[#allocation2] sm:$0xff] (!%p1879_p11)  ;;  %v1530_v18 = vsub.s32 (!%p1879_p11), %v1527_v11, %v1529_v7 }
 0x18e   : > { %1434 = vst [vmem:[#allocation2 + $0x20] sm:$0xff] %v1426_v16  ;;  %v1428_v23 = vadd.f32 %v1903_v17, %v344_v14  ;;  %v1443_v26 = vld [vmem:[#allocation2 + $0x8] sm:$0xff] (!%p1879_p11)  ;;  %v1496_v29 = vmul.f32 (!%p1879_p11), %v1442_v25, %v1442_v25 }
 0x18f   : > { %1435 = vst [vmem:[#allocation2 + $0x28] sm:$0xff] %v1427_v21  ;;  %v1429_v24 = vadd.f32 %v1904_v22, %v345_v19  ;;  %v1444_v27 = vld [vmem:[#allocation2 + $0x10] sm:$0xff] (!%p1879_p11)  ;;  %v1893_v28 = vpack.c.bf16 (!%p1879_p11), %v1443_v26, %v1442_v25  ;;  %v1497_v30 = vmul.f32 (!%p1879_p11), %v1443_v26, %v1443_v26 }
 0x190   : > { %1436 = vst [vmem:[#allocation2 + $0x30] sm:$0xff] %v1428_v23  ;;  %v1445_v31 = vld [vmem:[#allocation2 + $0x18] sm:$0xff] (!%p1879_p11)  ;;  %v1478_v32 = vadd.f32 (!%p1879_p11), %v1444_v27, %v1442_v25  ;;  %v1498_v37 = vmul.f32 (!%p1879_p11), %v1444_v27, %v1444_v27 }
 0x191   : > { %1437 = vst [vmem:[#allocation2 + $0x38] sm:$0xff] %v1429_v24  ;;  %v1894_v35 = vpack.c.bf16 (!%p1879_p11), %v1445_v31, %v1444_v27  ;;  %v1487_v36 = vadd.f32 (!%p1879_p11), %v1445_v31, %v1443_v26  ;;  %v1499_v38 = vmul.f32 (!%p1879_p11), %v1445_v31, %v1445_v31  ;;  %1474 = vst [vmem:[%s2486_s2] sm:$0xff] (!%p1879_p11), %v1893_v28 }
 0x192   : > { %v1504_v45 = vadd.f32 %v1498_v37, %v1496_v29 }
 0x193   : > { %1475 = vst [vmem:[%s2486_s2 + $0x8] sm:$0xff] %v1894_v35  ;;  %v1513_v46 = vadd.f32 %v1499_v38, %v1497_v30 }
 0x195   : > { %v1446_v33 = vld [vmem:[#allocation2 + $0x20] sm:$0xff] }
 0x196   : > { %v1447_v34 = vld [vmem:[#allocation2 + $0x28] sm:$0xff]  ;;  %v1479_v42 = vadd.f32 %v1478_v32, %v1446_v33  ;;  %v1500_v43 = vmul.f32 %v1446_v33, %v1446_v33 }
 0x197   : > { %v1448_v39 = vld [vmem:[#allocation2 + $0x30] sm:$0xff]  ;;  %v1895_v41 = vpack.c.bf16 %v1447_v34, %v1446_v33  ;;  %v1501_v44 = vmul.f32 %v1447_v34, %v1447_v34  ;;  %v1488_v47 = vadd.f32 %v1487_v36, %v1447_v34 }
 0x198   : > { %v1449_v40 = vld [vmem:[#allocation2 + $0x38] sm:$0xff]  ;;  %v1480_v49 = vadd.f32 %v1479_v42, %v1448_v39  ;;  %v1502_v50 = vmul.f32 %v1448_v39, %v1448_v39  ;;  %v1505_v52 = vadd.f32 %v1504_v45, %v1500_v43 }
 0x199   : > { %v1896_v48 = vpack.c.bf16 %v1449_v40, %v1448_v39  ;;  %1476 = vst [vmem:[%s2486_s2 + $0x10] sm:$0xff] %v1895_v41  ;;  %v1503_v51 = vmul.f32 %v1449_v40, %v1449_v40  ;;  %v1514_v53 = vadd.f32 %v1513_v46, %v1501_v44  ;;  %v1489_v54 = vadd.f32 %v1488_v47, %v1449_v40 }
 0x19a   : > { %v1481_v55 = vrot.slane %v1480_v49, 4  ;;  %v1506_v57 = vadd.f32 %v1505_v52, %v1502_v50 }
 0x19b   : > { %1477 = vst [vmem:[%s2486_s2 + $0x18] sm:$0xff] %v1896_v48  ;;  %v1490_v56 = vrot.slane %v1489_v54, 4  ;;  %v1515_v58 = vadd.f32 %v1514_v53, %v1503_v51 }
 0x19c   : > { %v1482_v59 = vadd.f32 %v1481_v55, %v1480_v49  ;;  %v1507_v62 = vrot.slane %v1506_v57, 4 }
 0x19d   : > { %v1491_v61 = vadd.f32 %v1490_v56, %v1489_v54  ;;  %v1516_v63 = vrot.slane %v1515_v58, 4 }
 0x19e   : > { %v1483_v2 = vrot.slane %v1482_v59, 2  ;;  %v1508_v4 = vadd.f32 %v1507_v62, %v1506_v57 }
 0x19f   : > { %v1492_v3 = vrot.slane %v1491_v61, 2  ;;  %v1517_v5 = vadd.f32 %v1516_v63, %v1515_v58 }
 0x1a0   : > { %v1484_v6 = vadd.f32 %v1483_v2, %v1482_v59  ;;  %v1509_v9 = vrot.slane %v1508_v4, 2 }
 0x1a1   : > { %v1493_v8 = vadd.f32 %v1492_v3, %v1491_v61  ;;  %v1518_v10 = vrot.slane %v1517_v5, 2 }
 0x1a2   : > { %v1485_v12 = vrot.slane %v1484_v6, 1  ;;  %v1510_v14 = vadd.f32 %v1509_v9, %v1508_v4 }
 0x1a3   : > { %v1494_v13 = vrot.slane %v1493_v8, 1  ;;  %v1519_v15 = vadd.f32 %v1518_v10, %v1517_v5 }
 0x1a4   : > { %v1486_v16 = vadd.f32 %v1485_v12, %v1484_v6  ;;  %v1511_v19 = vrot.slane %v1510_v14, 1 }
 0x1a5   : > { %v1495_v17 = vadd.f32 %v1494_v13, %v1493_v8  ;;  %v1520_v20 = vrot.slane %v1519_v15, 1 }
 0x1a6   : > { %v1512_v22 = vadd.f32 %v1511_v19, %v1510_v14 }
 0x1a7   : > { %v1524_v21 = vcombine.low %v1486_v16, %v1495_v17  ;;  %v1521_v23 = vadd.f32 %v1520_v20, %v1519_v15 }
 0x1a9   : > { %v1531_v24 = vrot.slane %v1524_v21, %v1530_v18  ;;  %v1547_v25 = vcombine.low %v1512_v22, %v1521_v23 }
 0x1ab   : > { %v1538_v26 = vrot.slane %v1531_v24, %v1530_v18  ;;  %v1554_v27 = vrot.slane %v1547_v25, %v1530_v18 }
 0x1ad   : > { %1544 = vst.msk [vmem:[%s2487_s3] ss:$2 sm:$0x3] %vm1542_vm0, %v1538_v26  ;;  %v1561_v28 = vrot.slane %v1554_v27, %v1530_v18 }
 0x1af   : > { %1884 = vst.msk [vmem:[%s2487_s3 + $0x1] ss:$2 sm:$0x3] %vm1542_vm0, %v1561_v28 }
 0x1b0 PF: > { %s14_s16 = sadd.s32 1, %s2193_s16   ;;  %s2488_s12 = smov %s2181_s13 }
 0x1b1   : > { %p11_p12 = scmp.ge.s32.totalorder %s14_s16, 4   ;;  %s2489_s13 = smov %s2252_s20 }
 0x1b2   : > { %s2490_s14 = smov %s2189_s15  ;;  %s2491_s15 = smov %s2493_s17 }
 0x1b3   :  { %13 = sbr.rel (!%p11_p12) target bundleno = 3 (0x3), region = 110 }

// kernel: discriminator_forward.14
= control target key start
LH: loop header
LB: loop body
LE: loop exit
PB: predicated region body
PF: predicated region fallthrough
CT: control target
= control target key end

     0   :  { %v37_v0 = vlaneseq  ;;  %s362_s0 = inlined_call_operand.vmem [shape: bf16[32,512], index: 0, kind: input, shape index: {}]   ;;  %s363_s1 = inlined_call_operand.vmem [shape: f32[2,512], index: 1, kind: input, shape index: {}]   ;;  %s364_s2 = inlined_call_operand.vmem [shape: bf16[32,512], index: 2, kind: output, shape index: {}]  }
   0x1   :  { %v11_v1 = vld [vmem:[%s362_s0] sm:$0xff]  ;;  %v12_v2 = vld [vmem:[%s362_s0 + $0x8] sm:$0xff]  ;;  %v13_v8 = vld [vmem:[%s362_s0 + $0x10] sm:$0xff] }
   0x2   :  { %v19_v3 = vunpack.c.l.bf16 %v11_v1  ;;  %v20_v4 = vunpack.c.h.bf16 %v11_v1  ;;  %v35_v5 = vld [vmem:[%s363_s1] ss:$2 sm:$0xf]  ;;  %v38_v6 = vshrl.u32 %v37_v0, 7  ;;  %v21_v7 = vunpack.c.l.bf16 %v12_v2  ;;  %v14_v9 = vld [vmem:[%s362_s0 + $0x18] sm:$0xff]  ;;  %v278_v16 = vld [vmem:[%s362_s0 + $0x28] sm:$0xff] }
   0x3   :  { %v220_v10 = vld [vmem:[%s363_s1 + $0x1] ss:$2 sm:$0xf]  ;;  %v22_v11 = vunpack.c.h.bf16 %v12_v2  ;;  %v23_v12 = vunpack.c.l.bf16 %v13_v8  ;;  %v24_v13 = vunpack.c.h.bf16 %v13_v8  ;;  %v25_v14 = vunpack.c.l.bf16 %v14_v9 }
   0x4   :  { %v273_v15 = vld [vmem:[%s362_s0 + $0x20] sm:$0xff]  ;;  %v39_v17 = vsub.s32 0, %v38_v6  ;;  %v43_v18 = vsub.s32 1, %v38_v6  ;;  %v47_v19 = vsub.s32 2, %v38_v6  ;;  %v51_v20 = vsub.s32 3, %v38_v6 }
   0x5   :  { %v26_v21 = vunpack.c.h.bf16 %v14_v9  ;;  %v27_v22 = vunpack.c.l.bf16 %v273_v15  ;;  %v28_v23 = vunpack.c.h.bf16 %v273_v15  ;;  %v29_v24 = vunpack.c.l.bf16 %v278_v16 }
   0x6   :  { %v283_v25 = vrot.slane %v35_v5, %v39_v17  ;;  %v285_v26 = vrot.slane %v35_v5, %v43_v18  ;;  %v287_v27 = vrot.slane %v220_v10, %v39_v17  ;;  %v289_v28 = vrot.slane %v220_v10, %v43_v18  ;;  %v18_v17 = vld [vmem:[%s362_s0 + $0x38] sm:$0xff] }
   0x7   :  { %v291_v29 = vrot.slane %v35_v5, %v47_v19  ;;  %v293_v30 = vrot.slane %v35_v5, %v51_v20  ;;  %v295_v31 = vrot.slane %v220_v10, %v47_v19  ;;  %v297_v32 = vrot.slane %v220_v10, %v51_v20  ;;  %v17_v5 = vld [vmem:[%s362_s0 + $0x30] sm:$0xff] }
   0x8   :  { %v57_v33 = vmul.f32 %v283_v25, %v19_v3  ;;  %v58_v34 = vmul.f32 %v285_v26, %v20_v4  ;;  %v61_v35 = vmul.f32 %v283_v25, %v23_v12  ;;  %v62_v36 = vmul.f32 %v285_v26, %v24_v13 }
   0x9   :  { %v59_v37 = vmul.f32 %v291_v29, %v21_v7  ;;  %v60_v38 = vmul.f32 %v293_v30, %v22_v11  ;;  %v63_v39 = vmul.f32 %v291_v29, %v25_v14  ;;  %v64_v40 = vmul.f32 %v293_v30, %v26_v21 }
   0xa   :  { %v96_v41 = vadd.f32 %v287_v27, %v57_v33  ;;  %v97_v42 = vadd.f32 %v289_v28, %v58_v34  ;;  %v100_v43 = vadd.f32 %v287_v27, %v61_v35  ;;  %v101_v44 = vadd.f32 %v289_v28, %v62_v36 }
   0xb   :  { %v98_v45 = vadd.f32 %v295_v31, %v59_v37  ;;  %v99_v46 = vadd.f32 %v297_v32, %v60_v38  ;;  %v102_v47 = vadd.f32 %v295_v31, %v63_v39  ;;  %v103_v48 = vadd.f32 %v297_v32, %v64_v40 }
   0xc   :  { %vm112_vm0 = vcmp.ge.f32.partialorder %v96_v41, 0.0  ;;  %vm113_vm1 = vcmp.ge.f32.partialorder %v97_v42, 0.0  ;;  %v128_v49 = vmul.f32 0.2, %v96_v41  ;;  %v129_v50 = vmul.f32 0.2, %v97_v42 }
   0xd   :  { %vm114_vm2 = vcmp.ge.f32.partialorder %v98_v45, 0.0  ;;  %vm115_vm3 = vcmp.ge.f32.partialorder %v99_v46, 0.0  ;;  %v130_v51 = vmul.f32 0.2, %v98_v45  ;;  %v131_v52 = vmul.f32 0.2, %v99_v46 }
   0xe   :  { %v144_v53 = vsel %vm112_vm0, %v96_v41, %v128_v49  ;;  %v145_v54 = vsel %vm113_vm1, %v97_v42, %v129_v50  ;;  %vm116_vm4 = vcmp.ge.f32.partialorder %v100_v43, 0.0  ;;  %vm117_vm5 = vcmp.ge.f32.partialorder %v101_v44, 0.0 }
   0xf   :  { %v229_v55 = vpack.c.bf16 %v145_v54, %v144_v53  ;;  %v146_v56 = vsel %vm114_vm2, %v98_v45, %v130_v51  ;;  %v147_v57 = vsel %vm115_vm3, %v99_v46, %v131_v52  ;;  %v132_v58 = vmul.f32 0.2, %v100_v43 }
  0x10   :  { %v230_v59 = vpack.c.bf16 %v147_v57, %v146_v56  ;;  %v133_v60 = vmul.f32 0.2, %v101_v44  ;;  %vm118_vm6 = vcmp.ge.f32.partialorder %v102_v47, 0.0  ;;  %vm119_vm7 = vcmp.ge.f32.partialorder %v103_v48, 0.0 }
  0x11   :  { %208 = vst [vmem:[%s364_s2] sm:$0xff] %v229_v55  ;;  %v148_v61 = vsel %vm116_vm4, %v100_v43, %v132_v58  ;;  %v134_v62 = vmul.f32 0.2, %v102_v47  ;;  %v135_v63 = vmul.f32 0.2, %v103_v48  ;;  %v65_v0 = vmul.f32 %v283_v25, %v27_v22 }
  0x12   :  { %209 = vst [vmem:[%s364_s2 + $0x8] sm:$0xff] %v230_v59  ;;  %v149_v1 = vsel %vm117_vm5, %v101_v44, %v133_v60  ;;  %v66_v2 = vmul.f32 %v285_v26, %v28_v23  ;;  %v30_v3 = vunpack.c.h.bf16 %v278_v16  ;;  %v67_v4 = vmul.f32 %v291_v29, %v29_v24 }
  0x13   :  { %v231_v6 = vpack.c.bf16 %v149_v1, %v148_v61  ;;  %v150_v7 = vsel %vm118_vm6, %v102_v47, %v134_v62  ;;  %v151_v8 = vsel %vm119_vm7, %v103_v48, %v135_v63  ;;  %v104_v9 = vadd.f32 %v287_v27, %v65_v0 }
  0x14   :  { %v232_v10 = vpack.c.bf16 %v151_v8, %v150_v7  ;;  %v105_v11 = vadd.f32 %v289_v28, %v66_v2  ;;  %v68_v12 = vmul.f32 %v293_v30, %v30_v3  ;;  %v106_v13 = vadd.f32 %v295_v31, %v67_v4 }
  0x15   :  { %210 = vst [vmem:[%s364_s2 + $0x10] sm:$0xff] %v231_v6  ;;  %vm120_vm8 = vcmp.ge.f32.partialorder %v104_v9, 0.0  ;;  %v136_v14 = vmul.f32 0.2, %v104_v9  ;;  %v31_v15 = vunpack.c.l.bf16 %v17_v5  ;;  %v32_v16 = vunpack.c.h.bf16 %v17_v5 }
  0x16   :  { %211 = vst [vmem:[%s364_s2 + $0x18] sm:$0xff] %v232_v10  ;;  %vm121_vm9 = vcmp.ge.f32.partialorder %v105_v11, 0.0  ;;  %v137_v18 = vmul.f32 0.2, %v105_v11  ;;  %v107_v19 = vadd.f32 %v297_v32, %v68_v12  ;;  %vm122_vm10 = vcmp.ge.f32.partialorder %v106_v13, 0.0 }
  0x17   :  { %v152_v20 = vsel %vm120_vm8, %v104_v9, %v136_v14  ;;  %v138_v21 = vmul.f32 0.2, %v106_v13  ;;  %v69_v22 = vmul.f32 %v283_v25, %v31_v15  ;;  %v70_v23 = vmul.f32 %v285_v26, %v32_v16 }
  0x18   :  { %v153_v24 = vsel %vm121_vm9, %v105_v11, %v137_v18  ;;  %vm123_vm11 = vcmp.ge.f32.partialorder %v107_v19, 0.0  ;;  %v139_v33 = vmul.f32 0.2, %v107_v19  ;;  %v33_v34 = vunpack.c.l.bf16 %v18_v17 }
  0x19   :  { %v233_v35 = vpack.c.bf16 %v153_v24, %v152_v20  ;;  %v154_v36 = vsel %vm122_vm10, %v106_v13, %v138_v21  ;;  %v108_v37 = vadd.f32 %v287_v27, %v69_v22  ;;  %v109_v38 = vadd.f32 %v289_v28, %v70_v23 }
  0x1a   :  { %v155_v39 = vsel %vm123_vm11, %v107_v19, %v139_v33  ;;  %v34_v40 = vunpack.c.h.bf16 %v18_v17  ;;  %v71_v41 = vmul.f32 %v291_v29, %v33_v34 }
  0x1b   :  { %212 = vst [vmem:[%s364_s2 + $0x20] sm:$0xff] %v233_v35  ;;  %v234_v25 = vpack.c.bf16 %v155_v39, %v154_v36  ;;  %vm124_vm12 = vcmp.ge.f32.partialorder %v108_v37, 0.0  ;;  %vm125_vm13 = vcmp.ge.f32.partialorder %v109_v38, 0.0  ;;  %v140_v26 = vmul.f32 0.2, %v108_v37 }
  0x1c   :  { %v141_v42 = vmul.f32 0.2, %v109_v38  ;;  %v72_v43 = vmul.f32 %v293_v30, %v34_v40  ;;  %v110_v44 = vadd.f32 %v295_v31, %v71_v41 }
  0x1d   :  { %213 = vst [vmem:[%s364_s2 + $0x28] sm:$0xff] %v234_v25  ;;  %v156_v27 = vsel %vm124_vm12, %v108_v37, %v140_v26 }
  0x1e   :  { %v157_v28 = vsel %vm125_vm13, %v109_v38, %v141_v42  ;;  %v111_v29 = vadd.f32 %v297_v32, %v72_v43  ;;  %vm126_vm14 = vcmp.ge.f32.partialorder %v110_v44, 0.0  ;;  %v142_v45 = vmul.f32 0.2, %v110_v44 }
  0x1f   :  { %v235_v46 = vpack.c.bf16 %v157_v28, %v156_v27 }
  0x20   :  { %vm127_vm15 = vcmp.ge.f32.partialorder %v111_v29, 0.0  ;;  %v143_v47 = vmul.f32 0.2, %v111_v29  ;;  %v158_v48 = vsel %vm126_vm14, %v110_v44, %v142_v45 }
  0x21   :  { %214 = vst [vmem:[%s364_s2 + $0x30] sm:$0xff] %v235_v46 }
  0x22   :  { %v159_v30 = vsel %vm127_vm15, %v111_v29, %v143_v47 }
  0x23   :  { %v236_v31 = vpack.c.bf16 %v159_v30, %v158_v48 }
  0x25   :  { %215 = vst [vmem:[%s364_s2 + $0x38] sm:$0xff] %v236_v31 }

// kernel: discriminator_forward.13
= control target key start
LH: loop header
LB: loop body
LE: loop exit
PB: predicated region body
PF: predicated region fallthrough
CT: control target
= control target key end

     0   :  { %s3683_s12 = smov 0   ;;  %s3685_s13 = smov 0   ;;  %s4100_s0 = inlined_call_operand.vmem [shape: bf16[32,4096], index: 0, kind: input, shape index: {}]   ;;  %s4101_s1 = inlined_call_operand.vmem [shape: bf16[4096,512], index: 1, kind: input, shape index: {}]   ;;  %s4102_s2 = inlined_call_operand.vmem [shape: bf16[32,512], index: 2, kind: output, shape index: {0}]   ;;  %s4103_s3 = inlined_call_operand.vmem [shape: f32[1,2,512], index: 3, kind: output, shape index: {1}]  }
   0x1   :  { %s3687_s14 = smov 0   ;;  %s3689_s15 = smov 0  }
   0x2   :  { %s3691_s16 = smov 0  }
   0x3 LB: > { %s26_s17 = sadd.s32 1, %s3655_s15  ;;  %p49_p1 = scmp.ne.s32.totalorder %s3647_s13, %s3643_s12  ;;  %s3659_s16 = sphi %s3691_s16, %s14_s16   ;;  %s3655_s15 = sphi %s3689_s15, %s4107_s15   ;;  %s3651_s14 = sphi %s3687_s14, %s4106_s14   ;;  %s3647_s13 = sphi %s3685_s13, %s4105_s13   ;;  %s3643_s12 = sphi %s3683_s12, %s4104_s12  }
   0x4   : > { %p27_p0 = scmp.ge.s32.totalorder %s26_s17, 4  ;;  %p50_p2 = scmp.eq.s32.totalorder %s3659_s16, 0 }
   0x5   : > { %s42_s19 = sadd.s32 1, %s3647_s13  ;;  %p2839_p5 = scmp.ge.s32.totalorder %s3659_s16, 4 }
   0x6   : > { %s4109_s17 = smov (%p27_p0, %s26_s17), 0  ;;  %p51_p3 = por %p50_p2, %p49_p1 }
   0x7   : > { %s38_s18 = ssub.s32 %s3655_s15, %s4109_s17  ;;  %159 = sbr.rel (%p2839_p5) target bundleno = 26 (0x1a), region = 16 }
   0x8   : > { %p40_p4 = scmp.eq.s32.totalorder %s38_s18, 0 }
   0xa   : > { %s3718_s20 = scalar_select %p40_p4, %s3647_s13, %s42_s19  }
   0xe   : > { %162 = sbr.rel (!%p51_p3) target bundleno = 26 (0x1a), region = 20  ;;  %s164_s21 = sand.u32 (%p51_p3), 1, %s3647_s13  }
   0xf   : > { %s3137_s22 = sshll.u32 (%p51_p3), %s3655_s15, 5  ;;  %s2840_s23 = sshll.u32 (%p51_p3), %s164_s21, 7 }
  0x10   : > { %s3726_s26 = scalar_lea.vmem (%p51_p3), %s4100_s0, %s3137_s22  ;;  %s166_s27 = scalar_lea.vmem (%p51_p3), [#allocation3], %s2840_s23 }
  0x11   : > { %v185_v0 = vld [vmem:[%s3726_s26] sm:$0xff] (%p51_p3)  ;;  %v187_v1 = vld [vmem:[%s3726_s26 + $0x8] sm:$0xff] (%p51_p3)  ;;  %v189_v2 = vld [vmem:[%s3726_s26 + $0x10] sm:$0xff] (%p51_p3) }
  0x12   : > { %186 = vst [vmem:[%s166_s27] sm:$0xff] (%p51_p3), %v185_v0  ;;  %188 = vst [vmem:[%s166_s27 + $0x8] sm:$0xff] (%p51_p3), %v187_v1  ;;  %v191_v3 = vld [vmem:[%s3726_s26 + $0x18] sm:$0xff] (%p51_p3)  ;;  %v193_v4 = vld [vmem:[%s3726_s26 + $0x80] sm:$0xff] (%p51_p3) }
  0x13   : > { %190 = vst [vmem:[%s166_s27 + $0x10] sm:$0xff] (%p51_p3), %v189_v2  ;;  %v195_v5 = vld [vmem:[%s3726_s26 + $0x88] sm:$0xff] (%p51_p3)  ;;  %192 = vst [vmem:[%s166_s27 + $0x18] sm:$0xff] (%p51_p3), %v191_v3  ;;  %v197_v6 = vld [vmem:[%s3726_s26 + $0x90] sm:$0xff] (%p51_p3) }
  0x14   : > { %194 = vst [vmem:[%s166_s27 + $0x20] sm:$0xff] (%p51_p3), %v193_v4  ;;  %196 = vst [vmem:[%s166_s27 + $0x28] sm:$0xff] (%p51_p3), %v195_v5  ;;  %v199_v7 = vld [vmem:[%s3726_s26 + $0x98] sm:$0xff] (%p51_p3)  ;;  %v201_v8 = vld [vmem:[%s3726_s26 + $0x100] sm:$0xff] (%p51_p3) }
  0x15   : > { %198 = vst [vmem:[%s166_s27 + $0x30] sm:$0xff] %v197_v6  ;;  %200 = vst [vmem:[%s166_s27 + $0x38] sm:$0xff] %v199_v7  ;;  %v203_v9 = vld [vmem:[%s3726_s26 + $0x108] sm:$0xff]  ;;  %v205_v10 = vld [vmem:[%s3726_s26 + $0x110] sm:$0xff] }
  0x16   : > { %202 = vst [vmem:[%s166_s27 + $0x40] sm:$0xff] %v201_v8  ;;  %v207_v11 = vld [vmem:[%s3726_s26 + $0x118] sm:$0xff]  ;;  %204 = vst [vmem:[%s166_s27 + $0x48] sm:$0xff] %v203_v9  ;;  %v209_v12 = vld [vmem:[%s3726_s26 + $0x180] sm:$0xff] }
  0x17   : > { %206 = vst [vmem:[%s166_s27 + $0x50] sm:$0xff] %v205_v10  ;;  %208 = vst [vmem:[%s166_s27 + $0x58] sm:$0xff] %v207_v11  ;;  %v211_v13 = vld [vmem:[%s3726_s26 + $0x188] sm:$0xff]  ;;  %v213_v14 = vld [vmem:[%s3726_s26 + $0x190] sm:$0xff] }
  0x18   : > { %210 = vst [vmem:[%s166_s27 + $0x60] sm:$0xff] %v209_v12  ;;  %212 = vst [vmem:[%s166_s27 + $0x68] sm:$0xff] %v211_v13  ;;  %v215_v15 = vld [vmem:[%s3726_s26 + $0x198] sm:$0xff] }
  0x19   : > { %214 = vst [vmem:[%s166_s27 + $0x70] sm:$0xff] %v213_v14  ;;  %216 = vst [vmem:[%s166_s27 + $0x78] sm:$0xff] %v215_v15 }
  0x1a PF: > { %p2843_p6 = scmp.ge.s32.totalorder %s3659_s16, 1  ;;  %p236_p7 = scmp.lt.s32.totalorder %s3659_s16, 5 }
  0x1c   : > { %p237_p8 = pnand %p2843_p6, %p236_p7 }
  0x1d   : > { %s243_s28 = sand.u32 (!%p237_p8), 1, %s3643_s12   ;;  %s2845_s29 = sshll.u32 (!%p237_p8), %s3651_s14, 7 }
  0x1e   : > { %240 = sbr.rel (%p237_p8) target bundleno = 566 (0x236), region = 47  ;;  %s2844_s30 = sshll.u32 (!%p237_p8), %s243_s28, 7 }
  0x1f   : > { %p294_p9 = scmp.lt.s32.totalorder (!%p237_p8), %s2845_s29, 511  ;;  %s3753_s8 = scalar_lea.vmem (!%p237_p8), [#allocation3], %s2844_s30 }
  0x20   : > { %p2848_p10 = scmp.ne.s32.totalorder (!%p237_p8), %s3651_s14, 0 }
  0x25   : > { %s4111_s29 = smov (!%p294_p9, %s2845_s29), 511  ;;  %329 = sbr.rel (%p2848_p10) target bundleno = 47 (0x2f), region = 55 }
  0x26   : > { %s3138_s4 = sshll.u32 %s4111_s29, 4  ;;  %v3661_v16 = vmov (!%p2848_p10), 0.0  }
  0x27   : > { %s3751_s7 = scalar_lea.vmem %s4101_s1, %s3138_s4  ;;  %330 = vst [vmem:[#allocation2] sm:$0xff] (!%p2848_p10), %v3661_v16  ;;  %331 = vst [vmem:[#allocation2 + $0x8] sm:$0xff] (!%p2848_p10), %v3661_v16 }
  0x28   : > { %332 = vst [vmem:[#allocation2 + $0x10] sm:$0xff] (!%p2848_p10), %v3661_v16  ;;  %333 = vst [vmem:[#allocation2 + $0x18] sm:$0xff] (!%p2848_p10), %v3661_v16 }
  0x29   : > { %334 = vst [vmem:[#allocation2 + $0x20] sm:$0xff] (!%p2848_p10), %v3661_v16  ;;  %335 = vst [vmem:[#allocation2 + $0x28] sm:$0xff] (!%p2848_p10), %v3661_v16 }
  0x2a   : > { %336 = vst [vmem:[#allocation2 + $0x30] sm:$0xff] (!%p2848_p10), %v3661_v16  ;;  %337 = vst [vmem:[#allocation2 + $0x38] sm:$0xff] (!%p2848_p10), %v3661_v16 }
  0x2b   : > { %338 = vst [vmem:[#allocation2 + $0x40] sm:$0xff] (!%p2848_p10), %v3661_v16  ;;  %339 = vst [vmem:[#allocation2 + $0x48] sm:$0xff] (!%p2848_p10), %v3661_v16 }
  0x2c   : > { %340 = vst [vmem:[#allocation2 + $0x50] sm:$0xff] %v3661_v16  ;;  %341 = vst [vmem:[#allocation2 + $0x58] sm:$0xff] %v3661_v16 }
  0x2d   : > { %342 = vst [vmem:[#allocation2 + $0x60] sm:$0xff] %v3661_v16  ;;  %343 = vst [vmem:[#allocation2 + $0x68] sm:$0xff] %v3661_v16 }
  0x2e   : > { %344 = vst [vmem:[#allocation2 + $0x70] sm:$0xff] %v3661_v16  ;;  %345 = vst [vmem:[#allocation2 + $0x78] sm:$0xff] %v3661_v16 }
  0x2f PF: > { %v3237_v17 = vld [vmem:[%s3751_s7 + $0x4] ss:$16 sps:$4 sm:$0xff]   ;;  %v3239_v18 = vld [vmem:[%s3751_s7 + $0xc] ss:$16 sps:$4 sm:$0xff]   ;;  %v3241_v19 = vld [vmem:[%s3751_s7] ss:$16 sps:$4 sm:$0xff]  }
  0x30   : > { %1994 = vmatprep.subr.bf16.mxu0 %v3237_v17  ;;  %v3242_v20 = vld [vmem:[%s3751_s7 + $0x8] ss:$16 sps:$4 sm:$0xff]   ;;  %2206 = vmatprep.subr.bf16.mxu1 %v3239_v18  ;;  %v3243_v21 = vld [vmem:[%s3751_s7 + $0x24] ss:$16 sps:$4 sm:$0xff]   ;;  %v3245_v22 = vld [vmem:[%s3751_s7 + $0x2c] ss:$16 sps:$4 sm:$0xff]  }
  0x31   : > { %1995 = vmatpush1.bf16.msra.mxu0 %v3241_v19  ;;  %2207 = vmatpush1.bf16.msra.mxu1 %v3242_v20  ;;  %v3247_v23 = vld [vmem:[%s3751_s7 + $0x20] ss:$16 sps:$4 sm:$0xff]   ;;  %v3248_v24 = vld [vmem:[%s3751_s7 + $0x28] ss:$16 sps:$4 sm:$0xff]   ;;  %v3249_v25 = vld [vmem:[%s3751_s7 + $0x44] ss:$16 sps:$4 sm:$0xff]  }
  0x32   : > { %1996 = vmatprep.subr.bf16.mxu0 %v3243_v21  ;;  %2208 = vmatprep.subr.bf16.mxu1 %v3245_v22  ;;  %v3251_v26 = vld [vmem:[%s3751_s7 + $0x4c] ss:$16 sps:$4 sm:$0xff]   ;;  %v3253_v27 = vld [vmem:[%s3751_s7 + $0x40] ss:$16 sps:$4 sm:$0xff]   ;;  %v3254_v28 = vld [vmem:[%s3751_s7 + $0x48] ss:$16 sps:$4 sm:$0xff]  }
  0x33   : > { %v3255_v29 = vld [vmem:[%s3751_s7 + $0x64] ss:$16 sps:$4 sm:$0xff]   ;;  %v3257_v30 = vld [vmem:[%s3751_s7 + $0x6c] ss:$16 sps:$4 sm:$0xff]   ;;  %v3259_v31 = vld [vmem:[%s3751_s7 + $0x60] ss:$16 sps:$4 sm:$0xff]  }
  0x34   : > { %v3260_v32 = vld [vmem:[%s3751_s7 + $0x68] ss:$16 sps:$4 sm:$0xff]   ;;  %v3261_v33 = vld [vmem:[%s3751_s7 + $0x84] ss:$16 sps:$4 sm:$0xff]   ;;  %v3263_v34 = vld [vmem:[%s3751_s7 + $0x8c] ss:$16 sps:$4 sm:$0xff]  }
  0x35   : > { %1997 = vmatpush1.bf16.msra.mxu0 %v3247_v23  ;;  %2209 = vmatpush1.bf16.msra.mxu1 %v3248_v24  ;;  %v3265_v35 = vld [vmem:[%s3751_s7 + $0x80] ss:$16 sps:$4 sm:$0xff]   ;;  %v3266_v36 = vld [vmem:[%s3751_s7 + $0x88] ss:$16 sps:$4 sm:$0xff]   ;;  %v3267_v37 = vld [vmem:[%s3751_s7 + $0xa4] ss:$16 sps:$4 sm:$0xff]  }
  0x36   : > { %1998 = vmatprep.subr.bf16.mxu0 %v3249_v25  ;;  %2210 = vmatprep.subr.bf16.mxu1 %v3251_v26  ;;  %v3269_v38 = vld [vmem:[%s3751_s7 + $0xac] ss:$16 sps:$4 sm:$0xff]   ;;  %v3271_v39 = vld [vmem:[%s3751_s7 + $0xa0] ss:$16 sps:$4 sm:$0xff]   ;;  %v3272_v40 = vld [vmem:[%s3751_s7 + $0xa8] ss:$16 sps:$4 sm:$0xff]  }
  0x37   : > { %v3273_v41 = vld [vmem:[%s3751_s7 + $0xc4] ss:$16 sps:$4 sm:$0xff]   ;;  %v3275_v42 = vld [vmem:[%s3751_s7 + $0xcc] ss:$16 sps:$4 sm:$0xff]   ;;  %v3277_v43 = vld [vmem:[%s3751_s7 + $0xc0] ss:$16 sps:$4 sm:$0xff]  }
  0x38   : > { %v3278_v44 = vld [vmem:[%s3751_s7 + $0xc8] ss:$16 sps:$4 sm:$0xff]   ;;  %v3279_v45 = vld [vmem:[%s3751_s7 + $0xe4] ss:$16 sps:$4 sm:$0xff]   ;;  %v3281_v46 = vld [vmem:[%s3751_s7 + $0xec] ss:$16 sps:$4 sm:$0xff]  }
  0x39   : > { %1999 = vmatpush1.bf16.msra.mxu0 %v3253_v27  ;;  %2211 = vmatpush1.bf16.msra.mxu1 %v3254_v28  ;;  %v3283_v47 = vld [vmem:[%s3751_s7 + $0xe0] ss:$16 sps:$4 sm:$0xff]   ;;  %v3284_v48 = vld [vmem:[%s3751_s7 + $0xe8] ss:$16 sps:$4 sm:$0xff]   ;;  %v3285_v49 = vld [vmem:[%s3751_s7 + $0x104] ss:$16 sps:$4 sm:$0xff]  }
  0x3a   : > { %2000 = vmatprep.subr.bf16.mxu0 %v3255_v29  ;;  %2212 = vmatprep.subr.bf16.mxu1 %v3257_v30  ;;  %v3287_v50 = vld [vmem:[%s3751_s7 + $0x10c] ss:$16 sps:$4 sm:$0xff]   ;;  %v3289_v51 = vld [vmem:[%s3751_s7 + $0x100] ss:$16 sps:$4 sm:$0xff]   ;;  %v3290_v52 = vld [vmem:[%s3751_s7 + $0x108] ss:$16 sps:$4 sm:$0xff]  }
  0x3b   : > { %v3291_v53 = vld [vmem:[%s3751_s7 + $0x124] ss:$16 sps:$4 sm:$0xff]   ;;  %v3293_v54 = vld [vmem:[%s3751_s7 + $0x12c] ss:$16 sps:$4 sm:$0xff]   ;;  %v3295_v55 = vld [vmem:[%s3751_s7 + $0x120] ss:$16 sps:$4 sm:$0xff]  }
  0x3c   : > { %v3296_v56 = vld [vmem:[%s3751_s7 + $0x128] ss:$16 sps:$4 sm:$0xff]   ;;  %v3297_v57 = vld [vmem:[%s3751_s7 + $0x144] ss:$16 sps:$4 sm:$0xff]   ;;  %v3299_v58 = vld [vmem:[%s3751_s7 + $0x14c] ss:$16 sps:$4 sm:$0xff]  }
  0x3d   : > { %2001 = vmatpush1.bf16.msra.mxu0 %v3259_v31  ;;  %2213 = vmatpush1.bf16.msra.mxu1 %v3260_v32  ;;  %v3301_v59 = vld [vmem:[%s3751_s7 + $0x140] ss:$16 sps:$4 sm:$0xff]   ;;  %v3302_v60 = vld [vmem:[%s3751_s7 + $0x148] ss:$16 sps:$4 sm:$0xff]   ;;  %v3303_v61 = vld [vmem:[%s3751_s7 + $0x164] ss:$16 sps:$4 sm:$0xff]  }
  0x3e   : > { %2002 = vmatprep.subr.bf16.mxu0 %v3261_v33  ;;  %2214 = vmatprep.subr.bf16.mxu1 %v3263_v34  ;;  %v3305_v62 = vld [vmem:[%s3751_s7 + $0x16c] ss:$16 sps:$4 sm:$0xff]   ;;  %v362_v63 = vld [vmem:[%s3753_s8] sm:$0xff]  ;;  %v3308_v2 = vld [vmem:[%s3751_s7 + $0x168] ss:$16 sps:$4 sm:$0xff]   ;;  %p3121_p11 = scmp.ne.s32.totalorder %s3651_s14, 3 }
  0x3f   : > { %v366_v0 = vld [vmem:[%s3753_s8 + $0x20] sm:$0xff]  ;;  %v3311_v5 = vld [vmem:[%s3751_s7 + $0x18c] ss:$16 sps:$4 sm:$0xff]   ;;  %v3314_v7 = vld [vmem:[%s3751_s7 + $0x188] ss:$16 sps:$4 sm:$0xff]  }
  0x40   : > { %v3307_v1 = vld [vmem:[%s3751_s7 + $0x160] ss:$16 sps:$4 sm:$0xff]   ;;  %v2850_v3 = vcombine.high %v362_v63, %v366_v0  ;;  %v3309_v4 = vld [vmem:[%s3751_s7 + $0x184] ss:$16 sps:$4 sm:$0xff]   ;;  %v3317_v9 = vld [vmem:[%s3751_s7 + $0x1ac] ss:$16 sps:$4 sm:$0xff]   ;;  %v2849_v22 = vcombine.low %v362_v63, %v366_v0 }
  0x41   : > { %2003 = vmatpush1.bf16.msra.mxu0 %v3265_v35  ;;  %2215 = vmatpush1.bf16.msra.mxu1 %v3266_v36  ;;  %v3313_v6 = vld [vmem:[%s3751_s7 + $0x180] ss:$16 sps:$4 sm:$0xff]   ;;  %v3315_v8 = vld [vmem:[%s3751_s7 + $0x1a4] ss:$16 sps:$4 sm:$0xff]   ;;  %v3320_v11 = vld [vmem:[%s3751_s7 + $0x1a8] ss:$16 sps:$4 sm:$0xff]  }
  0x42   : > { %2004 = vmatprep.subr.bf16.mxu0 %v3267_v37  ;;  %2216 = vmatprep.subr.bf16.mxu1 %v3269_v38  ;;  %v3319_v10 = vld [vmem:[%s3751_s7 + $0x1a0] ss:$16 sps:$4 sm:$0xff]   ;;  %v3321_v12 = vld [vmem:[%s3751_s7 + $0x1c4] ss:$16 sps:$4 sm:$0xff]   ;;  %v3323_v13 = vld [vmem:[%s3751_s7 + $0x1cc] ss:$16 sps:$4 sm:$0xff]  }
  0x43   : > { %2026 = vmatprep.mubr.bf16.mxu0 %v2850_v3  ;;  %2238 = vmatprep.mubr.bf16.mxu1 %v2850_v3  ;;  %v3325_v14 = vld [vmem:[%s3751_s7 + $0x1c0] ss:$16 sps:$4 sm:$0xff]   ;;  %v3326_v15 = vld [vmem:[%s3751_s7 + $0x1c8] ss:$16 sps:$4 sm:$0xff]   ;;  %v3327_v16 = vld [vmem:[%s3751_s7 + $0x1e4] ss:$16 sps:$4 sm:$0xff]  }
  0x44   : > { %v3329_v17 = vld [vmem:[%s3751_s7 + $0x1ec] ss:$16 sps:$4 sm:$0xff]   ;;  %v3331_v18 = vld [vmem:[%s3751_s7 + $0x1e0] ss:$16 sps:$4 sm:$0xff]   ;;  %v3332_v19 = vld [vmem:[%s3751_s7 + $0x1e8] ss:$16 sps:$4 sm:$0xff]  }
  0x45   : > { %2005 = vmatpush1.bf16.msra.mxu0 %v3271_v39  ;;  %2217 = vmatpush1.bf16.msra.mxu1 %v3272_v40  ;;  %v3335_v20 = vld [vmem:[%s3751_s7 + $0x204] ss:$16 sps:$4 sm:$0xff]   ;;  %v3338_v21 = vld [vmem:[%s3751_s7 + $0x20c] ss:$16 sps:$4 sm:$0xff]   ;;  %v3333_v23 = vld [vmem:[%s3751_s7 + $0x200] ss:$16 sps:$4 sm:$0xff]  }
  0x46   : > { %2006 = vmatprep.subr.bf16.mxu0 %v3273_v41  ;;  %2218 = vmatprep.subr.bf16.mxu1 %v3275_v42  ;;  %v3336_v24 = vld [vmem:[%s3751_s7 + $0x208] ss:$16 sps:$4 sm:$0xff]   ;;  %v3341_v25 = vld [vmem:[%s3751_s7 + $0x224] ss:$16 sps:$4 sm:$0xff]   ;;  %v3344_v26 = vld [vmem:[%s3751_s7 + $0x22c] ss:$16 sps:$4 sm:$0xff]  }
  0x47   : > { %v3339_v27 = vld [vmem:[%s3751_s7 + $0x220] ss:$16 sps:$4 sm:$0xff]   ;;  %v3342_v28 = vld [vmem:[%s3751_s7 + $0x228] ss:$16 sps:$4 sm:$0xff]   ;;  %v3347_v29 = vld [vmem:[%s3751_s7 + $0x244] ss:$16 sps:$4 sm:$0xff]  }
  0x48   : > { %v3350_v30 = vld [vmem:[%s3751_s7 + $0x24c] ss:$16 sps:$4 sm:$0xff]   ;;  %v3345_v31 = vld [vmem:[%s3751_s7 + $0x240] ss:$16 sps:$4 sm:$0xff]   ;;  %v3348_v32 = vld [vmem:[%s3751_s7 + $0x248] ss:$16 sps:$4 sm:$0xff]  }
  0x49   : > { %2007 = vmatpush1.bf16.msra.mxu0 %v3277_v43  ;;  %2219 = vmatpush1.bf16.msra.mxu1 %v3278_v44  ;;  %v3353_v33 = vld [vmem:[%s3751_s7 + $0x264] ss:$16 sps:$4 sm:$0xff]   ;;  %v3356_v34 = vld [vmem:[%s3751_s7 + $0x26c] ss:$16 sps:$4 sm:$0xff]   ;;  %v3351_v35 = vld [vmem:[%s3751_s7 + $0x260] ss:$16 sps:$4 sm:$0xff]  }
  0x4a   : > { %2008 = vmatprep.subr.bf16.mxu0 %v3279_v45  ;;  %2220 = vmatprep.subr.bf16.mxu1 %v3281_v46  ;;  %v3354_v36 = vld [vmem:[%s3751_s7 + $0x268] ss:$16 sps:$4 sm:$0xff]   ;;  %v3359_v37 = vld [vmem:[%s3751_s7 + $0x284] ss:$16 sps:$4 sm:$0xff]   ;;  %v3362_v38 = vld [vmem:[%s3751_s7 + $0x28c] ss:$16 sps:$4 sm:$0xff]  }
  0x4b   : > { %v3357_v39 = vld [vmem:[%s3751_s7 + $0x280] ss:$16 sps:$4 sm:$0xff]   ;;  %v3360_v40 = vld [vmem:[%s3751_s7 + $0x288] ss:$16 sps:$4 sm:$0xff]   ;;  %v3365_v41 = vld [vmem:[%s3751_s7 + $0x2a4] ss:$16 sps:$4 sm:$0xff]  }
  0x4c   : > { %v3368_v42 = vld [vmem:[%s3751_s7 + $0x2ac] ss:$16 sps:$4 sm:$0xff]   ;;  %v370_v43 = vld [vmem:[%s3753_s8 + $0x40] sm:$0xff]  ;;  %v3384_v63 = vld [vmem:[%s3751_s7 + $0x308] ss:$16 sps:$4 sm:$0xff]  }
  0x4d   : > { %2009 = vmatpush1.bf16.msra.mxu0 %v3283_v47  ;;  %2221 = vmatpush1.bf16.msra.mxu1 %v3284_v48  ;;  %v374_v44 = vld [vmem:[%s3753_s8 + $0x60] sm:$0xff]  ;;  %v3366_v47 = vld [vmem:[%s3751_s7 + $0x2a8] ss:$16 sps:$4 sm:$0xff]  }
  0x4e   : > { %2010 = vmatprep.subr.bf16.mxu0 %v3285_v49  ;;  %2222 = vmatprep.subr.bf16.mxu1 %v3287_v50  ;;  %v2858_v45 = vcombine.high %v370_v43, %v374_v44  ;;  %v3363_v46 = vld [vmem:[%s3751_s7 + $0x2a0] ss:$16 sps:$4 sm:$0xff]   ;;  %v2857_v48 = vcombine.low %v370_v43, %v374_v44  ;;  %v3371_v49 = vld [vmem:[%s3751_s7 + $0x2c4] ss:$16 sps:$4 sm:$0xff]   ;;  %v3374_v50 = vld [vmem:[%s3751_s7 + $0x2cc] ss:$16 sps:$4 sm:$0xff]  }
  0x4f   : > { %v3389_v0 = vld [vmem:[%s3751_s7 + $0x324] ss:$16 sps:$4 sm:$0xff]   ;;  %v3390_v3 = vld [vmem:[%s3751_s7 + $0x328] ss:$16 sps:$4 sm:$0xff]  }
  0x50   : > { %v3914_v44 = vld [vmem:[%s3753_s8 + $0x30] sm:$0xff] }
  0x51   : > { %2011 = vmatpush1.bf16.msra.mxu0 %v3289_v51  ;;  %2223 = vmatpush1.bf16.msra.mxu1 %v3290_v52  ;;  %v3851_v51 = vld [vmem:[%s3753_s8 + $0x8] sm:$0xff] }
  0x52   : > { %2012 = vmatprep.subr.bf16.mxu0 %v3291_v53  ;;  %2224 = vmatprep.subr.bf16.mxu1 %v3293_v54  ;;  %v3854_v52 = vld [vmem:[%s3753_s8 + $0x28] sm:$0xff]  ;;  %v3369_v53 = vld [vmem:[%s3751_s7 + $0x2c0] ss:$16 sps:$4 sm:$0xff]  }
  0x53   : > { %v3372_v54 = vld [vmem:[%s3751_s7 + $0x2c8] ss:$16 sps:$4 sm:$0xff]  }
  0x55   : > { %2013 = vmatpush1.bf16.msra.mxu0 %v3295_v55  ;;  %2225 = vmatpush1.bf16.msra.mxu1 %v3296_v56  ;;  %v2852_v55 = vcombine.high %v3851_v51, %v3854_v52  ;;  %v3377_v56 = vld [vmem:[%s3751_s7 + $0x2e4] ss:$16 sps:$4 sm:$0xff]  }
  0x56   : > { %2014 = vmatprep.subr.bf16.mxu0 %v3297_v57  ;;  %2226 = vmatprep.subr.bf16.mxu1 %v3299_v58  ;;  %v3380_v57 = vld [vmem:[%s3751_s7 + $0x2ec] ss:$16 sps:$4 sm:$0xff]   ;;  %v3375_v58 = vld [vmem:[%s3751_s7 + $0x2e0] ss:$16 sps:$4 sm:$0xff]  }
  0x59   : > { %2015 = vmatpush1.bf16.msra.mxu0 %v3301_v59  ;;  %2227 = vmatpush1.bf16.msra.mxu1 %v3302_v60  ;;  %v3378_v59 = vld [vmem:[%s3751_s7 + $0x2e8] ss:$16 sps:$4 sm:$0xff]   ;;  %v3383_v60 = vld [vmem:[%s3751_s7 + $0x304] ss:$16 sps:$4 sm:$0xff]  }
  0x5a   : > { %2016 = vmatprep.subr.bf16.mxu0 %v3303_v61  ;;  %2228 = vmatprep.subr.bf16.mxu1 %v3305_v62  ;;  %v3386_v61 = vld [vmem:[%s3751_s7 + $0x30c] ss:$16 sps:$4 sm:$0xff]   ;;  %v3381_v62 = vld [vmem:[%s3751_s7 + $0x300] ss:$16 sps:$4 sm:$0xff]  }
  0x5d   : > { %2017 = vmatpush1.bf16.msra.mxu0 %v3307_v1  ;;  %2229 = vmatpush1.bf16.msra.mxu1 %v3308_v2  ;;  %v3392_v1 = vld [vmem:[%s3751_s7 + $0x32c] ss:$16 sps:$4 sm:$0xff]   ;;  %v3387_v2 = vld [vmem:[%s3751_s7 + $0x320] ss:$16 sps:$4 sm:$0xff]  }
  0x5e   : > { %2018 = vmatprep.subr.bf16.mxu0 %v3309_v4  ;;  %2230 = vmatprep.subr.bf16.mxu1 %v3311_v5  ;;  %v3395_v4 = vld [vmem:[%s3751_s7 + $0x344] ss:$16 sps:$4 sm:$0xff]   ;;  %v3398_v5 = vld [vmem:[%s3751_s7 + $0x34c] ss:$16 sps:$4 sm:$0xff]  }
  0x61   : > { %2019 = vmatpush1.bf16.msra.mxu0 %v3313_v6  ;;  %2231 = vmatpush1.bf16.msra.mxu1 %v3314_v7  ;;  %v3393_v6 = vld [vmem:[%s3751_s7 + $0x340] ss:$16 sps:$4 sm:$0xff]   ;;  %v3396_v7 = vld [vmem:[%s3751_s7 + $0x348] ss:$16 sps:$4 sm:$0xff]  }
  0x62   : > { %2020 = vmatprep.subr.bf16.mxu0 %v3315_v8  ;;  %2232 = vmatprep.subr.bf16.mxu1 %v3317_v9  ;;  %v3401_v8 = vld [vmem:[%s3751_s7 + $0x364] ss:$16 sps:$4 sm:$0xff]   ;;  %v3404_v9 = vld [vmem:[%s3751_s7 + $0x36c] ss:$16 sps:$4 sm:$0xff]  }
  0x65   : > { %2021 = vmatpush1.bf16.msra.mxu0 %v3319_v10  ;;  %2233 = vmatpush1.bf16.msra.mxu1 %v3320_v11  ;;  %v3399_v10 = vld [vmem:[%s3751_s7 + $0x360] ss:$16 sps:$4 sm:$0xff]   ;;  %v3402_v11 = vld [vmem:[%s3751_s7 + $0x368] ss:$16 sps:$4 sm:$0xff]  }
  0x66   : > { %2022 = vmatprep.subr.bf16.mxu0 %v3321_v12  ;;  %2234 = vmatprep.subr.bf16.mxu1 %v3323_v13  ;;  %v3407_v12 = vld [vmem:[%s3751_s7 + $0x384] ss:$16 sps:$4 sm:$0xff]   ;;  %v3410_v13 = vld [vmem:[%s3751_s7 + $0x38c] ss:$16 sps:$4 sm:$0xff]  }
  0x69   : > { %2023 = vmatpush1.bf16.msra.mxu0 %v3325_v14  ;;  %2235 = vmatpush1.bf16.msra.mxu1 %v3326_v15  ;;  %v3405_v14 = vld [vmem:[%s3751_s7 + $0x380] ss:$16 sps:$4 sm:$0xff]   ;;  %v3408_v15 = vld [vmem:[%s3751_s7 + $0x388] ss:$16 sps:$4 sm:$0xff]  }
  0x6a   : > { %2024 = vmatprep.subr.bf16.mxu0 %v3327_v16  ;;  %2236 = vmatprep.subr.bf16.mxu1 %v3329_v17  ;;  %v3413_v16 = vld [vmem:[%s3751_s7 + $0x3a4] ss:$16 sps:$4 sm:$0xff]   ;;  %v3416_v17 = vld [vmem:[%s3751_s7 + $0x3ac] ss:$16 sps:$4 sm:$0xff]  }
  0x6d   : > { %2025 = vmatpush1.bf16.msra.mxu0 %v3331_v18  ;;  %2237 = vmatpush1.bf16.msra.mxu1 %v3332_v19  ;;  %v3411_v18 = vld [vmem:[%s3751_s7 + $0x3a0] ss:$16 sps:$4 sm:$0xff]   ;;  %v3414_v19 = vld [vmem:[%s3751_s7 + $0x3a8] ss:$16 sps:$4 sm:$0xff]  }
  0x6e   : > { %2047 = vmatprep.subr.bf16.mxu0 %v3335_v20  ;;  %2259 = vmatprep.subr.bf16.mxu1 %v3338_v21  ;;  %v3419_v20 = vld [vmem:[%s3751_s7 + $0x3c4] ss:$16 sps:$4 sm:$0xff]   ;;  %v3422_v21 = vld [vmem:[%s3751_s7 + $0x3cc] ss:$16 sps:$4 sm:$0xff]  }
  0x70   : > { %2027 = vmatmul.mubr.bf16.vlgmr.msra.gmra.mrb[0].mxu0 %v2849_v22  ;;  %2239 = vmatmul.mubr.bf16.vlgmr.msra.gmra.mrb[0].mxu1 %v2849_v22  ;;  %v3417_v22 = vld [vmem:[%s3751_s7 + $0x3c0] ss:$16 sps:$4 sm:$0xff]  }
  0x71   : > { %2048 = vmatpush1.bf16.msra.mxu0 %v3333_v23  ;;  %2260 = vmatpush1.bf16.msra.mxu1 %v3336_v24  ;;  %v3420_v23 = vld [vmem:[%s3751_s7 + $0x3c8] ss:$16 sps:$4 sm:$0xff]   ;;  %v3425_v24 = vld [vmem:[%s3751_s7 + $0x3e4] ss:$16 sps:$4 sm:$0xff]  }
  0x72   : > { %2049 = vmatprep.subr.bf16.mxu0 %v3341_v25  ;;  %2261 = vmatprep.subr.bf16.mxu1 %v3344_v26  ;;  %v3428_v25 = vld [vmem:[%s3751_s7 + $0x3ec] ss:$16 sps:$4 sm:$0xff]   ;;  %v3423_v26 = vld [vmem:[%s3751_s7 + $0x3e0] ss:$16 sps:$4 sm:$0xff]  }
  0x73   : > { %2036 = vmatprep.mubr.bf16.mxu0 %v2858_v45  ;;  %2248 = vmatprep.mubr.bf16.mxu1 %v2858_v45  ;;  %v3441_v45 = vld [vmem:[%s3751_s7 + $0x440] ss:$16 sps:$4 sm:$0xff]  }
  0x75   : > { %2050 = vmatpush1.bf16.msra.mxu0 %v3339_v27  ;;  %2262 = vmatpush1.bf16.msra.mxu1 %v3342_v28  ;;  %v3426_v27 = vld [vmem:[%s3751_s7 + $0x3e8] ss:$16 sps:$4 sm:$0xff]   ;;  %v3431_v28 = vld [vmem:[%s3751_s7 + $0x404] ss:$16 sps:$4 sm:$0xff]  }
  0x76   : > { %2051 = vmatprep.subr.bf16.mxu0 %v3347_v29  ;;  %2263 = vmatprep.subr.bf16.mxu1 %v3350_v30  ;;  %v3434_v29 = vld [vmem:[%s3751_s7 + $0x40c] ss:$16 sps:$4 sm:$0xff]   ;;  %v3429_v30 = vld [vmem:[%s3751_s7 + $0x400] ss:$16 sps:$4 sm:$0xff]  }
  0x78   : > { %2037 = vmatmul.mubr.bf16.gmra.mrb[4].mxu0 %v2857_v48  ;;  %2249 = vmatmul.mubr.bf16.gmra.mrb[4].mxu1 %v2857_v48  ;;  %v3452_v48 = vld [vmem:[%s3751_s7 + $0x46c] ss:$16 sps:$4 sm:$0xff]  }
  0x79   : > { %2052 = vmatpush1.bf16.msra.mxu0 %v3345_v31  ;;  %2264 = vmatpush1.bf16.msra.mxu1 %v3348_v32  ;;  %v3432_v31 = vld [vmem:[%s3751_s7 + $0x408] ss:$16 sps:$4 sm:$0xff]   ;;  %v2851_v32 = vcombine.low %v3851_v51, %v3854_v52  ;;  %v3455_v52 = vld [vmem:[%s3751_s7 + $0x484] ss:$16 sps:$4 sm:$0xff]  }
  0x7a   : > { %2053 = vmatprep.subr.bf16.mxu0 %v3353_v33  ;;  %2265 = vmatprep.subr.bf16.mxu1 %v3356_v34  ;;  %v371_v33 = vld [vmem:[%s3753_s8 + $0x48] sm:$0xff] }
  0x7b   : > { %2079 = vmatprep.mubr.bf16.mxu0 %v2852_v55  ;;  %2291 = vmatprep.mubr.bf16.mxu1 %v2852_v55  ;;  %v375_v34 = vld [vmem:[%s3753_s8 + $0x68] sm:$0xff] }
  0x7c   : > { %v2859_v43 = vcombine.low %v371_v33, %v375_v34  ;;  %v3450_v51 = vld [vmem:[%s3751_s7 + $0x468] ss:$16 sps:$4 sm:$0xff]  }
  0x7d   : > { %2054 = vmatpush1.bf16.msra.mxu0 %v3351_v35  ;;  %2266 = vmatpush1.bf16.msra.mxu1 %v3354_v36  ;;  %v3437_v35 = vld [vmem:[%s3751_s7 + $0x424] ss:$16 sps:$4 sm:$0xff]   ;;  %v3440_v36 = vld [vmem:[%s3751_s7 + $0x42c] ss:$16 sps:$4 sm:$0xff]   ;;  %v3456_v55 = vld [vmem:[%s3751_s7 + $0x488] ss:$16 sps:$4 sm:$0xff]  }
  0x7e   : > { %2055 = vmatprep.subr.bf16.mxu0 %v3359_v37  ;;  %2267 = vmatprep.subr.bf16.mxu1 %v3362_v38  ;;  %v2860_v37 = vcombine.high %v371_v33, %v375_v34  ;;  %v3435_v38 = vld [vmem:[%s3751_s7 + $0x420] ss:$16 sps:$4 sm:$0xff]   ;;  %v3524_v33 = vld [vmem:[%s3751_s7 + $0x5ec] ss:$16 sps:$4 sm:$0xff]  }
  0x7f   : > { %v3519_v34 = vld [vmem:[%s3751_s7 + $0x5e0] ss:$16 sps:$4 sm:$0xff]  }
  0x81   : > { %2056 = vmatpush1.bf16.msra.mxu0 %v3357_v39  ;;  %2268 = vmatpush1.bf16.msra.mxu1 %v3360_v40  ;;  %v3438_v39 = vld [vmem:[%s3751_s7 + $0x428] ss:$16 sps:$4 sm:$0xff]   ;;  %v3443_v40 = vld [vmem:[%s3751_s7 + $0x444] ss:$16 sps:$4 sm:$0xff]  }
  0x82   : > { %2057 = vmatprep.subr.bf16.mxu0 %v3365_v41  ;;  %2269 = vmatprep.subr.bf16.mxu1 %v3368_v42  ;;  %v3446_v41 = vld [vmem:[%s3751_s7 + $0x44c] ss:$16 sps:$4 sm:$0xff]   ;;  %v3911_v42 = vld [vmem:[%s3753_s8 + $0x10] sm:$0xff] }
  0x85   : > { %2058 = vmatpush1.bf16.msra.mxu0 %v3363_v46  ;;  %2270 = vmatpush1.bf16.msra.mxu1 %v3366_v47  ;;  %v3444_v46 = vld [vmem:[%s3751_s7 + $0x448] ss:$16 sps:$4 sm:$0xff]   ;;  %v3449_v47 = vld [vmem:[%s3751_s7 + $0x464] ss:$16 sps:$4 sm:$0xff]  }
  0x86   : > { %2059 = vmatprep.subr.bf16.mxu0 %v3371_v49  ;;  %2271 = vmatprep.subr.bf16.mxu1 %v3374_v50  ;;  %v2854_v49 = vcombine.high %v3911_v42, %v3914_v44  ;;  %v3447_v50 = vld [vmem:[%s3751_s7 + $0x460] ss:$16 sps:$4 sm:$0xff]  }
  0x89   : > { %2060 = vmatpush1.bf16.msra.mxu0 %v3369_v53  ;;  %2272 = vmatpush1.bf16.msra.mxu1 %v3372_v54  ;;  %v3458_v53 = vld [vmem:[%s3751_s7 + $0x48c] ss:$16 sps:$4 sm:$0xff]   ;;  %v3453_v54 = vld [vmem:[%s3751_s7 + $0x480] ss:$16 sps:$4 sm:$0xff]  }
  0x8a   : > { %2061 = vmatprep.subr.bf16.mxu0 %v3377_v56  ;;  %2273 = vmatprep.subr.bf16.mxu1 %v3380_v57  ;;  %v3461_v56 = vld [vmem:[%s3751_s7 + $0x4a4] ss:$16 sps:$4 sm:$0xff]   ;;  %v3464_v57 = vld [vmem:[%s3751_s7 + $0x4ac] ss:$16 sps:$4 sm:$0xff]  }
  0x8d   : > { %2062 = vmatpush1.bf16.msra.mxu0 %v3375_v58  ;;  %2274 = vmatpush1.bf16.msra.mxu1 %v3378_v59  ;;  %v3459_v58 = vld [vmem:[%s3751_s7 + $0x4a0] ss:$16 sps:$4 sm:$0xff]   ;;  %v3462_v59 = vld [vmem:[%s3751_s7 + $0x4a8] ss:$16 sps:$4 sm:$0xff]  }
  0x8e   : > { %2063 = vmatprep.subr.bf16.mxu0 %v3383_v60  ;;  %2275 = vmatprep.subr.bf16.mxu1 %v3386_v61  ;;  %v3467_v60 = vld [vmem:[%s3751_s7 + $0x4c4] ss:$16 sps:$4 sm:$0xff]   ;;  %v3470_v61 = vld [vmem:[%s3751_s7 + $0x4cc] ss:$16 sps:$4 sm:$0xff]  }
  0x91   : > { %2064 = vmatpush1.bf16.msra.mxu0 %v3381_v62  ;;  %2276 = vmatpush1.bf16.msra.mxu1 %v3384_v63  ;;  %v3465_v62 = vld [vmem:[%s3751_s7 + $0x4c0] ss:$16 sps:$4 sm:$0xff]   ;;  %v3468_v63 = vld [vmem:[%s3751_s7 + $0x4c8] ss:$16 sps:$4 sm:$0xff]  }
  0x92   : > { %2065 = vmatprep.subr.bf16.mxu0 %v3389_v0  ;;  %2277 = vmatprep.subr.bf16.mxu1 %v3392_v1  ;;  %v3473_v0 = vld [vmem:[%s3751_s7 + $0x4e4] ss:$16 sps:$4 sm:$0xff]   ;;  %v3476_v1 = vld [vmem:[%s3751_s7 + $0x4ec] ss:$16 sps:$4 sm:$0xff]  }
  0x95   : > { %2066 = vmatpush1.bf16.msra.mxu0 %v3387_v2  ;;  %2278 = vmatpush1.bf16.msra.mxu1 %v3390_v3  ;;  %v3471_v2 = vld [vmem:[%s3751_s7 + $0x4e0] ss:$16 sps:$4 sm:$0xff]   ;;  %v3474_v3 = vld [vmem:[%s3751_s7 + $0x4e8] ss:$16 sps:$4 sm:$0xff]  }
  0x96   : > { %2067 = vmatprep.subr.bf16.mxu0 %v3395_v4  ;;  %2279 = vmatprep.subr.bf16.mxu1 %v3398_v5  ;;  %v3479_v4 = vld [vmem:[%s3751_s7 + $0x504] ss:$16 sps:$4 sm:$0xff]   ;;  %v3482_v5 = vld [vmem:[%s3751_s7 + $0x50c] ss:$16 sps:$4 sm:$0xff]  }
  0x99   : > { %2068 = vmatpush1.bf16.msra.mxu0 %v3393_v6  ;;  %2280 = vmatpush1.bf16.msra.mxu1 %v3396_v7  ;;  %v3477_v6 = vld [vmem:[%s3751_s7 + $0x500] ss:$16 sps:$4 sm:$0xff]   ;;  %v3480_v7 = vld [vmem:[%s3751_s7 + $0x508] ss:$16 sps:$4 sm:$0xff]  }
  0x9a   : > { %2069 = vmatprep.subr.bf16.mxu0 %v3401_v8  ;;  %2281 = vmatprep.subr.bf16.mxu1 %v3404_v9  ;;  %v3485_v8 = vld [vmem:[%s3751_s7 + $0x524] ss:$16 sps:$4 sm:$0xff]   ;;  %v3488_v9 = vld [vmem:[%s3751_s7 + $0x52c] ss:$16 sps:$4 sm:$0xff]  }
  0x9d   : > { %2070 = vmatpush1.bf16.msra.mxu0 %v3399_v10  ;;  %2282 = vmatpush1.bf16.msra.mxu1 %v3402_v11  ;;  %v3483_v10 = vld [vmem:[%s3751_s7 + $0x520] ss:$16 sps:$4 sm:$0xff]   ;;  %v3486_v11 = vld [vmem:[%s3751_s7 + $0x528] ss:$16 sps:$4 sm:$0xff]  }
  0x9e   : > { %2071 = vmatprep.subr.bf16.mxu0 %v3407_v12  ;;  %2283 = vmatprep.subr.bf16.mxu1 %v3410_v13  ;;  %v3491_v12 = vld [vmem:[%s3751_s7 + $0x544] ss:$16 sps:$4 sm:$0xff]   ;;  %v3494_v13 = vld [vmem:[%s3751_s7 + $0x54c] ss:$16 sps:$4 sm:$0xff]  }
  0xa1   : > { %2072 = vmatpush1.bf16.msra.mxu0 %v3405_v14  ;;  %2284 = vmatpush1.bf16.msra.mxu1 %v3408_v15  ;;  %v3489_v14 = vld [vmem:[%s3751_s7 + $0x540] ss:$16 sps:$4 sm:$0xff]   ;;  %v3492_v15 = vld [vmem:[%s3751_s7 + $0x548] ss:$16 sps:$4 sm:$0xff]  }
  0xa2   : > { %2073 = vmatprep.subr.bf16.mxu0 %v3413_v16  ;;  %2285 = vmatprep.subr.bf16.mxu1 %v3416_v17  ;;  %v3497_v16 = vld [vmem:[%s3751_s7 + $0x564] ss:$16 sps:$4 sm:$0xff]   ;;  %v3500_v17 = vld [vmem:[%s3751_s7 + $0x56c] ss:$16 sps:$4 sm:$0xff]  }
  0xa5   : > { %2074 = vmatpush1.bf16.msra.mxu0 %v3411_v18  ;;  %2286 = vmatpush1.bf16.msra.mxu1 %v3414_v19  ;;  %v3495_v18 = vld [vmem:[%s3751_s7 + $0x560] ss:$16 sps:$4 sm:$0xff]   ;;  %v3498_v19 = vld [vmem:[%s3751_s7 + $0x568] ss:$16 sps:$4 sm:$0xff]  }
  0xa6   : > { %2075 = vmatprep.subr.bf16.mxu0 %v3419_v20  ;;  %2287 = vmatprep.subr.bf16.mxu1 %v3422_v21  ;;  %v3503_v20 = vld [vmem:[%s3751_s7 + $0x584] ss:$16 sps:$4 sm:$0xff]   ;;  %v3506_v21 = vld [vmem:[%s3751_s7 + $0x58c] ss:$16 sps:$4 sm:$0xff]  }
  0xa9   : > { %2076 = vmatpush1.bf16.msra.mxu0 %v3417_v22  ;;  %2288 = vmatpush1.bf16.msra.mxu1 %v3420_v23  ;;  %v3501_v22 = vld [vmem:[%s3751_s7 + $0x580] ss:$16 sps:$4 sm:$0xff]   ;;  %v3504_v23 = vld [vmem:[%s3751_s7 + $0x588] ss:$16 sps:$4 sm:$0xff]  }
  0xaa   : > { %2077 = vmatprep.subr.bf16.mxu0 %v3425_v24  ;;  %2289 = vmatprep.subr.bf16.mxu1 %v3428_v25  ;;  %v3509_v24 = vld [vmem:[%s3751_s7 + $0x5a4] ss:$16 sps:$4 sm:$0xff]   ;;  %v3512_v25 = vld [vmem:[%s3751_s7 + $0x5ac] ss:$16 sps:$4 sm:$0xff]  }
  0xad   : > { %2078 = vmatpush1.bf16.msra.mxu0 %v3423_v26  ;;  %2290 = vmatpush1.bf16.msra.mxu1 %v3426_v27  ;;  %v3507_v26 = vld [vmem:[%s3751_s7 + $0x5a0] ss:$16 sps:$4 sm:$0xff]   ;;  %v3510_v27 = vld [vmem:[%s3751_s7 + $0x5a8] ss:$16 sps:$4 sm:$0xff]  }
  0xae   : > { %2100 = vmatprep.subr.bf16.mxu0 %v3431_v28  ;;  %2312 = vmatprep.subr.bf16.mxu1 %v3434_v29  ;;  %v3515_v28 = vld [vmem:[%s3751_s7 + $0x5c4] ss:$16 sps:$4 sm:$0xff]   ;;  %v3518_v29 = vld [vmem:[%s3751_s7 + $0x5cc] ss:$16 sps:$4 sm:$0xff]  }
  0xb0   : > { %2080 = vmatmul.mubr.bf16.vlgmr.msra.gmra.mrb[0].mxu0 %v2851_v32  ;;  %2292 = vmatmul.mubr.bf16.vlgmr.msra.gmra.mrb[0].mxu1 %v2851_v32  ;;  %v3521_v32 = vld [vmem:[%s3751_s7 + $0x5e4] ss:$16 sps:$4 sm:$0xff]  }
  0xb1   : > { %2101 = vmatpush1.bf16.msra.mxu0 %v3429_v30  ;;  %2313 = vmatpush1.bf16.msra.mxu1 %v3432_v31  ;;  %v3513_v30 = vld [vmem:[%s3751_s7 + $0x5c0] ss:$16 sps:$4 sm:$0xff]   ;;  %v3516_v31 = vld [vmem:[%s3751_s7 + $0x5c8] ss:$16 sps:$4 sm:$0xff]  }
  0xb2   : > { %2102 = vmatprep.subr.bf16.mxu0 %v3437_v35  ;;  %2314 = vmatprep.subr.bf16.mxu1 %v3440_v36  ;;  %v3522_v35 = vld [vmem:[%s3751_s7 + $0x5e8] ss:$16 sps:$4 sm:$0xff]   ;;  %v3527_v36 = vld [vmem:[%s3751_s7 + $0x604] ss:$16 sps:$4 sm:$0xff]  }
  0xb3   : > { %2089 = vmatprep.mubr.bf16.mxu0 %v2860_v37  ;;  %2301 = vmatprep.mubr.bf16.mxu1 %v2860_v37  ;;  %v3530_v37 = vld [vmem:[%s3751_s7 + $0x60c] ss:$16 sps:$4 sm:$0xff]  }
  0xb5   : > { %2103 = vmatpush1.bf16.msra.mxu0 %v3435_v38  ;;  %2315 = vmatpush1.bf16.msra.mxu1 %v3438_v39  ;;  %v2853_v38 = vcombine.low %v3911_v42, %v3914_v44  ;;  %v372_v39 = vld [vmem:[%s3753_s8 + $0x50] sm:$0xff]  ;;  %v3534_v44 = vld [vmem:[%s3751_s7 + $0x628] ss:$16 sps:$4 sm:$0xff]  }
  0xb6   : > { %2104 = vmatprep.subr.bf16.mxu0 %v3443_v40  ;;  %2316 = vmatprep.subr.bf16.mxu1 %v3446_v41  ;;  %v376_v40 = vld [vmem:[%s3753_s8 + $0x70] sm:$0xff] }
  0xb7   : > { %v3525_v41 = vld [vmem:[%s3751_s7 + $0x600] ss:$16 sps:$4 sm:$0xff]  }
  0xb8   : > { %2090 = vmatmul.mubr.bf16.gmra.mrb[4].mxu0 %v2859_v43  ;;  %2302 = vmatmul.mubr.bf16.gmra.mrb[4].mxu1 %v2859_v43  ;;  %v3528_v43 = vld [vmem:[%s3751_s7 + $0x608] ss:$16 sps:$4 sm:$0xff]   ;;  %v3531_v42 = vld [vmem:[%s3751_s7 + $0x620] ss:$16 sps:$4 sm:$0xff]  }
  0xb9   : > { %2105 = vmatpush1.bf16.msra.mxu0 %v3441_v45  ;;  %2317 = vmatpush1.bf16.msra.mxu1 %v3444_v46  ;;  %v3533_v45 = vld [vmem:[%s3751_s7 + $0x624] ss:$16 sps:$4 sm:$0xff]   ;;  %v3536_v46 = vld [vmem:[%s3751_s7 + $0x62c] ss:$16 sps:$4 sm:$0xff]  }
  0xba   : > { %2106 = vmatprep.subr.bf16.mxu0 %v3449_v47  ;;  %2318 = vmatprep.subr.bf16.mxu1 %v3452_v48  ;;  %v2862_v47 = vcombine.high %v372_v39, %v376_v40  ;;  %v3539_v48 = vld [vmem:[%s3751_s7 + $0x644] ss:$16 sps:$4 sm:$0xff]  }
  0xbb   : > { %2132 = vmatprep.mubr.bf16.mxu0 %v2854_v49  ;;  %2344 = vmatprep.mubr.bf16.mxu1 %v2854_v49  ;;  %v3542_v49 = vld [vmem:[%s3751_s7 + $0x64c] ss:$16 sps:$4 sm:$0xff]  }
  0xbd   : > { %2107 = vmatpush1.bf16.msra.mxu0 %v3447_v50  ;;  %2319 = vmatpush1.bf16.msra.mxu1 %v3450_v51  ;;  %v2861_v50 = vcombine.low %v372_v39, %v376_v40  ;;  %v3987_v51 = vld [vmem:[%s3753_s8 + $0x18] sm:$0xff]  ;;  %v3617_v40 = vld [vmem:[%s3751_s7 + $0x7e4] ss:$16 sps:$4 sm:$0xff]  }
  0xbe   : > { %2108 = vmatprep.subr.bf16.mxu0 %v3455_v52  ;;  %2320 = vmatprep.subr.bf16.mxu1 %v3458_v53  ;;  %v3990_v52 = vld [vmem:[%s3753_s8 + $0x38] sm:$0xff]  ;;  %v3537_v53 = vld [vmem:[%s3751_s7 + $0x640] ss:$16 sps:$4 sm:$0xff]  }
  0xbf   : > { %v3612_v39 = vld [vmem:[%s3751_s7 + $0x7c8] ss:$16 sps:$4 sm:$0xff]  }
  0xc1   : > { %2109 = vmatpush1.bf16.msra.mxu0 %v3453_v54  ;;  %2321 = vmatpush1.bf16.msra.mxu1 %v3456_v55  ;;  %v3540_v54 = vld [vmem:[%s3751_s7 + $0x648] ss:$16 sps:$4 sm:$0xff]   ;;  %v3545_v55 = vld [vmem:[%s3751_s7 + $0x664] ss:$16 sps:$4 sm:$0xff]  }
  0xc2   : > { %2110 = vmatprep.subr.bf16.mxu0 %v3461_v56  ;;  %2322 = vmatprep.subr.bf16.mxu1 %v3464_v57  ;;  %v3548_v56 = vld [vmem:[%s3751_s7 + $0x66c] ss:$16 sps:$4 sm:$0xff]   ;;  %v2856_v57 = vcombine.high %v3987_v51, %v3990_v52 }
  0xc5   : > { %2111 = vmatpush1.bf16.msra.mxu0 %v3459_v58  ;;  %2323 = vmatpush1.bf16.msra.mxu1 %v3462_v59  ;;  %v3543_v58 = vld [vmem:[%s3751_s7 + $0x660] ss:$16 sps:$4 sm:$0xff]   ;;  %v3546_v59 = vld [vmem:[%s3751_s7 + $0x668] ss:$16 sps:$4 sm:$0xff]  }
  0xc6   : > { %2112 = vmatprep.subr.bf16.mxu0 %v3467_v60  ;;  %2324 = vmatprep.subr.bf16.mxu1 %v3470_v61  ;;  %v3551_v60 = vld [vmem:[%s3751_s7 + $0x684] ss:$16 sps:$4 sm:$0xff]   ;;  %v3554_v61 = vld [vmem:[%s3751_s7 + $0x68c] ss:$16 sps:$4 sm:$0xff]  }
  0xc9   : > { %2113 = vmatpush1.bf16.msra.mxu0 %v3465_v62  ;;  %2325 = vmatpush1.bf16.msra.mxu1 %v3468_v63  ;;  %v3549_v62 = vld [vmem:[%s3751_s7 + $0x680] ss:$16 sps:$4 sm:$0xff]   ;;  %v3552_v63 = vld [vmem:[%s3751_s7 + $0x688] ss:$16 sps:$4 sm:$0xff]  }
  0xca   : > { %2114 = vmatprep.subr.bf16.mxu0 %v3473_v0  ;;  %2326 = vmatprep.subr.bf16.mxu1 %v3476_v1  ;;  %v3557_v0 = vld [vmem:[%s3751_s7 + $0x6a4] ss:$16 sps:$4 sm:$0xff]   ;;  %v3560_v1 = vld [vmem:[%s3751_s7 + $0x6ac] ss:$16 sps:$4 sm:$0xff]  }
  0xcd   : > { %2115 = vmatpush1.bf16.msra.mxu0 %v3471_v2  ;;  %2327 = vmatpush1.bf16.msra.mxu1 %v3474_v3  ;;  %v3555_v2 = vld [vmem:[%s3751_s7 + $0x6a0] ss:$16 sps:$4 sm:$0xff]   ;;  %v3558_v3 = vld [vmem:[%s3751_s7 + $0x6a8] ss:$16 sps:$4 sm:$0xff]  }
  0xce   : > { %2116 = vmatprep.subr.bf16.mxu0 %v3479_v4  ;;  %2328 = vmatprep.subr.bf16.mxu1 %v3482_v5  ;;  %v3563_v4 = vld [vmem:[%s3751_s7 + $0x6c4] ss:$16 sps:$4 sm:$0xff]   ;;  %v3566_v5 = vld [vmem:[%s3751_s7 + $0x6cc] ss:$16 sps:$4 sm:$0xff]  }
  0xd1   : > { %2117 = vmatpush1.bf16.msra.mxu0 %v3477_v6  ;;  %2329 = vmatpush1.bf16.msra.mxu1 %v3480_v7  ;;  %v3561_v6 = vld [vmem:[%s3751_s7 + $0x6c0] ss:$16 sps:$4 sm:$0xff]   ;;  %v3564_v7 = vld [vmem:[%s3751_s7 + $0x6c8] ss:$16 sps:$4 sm:$0xff]  }
  0xd2   : > { %2118 = vmatprep.subr.bf16.mxu0 %v3485_v8  ;;  %2330 = vmatprep.subr.bf16.mxu1 %v3488_v9  ;;  %v3569_v8 = vld [vmem:[%s3751_s7 + $0x6e4] ss:$16 sps:$4 sm:$0xff]   ;;  %v3572_v9 = vld [vmem:[%s3751_s7 + $0x6ec] ss:$16 sps:$4 sm:$0xff]  }
  0xd5   : > { %2119 = vmatpush1.bf16.msra.mxu0 %v3483_v10  ;;  %2331 = vmatpush1.bf16.msra.mxu1 %v3486_v11  ;;  %v3567_v10 = vld [vmem:[%s3751_s7 + $0x6e0] ss:$16 sps:$4 sm:$0xff]   ;;  %v3570_v11 = vld [vmem:[%s3751_s7 + $0x6e8] ss:$16 sps:$4 sm:$0xff]  }
  0xd6   : > { %2120 = vmatprep.subr.bf16.mxu0 %v3491_v12  ;;  %2332 = vmatprep.subr.bf16.mxu1 %v3494_v13  ;;  %v3575_v12 = vld [vmem:[%s3751_s7 + $0x704] ss:$16 sps:$4 sm:$0xff]   ;;  %v3578_v13 = vld [vmem:[%s3751_s7 + $0x70c] ss:$16 sps:$4 sm:$0xff]  }
  0xd9   : > { %2121 = vmatpush1.bf16.msra.mxu0 %v3489_v14  ;;  %2333 = vmatpush1.bf16.msra.mxu1 %v3492_v15  ;;  %v3573_v14 = vld [vmem:[%s3751_s7 + $0x700] ss:$16 sps:$4 sm:$0xff]   ;;  %v3576_v15 = vld [vmem:[%s3751_s7 + $0x708] ss:$16 sps:$4 sm:$0xff]  }
  0xda   : > { %2122 = vmatprep.subr.bf16.mxu0 %v3497_v16  ;;  %2334 = vmatprep.subr.bf16.mxu1 %v3500_v17  ;;  %v3581_v16 = vld [vmem:[%s3751_s7 + $0x724] ss:$16 sps:$4 sm:$0xff]   ;;  %v3584_v17 = vld [vmem:[%s3751_s7 + $0x72c] ss:$16 sps:$4 sm:$0xff]  }
  0xdd   : > { %2123 = vmatpush1.bf16.msra.mxu0 %v3495_v18  ;;  %2335 = vmatpush1.bf16.msra.mxu1 %v3498_v19  ;;  %v3579_v18 = vld [vmem:[%s3751_s7 + $0x720] ss:$16 sps:$4 sm:$0xff]   ;;  %v3582_v19 = vld [vmem:[%s3751_s7 + $0x728] ss:$16 sps:$4 sm:$0xff]  }
  0xde   : > { %2124 = vmatprep.subr.bf16.mxu0 %v3503_v20  ;;  %2336 = vmatprep.subr.bf16.mxu1 %v3506_v21  ;;  %v3587_v20 = vld [vmem:[%s3751_s7 + $0x744] ss:$16 sps:$4 sm:$0xff]   ;;  %v3590_v21 = vld [vmem:[%s3751_s7 + $0x74c] ss:$16 sps:$4 sm:$0xff]  }
  0xe1   : > { %2125 = vmatpush1.bf16.msra.mxu0 %v3501_v22  ;;  %2337 = vmatpush1.bf16.msra.mxu1 %v3504_v23  ;;  %v3585_v22 = vld [vmem:[%s3751_s7 + $0x740] ss:$16 sps:$4 sm:$0xff]   ;;  %v3588_v23 = vld [vmem:[%s3751_s7 + $0x748] ss:$16 sps:$4 sm:$0xff]  }
  0xe2   : > { %2126 = vmatprep.subr.bf16.mxu0 %v3509_v24  ;;  %2338 = vmatprep.subr.bf16.mxu1 %v3512_v25  ;;  %v3593_v24 = vld [vmem:[%s3751_s7 + $0x764] ss:$16 sps:$4 sm:$0xff]   ;;  %v3596_v25 = vld [vmem:[%s3751_s7 + $0x76c] ss:$16 sps:$4 sm:$0xff]  }
  0xe5   : > { %2127 = vmatpush1.bf16.msra.mxu0 %v3507_v26  ;;  %2339 = vmatpush1.bf16.msra.mxu1 %v3510_v27  ;;  %v3591_v26 = vld [vmem:[%s3751_s7 + $0x760] ss:$16 sps:$4 sm:$0xff]   ;;  %v3594_v27 = vld [vmem:[%s3751_s7 + $0x768] ss:$16 sps:$4 sm:$0xff]  }
  0xe6   : > { %2128 = vmatprep.subr.bf16.mxu0 %v3515_v28  ;;  %2340 = vmatprep.subr.bf16.mxu1 %v3518_v29  ;;  %v3599_v28 = vld [vmem:[%s3751_s7 + $0x784] ss:$16 sps:$4 sm:$0xff]   ;;  %v3602_v29 = vld [vmem:[%s3751_s7 + $0x78c] ss:$16 sps:$4 sm:$0xff]  }
  0xe9   : > { %2129 = vmatpush1.bf16.msra.mxu0 %v3513_v30  ;;  %2341 = vmatpush1.bf16.msra.mxu1 %v3516_v31  ;;  %v3597_v30 = vld [vmem:[%s3751_s7 + $0x780] ss:$16 sps:$4 sm:$0xff]   ;;  %v3600_v31 = vld [vmem:[%s3751_s7 + $0x788] ss:$16 sps:$4 sm:$0xff]  }
  0xea   : > { %2130 = vmatprep.subr.bf16.mxu0 %v3521_v32  ;;  %2342 = vmatprep.subr.bf16.mxu1 %v3524_v33  ;;  %v3605_v32 = vld [vmem:[%s3751_s7 + $0x7a4] ss:$16 sps:$4 sm:$0xff]   ;;  %v3608_v33 = vld [vmem:[%s3751_s7 + $0x7ac] ss:$16 sps:$4 sm:$0xff]  }
  0xed   : > { %2131 = vmatpush1.bf16.msra.mxu0 %v3519_v34  ;;  %2343 = vmatpush1.bf16.msra.mxu1 %v3522_v35  ;;  %v3603_v34 = vld [vmem:[%s3751_s7 + $0x7a0] ss:$16 sps:$4 sm:$0xff]   ;;  %v3606_v35 = vld [vmem:[%s3751_s7 + $0x7a8] ss:$16 sps:$4 sm:$0xff]  }
  0xee   : > { %2153 = vmatprep.subr.bf16.mxu0 %v3527_v36  ;;  %2365 = vmatprep.subr.bf16.mxu1 %v3530_v37  ;;  %v3611_v36 = vld [vmem:[%s3751_s7 + $0x7c4] ss:$16 sps:$4 sm:$0xff]   ;;  %v3614_v37 = vld [vmem:[%s3751_s7 + $0x7cc] ss:$16 sps:$4 sm:$0xff]  }
  0xf0   : > { %2133 = vmatmul.mubr.bf16.vlgmr.msra.gmra.mrb[0].mxu0 %v2853_v38  ;;  %2345 = vmatmul.mubr.bf16.vlgmr.msra.gmra.mrb[0].mxu1 %v2853_v38  ;;  %v3609_v38 = vld [vmem:[%s3751_s7 + $0x7c0] ss:$16 sps:$4 sm:$0xff]  }
  0xf1   : > { %2154 = vmatpush1.bf16.msra.mxu0 %v3525_v41  ;;  %2366 = vmatpush1.bf16.msra.mxu1 %v3528_v43  ;;  %v3620_v41 = vld [vmem:[%s3751_s7 + $0x7ec] ss:$16 sps:$4 sm:$0xff]   ;;  %v3615_v43 = vld [vmem:[%s3751_s7 + $0x7e0] ss:$16 sps:$4 sm:$0xff]  }
  0xf2   : > { %2155 = vmatprep.subr.bf16.mxu0 %v3533_v45  ;;  %2367 = vmatprep.subr.bf16.mxu1 %v3536_v46  ;;  %v3618_v45 = vld [vmem:[%s3751_s7 + $0x7e8] ss:$16 sps:$4 sm:$0xff]  }
  0xf3   : > { %2142 = vmatprep.mubr.bf16.mxu0 %v2862_v47  ;;  %2354 = vmatprep.mubr.bf16.mxu1 %v2862_v47  ;;  %v373_v46 = vld [vmem:[%s3753_s8 + $0x58] sm:$0xff] }
  0xf4   : > { %v377_v47 = vld [vmem:[%s3753_s8 + $0x78] sm:$0xff] }
  0xf5   : > { %2156 = vmatpush1.bf16.msra.mxu0 %v3531_v42  ;;  %2368 = vmatpush1.bf16.msra.mxu1 %v3534_v44  ;;  %v2855_v42 = vcombine.low %v3987_v51, %v3990_v52  ;;  %v2864_v44 = vcombine.high %v373_v46, %v377_v47 }
  0xf6   : > { %2157 = vmatprep.subr.bf16.mxu0 %v3539_v48  ;;  %2369 = vmatprep.subr.bf16.mxu1 %v3542_v49  ;;  %v2863_v48 = vcombine.low %v373_v46, %v377_v47  ;;  %v346_v49 = vld [vmem:[#allocation2] sm:$0xff] }
  0xf8   : > { %2143 = vmatmul.mubr.bf16.gmra.mrb[4].mxu0 %v2861_v50  ;;  %2355 = vmatmul.mubr.bf16.gmra.mrb[4].mxu1 %v2861_v50  ;;  %v348_v50 = vld [vmem:[#allocation2 + $0x10] sm:$0xff] }
  0xf9   : > { %2158 = vmatpush1.bf16.msra.mxu0 %v3537_v53  ;;  %2370 = vmatpush1.bf16.msra.mxu1 %v3540_v54  ;;  %v347_v53 = vld [vmem:[#allocation2 + $0x8] sm:$0xff]  ;;  %v349_v54 = vld [vmem:[#allocation2 + $0x18] sm:$0xff] }
  0xfa   : > { %2159 = vmatprep.subr.bf16.mxu0 %v3545_v55  ;;  %2371 = vmatprep.subr.bf16.mxu1 %v3548_v56 }
  0xfb   : > { %2185 = vmatprep.mubr.bf16.mxu0 %v2856_v57  ;;  %2397 = vmatprep.mubr.bf16.mxu1 %v2856_v57  ;;  %v350_v57 = vld [vmem:[#allocation2 + $0x20] sm:$0xff] }
  0xfd   : > { %2160 = vmatpush1.bf16.msra.mxu0 %v3543_v58  ;;  %2372 = vmatpush1.bf16.msra.mxu1 %v3546_v59  ;;  %v352_v58 = vld [vmem:[#allocation2 + $0x30] sm:$0xff] }
  0xfe   : > { %2161 = vmatprep.subr.bf16.mxu0 %v3551_v60  ;;  %2373 = vmatprep.subr.bf16.mxu1 %v3554_v61  ;;  %v351_v61 = vld [vmem:[#allocation2 + $0x28] sm:$0xff] }
 0x101   : > { %2162 = vmatpush1.bf16.msra.mxu0 %v3549_v62  ;;  %2374 = vmatpush1.bf16.msra.mxu1 %v3552_v63  ;;  %v353_v62 = vld [vmem:[#allocation2 + $0x38] sm:$0xff] }
 0x102   : > { %2163 = vmatprep.subr.bf16.mxu0 %v3557_v0  ;;  %2375 = vmatprep.subr.bf16.mxu1 %v3560_v1 }
 0x105   : > { %2164 = vmatpush1.bf16.msra.mxu0 %v3555_v2  ;;  %2376 = vmatpush1.bf16.msra.mxu1 %v3558_v3 }
 0x106   : > { %2165 = vmatprep.subr.bf16.mxu0 %v3563_v4  ;;  %2377 = vmatprep.subr.bf16.mxu1 %v3566_v5 }
 0x109   : > { %2166 = vmatpush1.bf16.msra.mxu0 %v3561_v6  ;;  %2378 = vmatpush1.bf16.msra.mxu1 %v3564_v7 }
 0x10a   : > { %2167 = vmatprep.subr.bf16.mxu0 %v3569_v8  ;;  %2379 = vmatprep.subr.bf16.mxu1 %v3572_v9  ;;  %v354_v9 = vld [vmem:[#allocation2 + $0x40] sm:$0xff] }
 0x10d   : > { %2168 = vmatpush1.bf16.msra.mxu0 %v3567_v10  ;;  %2380 = vmatpush1.bf16.msra.mxu1 %v3570_v11  ;;  %v356_v10 = vld [vmem:[#allocation2 + $0x50] sm:$0xff]  ;;  %v355_v11 = vld [vmem:[#allocation2 + $0x48] sm:$0xff] }
 0x10e   : > { %2169 = vmatprep.subr.bf16.mxu0 %v3575_v12  ;;  %2381 = vmatprep.subr.bf16.mxu1 %v3578_v13  ;;  %v357_v12 = vld [vmem:[#allocation2 + $0x58] sm:$0xff] }
 0x111   : > { %2170 = vmatpush1.bf16.msra.mxu0 %v3573_v14  ;;  %2382 = vmatpush1.bf16.msra.mxu1 %v3576_v15  ;;  %v358_v15 = vld [vmem:[#allocation2 + $0x60] sm:$0xff] }
 0x112   : > { %2171 = vmatprep.subr.bf16.mxu0 %v3581_v16  ;;  %2383 = vmatprep.subr.bf16.mxu1 %v3584_v17  ;;  %v360_v16 = vld [vmem:[#allocation2 + $0x70] sm:$0xff] }
 0x115   : > { %2172 = vmatpush1.bf16.msra.mxu0 %v3579_v18  ;;  %2384 = vmatpush1.bf16.msra.mxu1 %v3582_v19 }
 0x116   : > { %2173 = vmatprep.subr.bf16.mxu0 %v3587_v20  ;;  %2385 = vmatprep.subr.bf16.mxu1 %v3590_v21  ;;  %v359_v21 = vld [vmem:[#allocation2 + $0x68] sm:$0xff] }
 0x119   : > { %2174 = vmatpush1.bf16.msra.mxu0 %v3585_v22  ;;  %2386 = vmatpush1.bf16.msra.mxu1 %v3588_v23  ;;  %v361_v22 = vld [vmem:[#allocation2 + $0x78] sm:$0xff] }
 0x11a   : > { %2175 = vmatprep.subr.bf16.mxu0 %v3593_v24  ;;  %2387 = vmatprep.subr.bf16.mxu1 %v3596_v25 }
 0x11d   : > { %2176 = vmatpush1.bf16.msra.mxu0 %v3591_v26  ;;  %2388 = vmatpush1.bf16.msra.mxu1 %v3594_v27 }
 0x11e   : > { %2177 = vmatprep.subr.bf16.mxu0 %v3599_v28  ;;  %2389 = vmatprep.subr.bf16.mxu1 %v3602_v29 }
 0x121   : > { %2178 = vmatpush1.bf16.msra.mxu0 %v3597_v30  ;;  %2390 = vmatpush1.bf16.msra.mxu1 %v3600_v31 }
 0x122   : > { %2179 = vmatprep.subr.bf16.mxu0 %v3605_v32  ;;  %2391 = vmatprep.subr.bf16.mxu1 %v3608_v33 }
 0x125   : > { %2180 = vmatpush1.bf16.msra.mxu0 %v3603_v34  ;;  %2392 = vmatpush1.bf16.msra.mxu1 %v3606_v35 }
 0x126   : > { %2181 = vmatprep.subr.bf16.mxu0 %v3611_v36  ;;  %2393 = vmatprep.subr.bf16.mxu1 %v3614_v37  ;;  %v2623_v36 = vlaneseq (!%p3121_p11) }
 0x128   : > { %vm2645_vm0 = vcmp.lt.s32.totalorder (!%p3121_p11), %v2623_v36, 512 }
 0x129   : > { %2182 = vmatpush1.bf16.msra.mxu0 %v3609_v38  ;;  %2394 = vmatpush1.bf16.msra.mxu1 %v3612_v39 }
 0x12a   : > { %2183 = vmatprep.subr.bf16.mxu0 %v3617_v40  ;;  %2395 = vmatprep.subr.bf16.mxu1 %v3620_v41 }
 0x12d   : > { %2184 = vmatpush1.bf16.msra.mxu0 %v3615_v43  ;;  %2396 = vmatpush1.bf16.msra.mxu1 %v3618_v45 }
 0x130   : > { %2186 = vmatmul.mubr.bf16.vlgmr.msra.gmra.mrb[0].mxu0 %v2855_v42  ;;  %2398 = vmatmul.mubr.bf16.vlgmr.msra.gmra.mrb[0].mxu1 %v2855_v42 }
 0x131   : > { %2195 = vmatprep.mubr.bf16.mxu0 %v2864_v44  ;;  %2407 = vmatprep.mubr.bf16.mxu1 %v2864_v44 }
 0x138   : > { %2196 = vmatmul.mubr.bf16.gmra.mrb[4].mxu0 %v2863_v48  ;;  %2408 = vmatmul.mubr.bf16.gmra.mrb[4].mxu1 %v2863_v48 }
 0x203   : > { %v2187_v55 = vpop.f32.mrb[0].mxu0  ;;  %v2399_v56 = vpop.f32.mrb[0].mxu1 }
 0x204   : > { %v2418_v59 = vadd.f32 %v2187_v55, %v346_v49  ;;  %v2420_v51 = vadd.f32 %v2399_v56, %v348_v50  ;;  %v2189_v52 = vpop.f32.mrb[1].mxu0  ;;  %v2401_v60 = vpop.f32.mrb[1].mxu1 }
 0x205   : > { %v2419_v63 = vadd.f32 %v2189_v52, %v347_v53  ;;  %v2421_v0 = vadd.f32 %v2401_v60, %v349_v54  ;;  %v2191_v1 = vpop.f32.mrb[2].mxu0  ;;  %v2403_v2 = vpop.f32.mrb[2].mxu1 }
 0x206   : > { %2434 = vst [vmem:[#allocation2] sm:$0xff] %v2418_v59  ;;  %2436 = vst [vmem:[#allocation2 + $0x10] sm:$0xff] %v2420_v51  ;;  %v2422_v3 = vadd.f32 %v2191_v1, %v350_v57  ;;  %v2424_v4 = vadd.f32 %v2403_v2, %v352_v58  ;;  %v2193_v5 = vpop.f32.mrb[3].mxu0  ;;  %v2405_v6 = vpop.f32.mrb[3].mxu1 }
 0x207   : > { %2435 = vst [vmem:[#allocation2 + $0x8] sm:$0xff] %v2419_v63  ;;  %2437 = vst [vmem:[#allocation2 + $0x18] sm:$0xff] %v2421_v0  ;;  %v2423_v7 = vadd.f32 %v2193_v5, %v351_v61  ;;  %v2425_v8 = vadd.f32 %v2405_v6, %v353_v62 }
 0x208   : > { %2438 = vst [vmem:[#allocation2 + $0x20] sm:$0xff] %v2422_v3  ;;  %2440 = vst [vmem:[#allocation2 + $0x30] sm:$0xff] %v2424_v4 }
 0x209   : > { %2439 = vst [vmem:[#allocation2 + $0x28] sm:$0xff] %v2423_v7  ;;  %2441 = vst [vmem:[#allocation2 + $0x38] sm:$0xff] %v2425_v8 }
 0x20b   : > { %v2197_v13 = vpop.f32.mrb[4].mxu0  ;;  %v2409_v14 = vpop.f32.mrb[4].mxu1  ;;  %2453 = sbr.rel (%p3121_p11) target bundleno = 566 (0x236), region = 59 }
 0x20c   : > { %v2426_v17 = vadd.f32 %v2197_v13, %v354_v9  ;;  %v2428_v18 = vadd.f32 %v2409_v14, %v356_v10  ;;  %v2199_v19 = vpop.f32.mrb[5].mxu0  ;;  %v2411_v20 = vpop.f32.mrb[5].mxu1 }
 0x20d   : > { %v2427_v23 = vadd.f32 %v2199_v19, %v355_v11  ;;  %v2429_v24 = vadd.f32 %v2411_v20, %v357_v12  ;;  %v2201_v25 = vpop.f32.mrb[6].mxu0  ;;  %v2413_v26 = vpop.f32.mrb[6].mxu1  ;;  %v2454_v33 = vld [vmem:[#allocation2] sm:$0xff] (!%p3121_p11)  ;;  %v2456_v35 = vld [vmem:[#allocation2 + $0x10] sm:$0xff] (!%p3121_p11) }
 0x20e   : > { %2442 = vst [vmem:[#allocation2 + $0x40] sm:$0xff] %v2426_v17  ;;  %2444 = vst [vmem:[#allocation2 + $0x50] sm:$0xff] %v2428_v18  ;;  %v2430_v27 = vadd.f32 %v2201_v25, %v358_v15  ;;  %v2432_v28 = vadd.f32 %v2413_v26, %v360_v16  ;;  %v2203_v29 = vpop.f32.mrb[7].mxu0  ;;  %v2415_v30 = vpop.f32.mrb[7].mxu1  ;;  %v2455_v34 = vld [vmem:[#allocation2 + $0x8] sm:$0xff] (!%p3121_p11)  ;;  %v2562_v38 = vmul.f32 (!%p3121_p11), %v2454_v33, %v2454_v33  ;;  %v2457_v40 = vld [vmem:[#allocation2 + $0x18] sm:$0xff] (!%p3121_p11) }
 0x20f   : > { %2443 = vst [vmem:[#allocation2 + $0x48] sm:$0xff] %v2427_v23  ;;  %2445 = vst [vmem:[#allocation2 + $0x58] sm:$0xff] %v2429_v24  ;;  %v2431_v31 = vadd.f32 %v2203_v29, %v359_v21  ;;  %v2433_v32 = vadd.f32 %v2415_v30, %v361_v22  ;;  %v3139_v37 = vpack.c.bf16 (!%p3121_p11), %v2455_v34, %v2454_v33  ;;  %v2458_v43 = vld [vmem:[#allocation2 + $0x20] sm:$0xff] (!%p3121_p11)  ;;  %v2460_v48 = vld [vmem:[#allocation2 + $0x30] sm:$0xff] (!%p3121_p11) }
 0x210   : > { %2446 = vst [vmem:[#allocation2 + $0x60] sm:$0xff] %v2430_v27  ;;  %2448 = vst [vmem:[#allocation2 + $0x70] sm:$0xff] %v2432_v28  ;;  %v2563_v39 = vmul.f32 (!%p3121_p11), %v2455_v34, %v2455_v34  ;;  %v2564_v41 = vmul.f32 (!%p3121_p11), %v2456_v35, %v2456_v35  ;;  %v2459_v45 = vld [vmem:[#allocation2 + $0x28] sm:$0xff] (!%p3121_p11)  ;;  %v3140_v46 = vpack.c.bf16 (!%p3121_p11), %v2457_v40, %v2456_v35  ;;  %v2461_v49 = vld [vmem:[#allocation2 + $0x38] sm:$0xff] (!%p3121_p11) }
 0x211   : > { %2447 = vst [vmem:[#allocation2 + $0x68] sm:$0xff] %v2431_v31  ;;  %2449 = vst [vmem:[#allocation2 + $0x78] sm:$0xff] %v2433_v32  ;;  %v2565_v47 = vmul.f32 (!%p3121_p11), %v2457_v40, %v2457_v40  ;;  %v3141_v42 = vpack.c.bf16 (!%p3121_p11), %v2459_v45, %v2458_v43  ;;  %v2526_v44 = vadd.f32 (!%p3121_p11), %v2458_v43, %v2454_v33 }
 0x212   : > { %2518 = vst [vmem:[%s4102_s2] sm:$0xff] %v3139_v37  ;;  %v2535_v50 = vadd.f32 %v2459_v45, %v2455_v34  ;;  %v2566_v53 = vmul.f32 %v2458_v43, %v2458_v43  ;;  %v2567_v54 = vmul.f32 %v2459_v45, %v2459_v45  ;;  %v3142_v55 = vpack.c.bf16 %v2461_v49, %v2460_v48 }
 0x213   : > { %2519 = vst [vmem:[%s4102_s2 + $0x8] sm:$0xff] %v3140_v46  ;;  %2520 = vst [vmem:[%s4102_s2 + $0x10] sm:$0xff] %v3141_v42  ;;  %v2544_v57 = vadd.f32 %v2460_v48, %v2456_v35  ;;  %v2553_v58 = vadd.f32 %v2461_v49, %v2457_v40  ;;  %v2568_v59 = vmul.f32 %v2460_v48, %v2460_v48 }
 0x214   : > { %v2569_v51 = vmul.f32 %v2461_v49, %v2461_v49  ;;  %v2578_v60 = vadd.f32 %v2566_v53, %v2562_v38  ;;  %v2587_v61 = vadd.f32 %v2567_v54, %v2563_v39  ;;  %2521 = vst [vmem:[%s4102_s2 + $0x18] sm:$0xff] %v3142_v55 }
 0x215   : > { %v2462_v56 = vld [vmem:[#allocation2 + $0x40] sm:$0xff]  ;;  %v2464_v0 = vld [vmem:[#allocation2 + $0x50] sm:$0xff]  ;;  %v2596_v2 = vadd.f32 %v2568_v59, %v2564_v41 }
 0x216   : > { %v2463_v52 = vld [vmem:[#allocation2 + $0x48] sm:$0xff]  ;;  %v2527_v63 = vadd.f32 %v2526_v44, %v2462_v56  ;;  %v2465_v1 = vld [vmem:[#allocation2 + $0x58] sm:$0xff]  ;;  %v2605_v3 = vadd.f32 %v2569_v51, %v2565_v47  ;;  %v2570_v5 = vmul.f32 %v2462_v56, %v2462_v56  ;;  %v2545_v9 = vadd.f32 %v2544_v57, %v2464_v0 }
 0x217   : > { %v3143_v62 = vpack.c.bf16 %v2463_v52, %v2462_v56  ;;  %v2536_v4 = vadd.f32 %v2535_v50, %v2463_v52  ;;  %v2466_v6 = vld [vmem:[#allocation2 + $0x60] sm:$0xff]  ;;  %v2571_v7 = vmul.f32 %v2463_v52, %v2463_v52  ;;  %v3144_v8 = vpack.c.bf16 %v2465_v1, %v2464_v0  ;;  %v2468_v20 = vld [vmem:[#allocation2 + $0x70] sm:$0xff] }
 0x218   : > { %v2554_v10 = vadd.f32 %v2553_v58, %v2465_v1  ;;  %v2467_v11 = vld [vmem:[#allocation2 + $0x68] sm:$0xff]  ;;  %v2579_v12 = vadd.f32 %v2578_v60, %v2570_v5  ;;  %v2572_v13 = vmul.f32 %v2464_v0, %v2464_v0  ;;  %v2573_v14 = vmul.f32 %v2465_v1, %v2465_v1  ;;  %v2469_v21 = vld [vmem:[#allocation2 + $0x78] sm:$0xff] }
 0x219   : > { %2522 = vst [vmem:[%s4102_s2 + $0x20] sm:$0xff] %v3143_v62  ;;  %v3145_v15 = vpack.c.bf16 %v2467_v11, %v2466_v6  ;;  %v2588_v16 = vadd.f32 %v2587_v61, %v2571_v7  ;;  %2523 = vst [vmem:[%s4102_s2 + $0x28] sm:$0xff] %v3144_v8  ;;  %v2528_v17 = vadd.f32 %v2527_v63, %v2466_v6 }
 0x21a   : > { %v2537_v18 = vadd.f32 %v2536_v4, %v2467_v11  ;;  %v2574_v19 = vmul.f32 %v2466_v6, %v2466_v6  ;;  %v2597_v22 = vadd.f32 %v2596_v2, %v2572_v13  ;;  %v2606_v23 = vadd.f32 %v2605_v3, %v2573_v14 }
 0x21b   : > { %2524 = vst [vmem:[%s4102_s2 + $0x30] sm:$0xff] %v3145_v15  ;;  %v2575_v24 = vmul.f32 %v2467_v11, %v2467_v11  ;;  %v3146_v25 = vpack.c.bf16 %v2469_v21, %v2468_v20  ;;  %v2529_v26 = vrot.slane %v2528_v17, 4  ;;  %v2546_v29 = vadd.f32 %v2545_v9, %v2468_v20 }
 0x21c   : > { %v2538_v27 = vrot.slane %v2537_v18, 4  ;;  %v2580_v28 = vadd.f32 %v2579_v12, %v2574_v19  ;;  %v2555_v31 = vadd.f32 %v2554_v10, %v2469_v21  ;;  %v2576_v32 = vmul.f32 %v2468_v20, %v2468_v20 }
 0x21d   : > { %v2589_v30 = vadd.f32 %v2588_v16, %v2575_v24  ;;  %2525 = vst [vmem:[%s4102_s2 + $0x38] sm:$0xff] %v3146_v25  ;;  %v2577_v33 = vmul.f32 %v2469_v21, %v2469_v21  ;;  %v2530_v34 = vadd.f32 %v2529_v26, %v2528_v17  ;;  %v2547_v38 = vrot.slane %v2546_v29, 4 }
 0x21e   : > { %v2539_v35 = vadd.f32 %v2538_v27, %v2537_v18  ;;  %v2581_v37 = vrot.slane %v2580_v28, 4  ;;  %v2556_v40 = vrot.slane %v2555_v31, 4  ;;  %v2598_v41 = vadd.f32 %v2597_v22, %v2576_v32 }
 0x21f   : > { %v2590_v39 = vrot.slane %v2589_v30, 4  ;;  %v2607_v43 = vadd.f32 %v2606_v23, %v2577_v33  ;;  %v2531_v45 = vrot.slane %v2530_v34, 2  ;;  %v2548_v42 = vadd.f32 %v2547_v38, %v2546_v29 }
 0x220   : > { %v2540_v46 = vrot.slane %v2539_v35, 2  ;;  %v2582_v47 = vadd.f32 %v2581_v37, %v2580_v28  ;;  %v2557_v48 = vadd.f32 %v2556_v40, %v2555_v31  ;;  %v2599_v49 = vrot.slane %v2598_v41, 4 }
 0x221   : > { %v2591_v44 = vadd.f32 %v2590_v39, %v2589_v30  ;;  %v2608_v50 = vrot.slane %v2607_v43, 4  ;;  %v2532_v53 = vadd.f32 %v2531_v45, %v2530_v34  ;;  %v2549_v56 = vrot.slane %v2548_v42, 2 }
 0x222   : > { %v2541_v54 = vadd.f32 %v2540_v46, %v2539_v35  ;;  %v2583_v55 = vrot.slane %v2582_v47, 2  ;;  %v2558_v58 = vrot.slane %v2557_v48, 2  ;;  %v2600_v59 = vadd.f32 %v2599_v49, %v2598_v41 }
 0x223   : > { %v2592_v57 = vrot.slane %v2591_v44, 2  ;;  %v2609_v51 = vadd.f32 %v2608_v50, %v2607_v43  ;;  %v2533_v52 = vrot.slane %v2532_v53, 1  ;;  %v2550_v62 = vadd.f32 %v2549_v56, %v2548_v42 }
 0x224   : > { %v2542_v60 = vrot.slane %v2541_v54, 1  ;;  %v2584_v61 = vadd.f32 %v2583_v55, %v2582_v47  ;;  %v2559_v0 = vadd.f32 %v2558_v58, %v2557_v48  ;;  %v2601_v1 = vrot.slane %v2600_v59, 2 }
 0x225   : > { %v2593_v63 = vadd.f32 %v2592_v57, %v2591_v44  ;;  %v2610_v2 = vrot.slane %v2609_v51, 2  ;;  %v2551_v3 = vrot.slane %v2550_v62, 1  ;;  %v2534_v4 = vadd.f32 %v2533_v52, %v2532_v53 }
 0x226   : > { %v2543_v5 = vadd.f32 %v2542_v60, %v2541_v54  ;;  %v3662_v6 = vmov 1966171168   ;;  %v2560_v8 = vrot.slane %v2559_v0, 1  ;;  %v2602_v9 = vadd.f32 %v2601_v1, %v2600_v59 }
 0x227   : > { %v2621_v7 = vunpack.c.l.s4 %v3662_v6  ;;  %v2611_v10 = vadd.f32 %v2610_v2, %v2609_v51  ;;  %v2624_v11 = vshrl.u32 %v2623_v36, 7  ;;  %v2552_v12 = vadd.f32 %v2551_v3, %v2550_v62 }
 0x228   : > { %v2618_v13 = vcombine.low %v2534_v4, %v2543_v5  ;;  %v2561_v15 = vadd.f32 %v2560_v8, %v2559_v0  ;;  %v2585_v16 = vrot.slane %v2584_v61, 1  ;;  %v2594_v17 = vrot.slane %v2593_v63, 1 }
 0x229   : > { %v2622_v14 = vunpack.c.0.s8 %v2621_v7  ;;  %v2603_v18 = vrot.slane %v2602_v9, 1  ;;  %v2612_v20 = vrot.slane %v2611_v10, 1 }
 0x22a   : > { %v2619_v21 = vcombine.low %v2552_v12, %v2561_v15  ;;  %v2586_v22 = vadd.f32 %v2585_v16, %v2584_v61  ;;  %v2595_v23 = vadd.f32 %v2594_v17, %v2593_v63 }
 0x22b   : > { %v2625_v19 = vsub.s32 %v2622_v14, %v2624_v11  ;;  %v2604_v24 = vadd.f32 %v2603_v18, %v2602_v9  ;;  %v2613_v26 = vadd.f32 %v2612_v20, %v2611_v10 }
 0x22c   : > { %v2652_v28 = vcombine.low %v2586_v22, %v2595_v23 }
 0x22d   : > { %v2626_v25 = vrot.slane %v2618_v13, %v2625_v19  ;;  %v2633_v27 = vrot.slane %v2619_v21, %v2625_v19  ;;  %v2653_v29 = vcombine.low %v2604_v24, %v2613_v26 }
 0x22e   : > { %v2660_v31 = vrot.slane %v2652_v28, %v2625_v19 }
 0x22f   : > { %v2634_v30 = vcombine.low %v2626_v25, %v2633_v27  ;;  %v2667_v32 = vrot.slane %v2653_v29, %v2625_v19 }
 0x231   : > { %v2641_v33 = vrot.slane %v2634_v30, %v2625_v19  ;;  %v2668_v34 = vcombine.low %v2660_v31, %v2667_v32 }
 0x233   : > { %2647 = vst.msk [vmem:[%s4103_s3] ss:$2 sm:$0xf] %vm2645_vm0, %v2641_v33  ;;  %v2675_v35 = vrot.slane %v2668_v34, %v2625_v19 }
 0x235   : > { %3130 = vst.msk [vmem:[%s4103_s3 + $0x1] ss:$2 sm:$0xf] %vm2645_vm0, %v2675_v35 }
 0x236 PF: > { %s14_s16 = sadd.s32 1, %s3659_s16   ;;  %s4104_s12 = smov %s3647_s13 }
 0x237   : > { %p11_p12 = scmp.ge.s32.totalorder %s14_s16, 6   ;;  %s4105_s13 = smov %s3718_s20 }
 0x238   : > { %s4106_s14 = smov %s3655_s15  ;;  %s4107_s15 = smov %s4109_s17 }
 0x239   :  { %13 = sbr.rel (!%p11_p12) target bundleno = 3 (0x3), region = 110 }

// kernel: discriminator_forward.15
= control target key start
LH: loop header
LB: loop body
LE: loop exit
PB: predicated region body
PF: predicated region fallthrough
CT: control target
= control target key end

     0   :  { %s915_s0 = inlined_call_operand.vmem [shape: bf16[16,8192], index: 0, kind: input, shape index: {}]   ;;  %s916_s1 = inlined_call_operand.vmem [shape: bf16[1,8192], index: 1, kind: input, shape index: {}]   ;;  %s917_s2 = inlined_call_operand.<no memory space> [shape: f32[1], index: 2, kind: input, shape index: {}]   ;;  %s918_s3 = inlined_call_operand.vmem [shape: f32[16,1], index: 3, kind: output, shape index: {}]  }
   0x1   :  { %8 = sst [smem:[#allocation3]] %s917_s2 }
   0x2   :  { %s756_s14 = smov 0   ;;  %s758_s15 = smov 0  }
   0x3   :  { %s760_s16 = smov 0   ;;  %s762_s17 = smov 0  }
   0x4   :  { %s764_s18 = smov 0  }
   0x5 LB: > { %s23_s2 = sadd.s32 1, %s726_s17  ;;  %p42_p1 = scmp.ne.s32.totalorder %s718_s15, %s714_s14  ;;  %s730_s18 = sphi %s764_s18, %s14_s18   ;;  %s726_s17 = sphi %s762_s17, %s922_s17   ;;  %s722_s16 = sphi %s760_s16, %s921_s16   ;;  %s718_s15 = sphi %s758_s15, %s920_s15   ;;  %s714_s14 = sphi %s756_s14, %s919_s14  }
   0x6   : > { %p24_p0 = scmp.ge.s32.totalorder %s23_s2, 4  ;;  %p43_p2 = scmp.eq.s32.totalorder %s730_s18, 0 }
   0x7   : > { %s35_s20 = sadd.s32 1, %s718_s15  ;;  %p637_p5 = scmp.ge.s32.totalorder %s730_s18, 4 }
   0x8   : > { %s924_s2 = smov (%p24_p0, %s23_s2), 0  ;;  %p44_p3 = por %p43_p2, %p42_p1 }
   0x9   : > { %s31_s19 = ssub.s32 %s726_s17, %s924_s2  ;;  %144 = sbr.rel (%p637_p5) target bundleno = 28 (0x1c), region = 20 }
   0xa   : > { %p33_p4 = scmp.eq.s32.totalorder %s31_s19, 0 }
   0xc   : > { %s791_s21 = scalar_select %p33_p4, %s718_s15, %s35_s20  }
  0x10   : > { %147 = sbr.rel (!%p44_p3) target bundleno = 28 (0x1c), region = 24  ;;  %s149_s22 = sand.u32 (%p44_p3), 1, %s718_s15  }
  0x11   : > { %s650_s23 = sshll.u32 (%p44_p3), %s726_s17, 6  ;;  %s638_s24 = sshll.u32 (%p44_p3), %s149_s22, 7 }
  0x12   : > { %s799_s27 = scalar_lea.vmem (%p44_p3), %s915_s0, %s650_s23  ;;  %s151_s28 = scalar_lea.vmem (%p44_p3), [#allocation4], %s638_s24 }
  0x13   : > { %v170_v0 = vld [vmem:[%s799_s27] sm:$0xff] (%p44_p3)  ;;  %v172_v1 = vld [vmem:[%s799_s27 + $0x8] sm:$0xff] (%p44_p3)  ;;  %v174_v2 = vld [vmem:[%s799_s27 + $0x10] sm:$0xff] (%p44_p3) }
  0x14   : > { %171 = vst [vmem:[%s151_s28] sm:$0xff] (%p44_p3), %v170_v0  ;;  %173 = vst [vmem:[%s151_s28 + $0x8] sm:$0xff] (%p44_p3), %v172_v1  ;;  %v176_v3 = vld [vmem:[%s799_s27 + $0x18] sm:$0xff] (%p44_p3)  ;;  %v178_v4 = vld [vmem:[%s799_s27 + $0x20] sm:$0xff] (%p44_p3) }
  0x15   : > { %175 = vst [vmem:[%s151_s28 + $0x10] sm:$0xff] (%p44_p3), %v174_v2  ;;  %v180_v5 = vld [vmem:[%s799_s27 + $0x28] sm:$0xff] (%p44_p3)  ;;  %177 = vst [vmem:[%s151_s28 + $0x18] sm:$0xff] (%p44_p3), %v176_v3  ;;  %v182_v6 = vld [vmem:[%s799_s27 + $0x30] sm:$0xff] (%p44_p3) }
  0x16   : > { %179 = vst [vmem:[%s151_s28 + $0x20] sm:$0xff] (%p44_p3), %v178_v4  ;;  %181 = vst [vmem:[%s151_s28 + $0x28] sm:$0xff] (%p44_p3), %v180_v5  ;;  %v184_v7 = vld [vmem:[%s799_s27 + $0x38] sm:$0xff] (%p44_p3)  ;;  %v186_v8 = vld [vmem:[%s799_s27 + $0x100] sm:$0xff] (%p44_p3) }
  0x17   : > { %183 = vst [vmem:[%s151_s28 + $0x30] sm:$0xff] %v182_v6  ;;  %185 = vst [vmem:[%s151_s28 + $0x38] sm:$0xff] %v184_v7  ;;  %v188_v9 = vld [vmem:[%s799_s27 + $0x108] sm:$0xff]  ;;  %v190_v10 = vld [vmem:[%s799_s27 + $0x110] sm:$0xff] }
  0x18   : > { %187 = vst [vmem:[%s151_s28 + $0x40] sm:$0xff] %v186_v8  ;;  %v192_v11 = vld [vmem:[%s799_s27 + $0x118] sm:$0xff]  ;;  %189 = vst [vmem:[%s151_s28 + $0x48] sm:$0xff] %v188_v9  ;;  %v194_v12 = vld [vmem:[%s799_s27 + $0x120] sm:$0xff] }
  0x19   : > { %191 = vst [vmem:[%s151_s28 + $0x50] sm:$0xff] %v190_v10  ;;  %193 = vst [vmem:[%s151_s28 + $0x58] sm:$0xff] %v192_v11  ;;  %v196_v13 = vld [vmem:[%s799_s27 + $0x128] sm:$0xff]  ;;  %v198_v14 = vld [vmem:[%s799_s27 + $0x130] sm:$0xff] }
  0x1a   : > { %195 = vst [vmem:[%s151_s28 + $0x60] sm:$0xff] %v194_v12  ;;  %197 = vst [vmem:[%s151_s28 + $0x68] sm:$0xff] %v196_v13  ;;  %v200_v15 = vld [vmem:[%s799_s27 + $0x138] sm:$0xff] }
  0x1b   : > { %199 = vst [vmem:[%s151_s28 + $0x70] sm:$0xff] %v198_v14  ;;  %201 = vst [vmem:[%s151_s28 + $0x78] sm:$0xff] %v200_v15 }
  0x1c PF: > { %p641_p6 = scmp.ge.s32.totalorder %s730_s18, 1  ;;  %p214_p7 = scmp.lt.s32.totalorder %s730_s18, 5 }
  0x1e   : > { %p215_p8 = pnand %p641_p6, %p214_p7 }
  0x1f   : > { %s221_s29 = sand.u32 (!%p215_p8), 1, %s714_s14   ;;  %s643_s30 = sshll.u32 (!%p215_p8), %s722_s16, 4 }
  0x20   : > { %218 = sbr.rel (%p215_p8) target bundleno = 247 (0xf7), region = 51  ;;  %s642_s4 = sshll.u32 (!%p215_p8), %s221_s29, 7 }
  0x21   : > { %p251_p9 = scmp.lt.s32.totalorder (!%p215_p8), %s643_s30, 63  ;;  %s824_s8 = scalar_lea.vmem (!%p215_p8), [#allocation4], %s642_s4 }
  0x22   : > { %p644_p10 = scmp.ne.s32.totalorder (!%p215_p8), %s722_s16, 0 }
  0x27   : > { %s926_s30 = smov (!%p251_p9, %s643_s30), 63  ;;  %264 = sbr.rel (%p644_p10) target bundleno = 46 (0x2e), region = 59 }
  0x28   : > { %s253_s7 = scalar_lea.vmem %s916_s1, %s926_s30  ;;  %vm265_vm0 = vcmask (!%p644_p10), 7168   ;;  %v732_v16 = vmov (!%p644_p10), 0.0  }
  0x29   : > { %266 = vst.msk [vmem:[#allocation2] sm:$0xff] (!%p644_p10), %vm265_vm0, %v732_v16  ;;  %267 = vst.msk [vmem:[#allocation2 + $0x8] sm:$0xff] (!%p644_p10), %vm265_vm0, %v732_v16 }
  0x2e PF: > { %v326_v17 = vlaneseq  ;;  %v316_v18 = vld [vmem:[%s253_s7] sm:$0xff]  ;;  %v268_v24 = vld [vmem:[%s824_s8] sm:$0xff]  ;;  %v269_v30 = vld [vmem:[%s824_s8 + $0x8] sm:$0xff]  ;;  %vm540_vm1 = vcmask 7168   ;;  %p645_p11 = scmp.ne.s32.totalorder %s722_s16, 3 }
  0x2f   : > { %v318_v19 = vunpack.c.l.bf16 %v316_v18  ;;  %v319_v28 = vunpack.c.h.bf16 %v316_v18  ;;  %v284_v31 = vunpack.c.l.bf16 %v268_v24  ;;  %v285_v32 = vunpack.c.h.bf16 %v268_v24  ;;  %v270_v36 = vld [vmem:[%s824_s8 + $0x10] sm:$0xff]  ;;  %v317_v38 = vld [vmem:[%s253_s7 + $0x8] sm:$0xff]  ;;  %v276_v41 = vld [vmem:[%s824_s8 + $0x40] sm:$0xff]  ;;  %s549_s9 = sld [smem:[#allocation3]] (!%p645_p11) }
  0x30   : > { %v327_v20 = vshrl.u32 %v326_v17, 7  ;;  %v286_v37 = vunpack.c.l.bf16 %v269_v30  ;;  %v287_v42 = vunpack.c.h.bf16 %v269_v30  ;;  %v277_v43 = vld [vmem:[%s824_s8 + $0x48] sm:$0xff]  ;;  %v288_v48 = vunpack.c.l.bf16 %v270_v36  ;;  %v271_v51 = vld [vmem:[%s824_s8 + $0x18] sm:$0xff]  ;;  %v272_v58 = vld [vmem:[%s824_s8 + $0x20] sm:$0xff] }
  0x31   : > { %v320_v49 = vunpack.c.l.bf16 %v317_v38  ;;  %v301_v52 = vunpack.c.h.bf16 %v276_v41  ;;  %v300_v55 = vunpack.c.l.bf16 %v276_v41  ;;  %v289_v56 = vunpack.c.h.bf16 %v270_v36  ;;  %v278_v63 = vld [vmem:[%s824_s8 + $0x50] sm:$0xff]  ;;  %v279_v16 = vld [vmem:[%s824_s8 + $0x58] sm:$0xff]  ;;  %v273_v24 = vld [vmem:[%s824_s8 + $0x28] sm:$0xff] }
  0x32   : > { %v827_v21 = vsub.s32 0, %v327_v20  ;;  %v829_v22 = vsub.s32 2, %v327_v20  ;;  %v831_v23 = vsub.s32 4, %v327_v20  ;;  %v836_v27 = vsub.s32 6, %v327_v20  ;;  %v280_v36 = vld [vmem:[%s824_s8 + $0x60] sm:$0xff] }
  0x33   : > { %v302_v57 = vunpack.c.l.bf16 %v277_v43  ;;  %v290_v0 = vunpack.c.l.bf16 %v271_v51  ;;  %v303_v1 = vunpack.c.h.bf16 %v277_v43  ;;  %v291_v8 = vunpack.c.h.bf16 %v271_v51  ;;  %v274_v43 = vld [vmem:[%s824_s8 + $0x30] sm:$0xff] }
  0x34   : > { %v329_v25 = vrot.slane %v318_v19, %v827_v21  ;;  %v333_v26 = vrot.slane %v318_v19, %v829_v22  ;;  %v337_v29 = vrot.slane %v318_v19, %v831_v23  ;;  %v341_v33 = vrot.slane %v318_v19, %v836_v27 }
  0x35   : > { %v345_v39 = vrot.slane %v319_v28, %v827_v21  ;;  %v349_v44 = vrot.slane %v319_v28, %v829_v22  ;;  %v353_v50 = vrot.slane %v319_v28, %v831_v23  ;;  %v357_v59 = vrot.slane %v319_v28, %v836_v27 }
  0x36   : > { %v409_v34 = vrot.slane %v329_v25, %v827_v21  ;;  %v413_v35 = vrot.slane %v333_v26, %v827_v21  ;;  %v417_v40 = vrot.slane %v337_v29, %v827_v21  ;;  %v421_v45 = vrot.slane %v341_v33, %v827_v21 }
  0x37   : > { %v425_v53 = vrot.slane %v345_v39, %v827_v21  ;;  %v429_v60 = vrot.slane %v349_v44, %v827_v21  ;;  %v361_v2 = vrot.slane %v320_v49, %v827_v21  ;;  %v433_v3 = vrot.slane %v353_v50, %v827_v21 }
  0x38   : > { %v470_v46 = vmul.f32 %v409_v34, %v284_v31  ;;  %v471_v47 = vmul.f32 %v413_v35, %v285_v32  ;;  %v472_v54 = vmul.f32 %v417_v40, %v286_v37  ;;  %v473_v61 = vmul.f32 %v421_v45, %v287_v42 }
  0x39   : > { %v474_v4 = vmul.f32 %v425_v53, %v288_v48  ;;  %v487_v5 = vmul.f32 %v413_v35, %v301_v52  ;;  %v486_v7 = vmul.f32 %v409_v34, %v300_v55  ;;  %v292_v9 = vunpack.c.l.bf16 %v272_v58 }
  0x3a   : > { %v504_v62 = vadd.f32 %v471_v47, %v470_v46  ;;  %v365_v10 = vrot.slane %v320_v49, %v829_v22  ;;  %v304_v11 = vunpack.c.l.bf16 %v278_v63  ;;  %v437_v12 = vrot.slane %v357_v59, %v827_v21 }
  0x3b   : > { %v475_v13 = vmul.f32 %v429_v60, %v289_v56  ;;  %v488_v14 = vmul.f32 %v417_v40, %v302_v57  ;;  %v862_v17 = vunpack.c.h.bf16 %v317_v38  ;;  %v369_v18 = vrot.slane %v320_v49, %v831_v23 }
  0x3c   : > { %v505_v6 = vadd.f32 %v504_v62, %v472_v54  ;;  %v441_v19 = vrot.slane %v361_v2, %v827_v21  ;;  %v305_v20 = vunpack.c.h.bf16 %v278_v63  ;;  %v476_v25 = vmul.f32 %v433_v3, %v290_v0  ;;  %v281_v54 = vld [vmem:[%s824_s8 + $0x68] sm:$0xff] }
  0x3d   : > { %v489_v26 = vmul.f32 %v421_v45, %v303_v1  ;;  %v521_v29 = vadd.f32 %v487_v5, %v486_v7  ;;  %v293_v30 = vunpack.c.h.bf16 %v272_v58  ;;  %v373_v31 = vrot.slane %v320_v49, %v836_v27 }
  0x3e   : > { %v506_v15 = vadd.f32 %v505_v6, %v473_v61  ;;  %v445_v32 = vrot.slane %v365_v10, %v827_v21  ;;  %v306_v33 = vunpack.c.l.bf16 %v279_v16  ;;  %v477_v34 = vmul.f32 %v437_v12, %v291_v8  ;;  %v275_v61 = vld [vmem:[%s824_s8 + $0x38] sm:$0xff] }
  0x3f   : > { %v490_v37 = vmul.f32 %v425_v53, %v304_v11  ;;  %v522_v38 = vadd.f32 %v521_v29, %v488_v14  ;;  %v294_v39 = vunpack.c.l.bf16 %v273_v24  ;;  %v377_v40 = vrot.slane %v862_v17, %v827_v21  ;;  %v282_v11 = vld [vmem:[%s824_s8 + $0x70] sm:$0xff] }
  0x40   : > { %v507_v28 = vadd.f32 %v506_v15, %v474_v4  ;;  %v449_v41 = vrot.slane %v369_v18, %v827_v21  ;;  %v307_v42 = vunpack.c.h.bf16 %v279_v16  ;;  %v478_v44 = vmul.f32 %v441_v19, %v292_v9 }
  0x41   : > { %v491_v46 = vmul.f32 %v429_v60, %v305_v20  ;;  %v523_v47 = vadd.f32 %v522_v38, %v489_v26  ;;  %v295_v48 = vunpack.c.h.bf16 %v273_v24  ;;  %v381_v49 = vrot.slane %v862_v17, %v829_v22  ;;  %v283_v26 = vld [vmem:[%s824_s8 + $0x78] sm:$0xff] }
  0x42   : > { %v508_v35 = vadd.f32 %v507_v28, %v475_v13  ;;  %v453_v50 = vrot.slane %v373_v31, %v827_v21  ;;  %v308_v51 = vunpack.c.l.bf16 %v280_v36  ;;  %v479_v52 = vmul.f32 %v445_v32, %v293_v30 }
  0x43   : > { %v492_v55 = vmul.f32 %v433_v3, %v306_v33  ;;  %v524_v56 = vadd.f32 %v523_v47, %v490_v37  ;;  %v296_v57 = vunpack.c.l.bf16 %v274_v43  ;;  %v385_v58 = vrot.slane %v862_v17, %v831_v23  ;;  %v502_v47 = vld [vmem:[#allocation2] sm:$0xff] }
  0x44   : > { %v509_v45 = vadd.f32 %v508_v35, %v476_v25  ;;  %v457_v59 = vrot.slane %v377_v40, %v827_v21  ;;  %v309_v60 = vunpack.c.h.bf16 %v280_v36  ;;  %v480_v62 = vmul.f32 %v449_v41, %v294_v39 }
  0x45   : > { %v493_v22 = vmul.f32 %v437_v12, %v307_v42  ;;  %v525_v0 = vadd.f32 %v524_v56, %v491_v46  ;;  %v297_v1 = vunpack.c.h.bf16 %v274_v43  ;;  %v389_v2 = vrot.slane %v862_v17, %v836_v27 }
  0x46   : > { %v510_v53 = vadd.f32 %v509_v45, %v477_v34  ;;  %v461_v3 = vrot.slane %v381_v49, %v827_v21  ;;  %v310_v4 = vunpack.c.l.bf16 %v281_v54  ;;  %v481_v5 = vmul.f32 %v453_v50, %v295_v48 }
  0x47   : > { %v494_v7 = vmul.f32 %v441_v19, %v308_v51  ;;  %v526_v23 = vadd.f32 %v525_v0, %v492_v55  ;;  %v298_v8 = vunpack.c.l.bf16 %v275_v61  ;;  %v465_v9 = vrot.slane %v385_v58, %v827_v21 }
  0x48   : > { %v511_v63 = vadd.f32 %v510_v53, %v478_v44  ;;  %v482_v10 = vmul.f32 %v457_v59, %v296_v57  ;;  %v311_v12 = vunpack.c.h.bf16 %v281_v54  ;;  %v495_v14 = vmul.f32 %v445_v32, %v309_v60 }
  0x49   : > { %v527_v15 = vadd.f32 %v526_v23, %v493_v22  ;;  %v299_v16 = vunpack.c.h.bf16 %v275_v61  ;;  %v469_v27 = vrot.slane %v389_v2, %v827_v21  ;;  %v483_v17 = vmul.f32 %v461_v3, %v297_v1 }
  0x4a   : > { %v512_v6 = vadd.f32 %v511_v63, %v479_v52  ;;  %v312_v20 = vunpack.c.l.bf16 %v282_v11  ;;  %v496_v24 = vmul.f32 %v449_v41, %v310_v4  ;;  %v484_v19 = vmul.f32 %v465_v9, %v298_v8 }
  0x4b   : > { %v528_v25 = vadd.f32 %v527_v15, %v494_v7  ;;  %v313_v29 = vunpack.c.h.bf16 %v282_v11  ;;  %v497_v30 = vmul.f32 %v453_v50, %v311_v12  ;;  %v485_v33 = vmul.f32 %v469_v27, %v299_v16  ;;  %v503_v50 = vld [vmem:[#allocation2 + $0x8] sm:$0xff] }
  0x4c   : > { %v513_v13 = vadd.f32 %v512_v6, %v480_v62  ;;  %v314_v35 = vunpack.c.l.bf16 %v283_v26  ;;  %v498_v36 = vmul.f32 %v457_v59, %v312_v20  ;;  %v315_v38 = vunpack.c.h.bf16 %v283_v26 }
  0x4d   : > { %v529_v31 = vadd.f32 %v528_v25, %v495_v14  ;;  %v499_v39 = vmul.f32 %v461_v3, %v313_v29  ;;  %v550_v55 = vstv (!%p645_p11), %s549_s9 }
  0x4e   : > { %v514_v18 = vadd.f32 %v513_v13, %v481_v5  ;;  %v500_v42 = vmul.f32 %v465_v9, %v314_v35  ;;  %v501_v41 = vmul.f32 %v469_v27, %v315_v38 }
  0x4f   : > { %v530_v32 = vadd.f32 %v529_v31, %v496_v24 }
  0x50   : > { %v515_v28 = vadd.f32 %v514_v18, %v482_v10 }
  0x51   : > { %v531_v21 = vadd.f32 %v530_v32, %v497_v30 }
  0x52   : > { %v516_v34 = vadd.f32 %v515_v28, %v483_v17 }
  0x53   : > { %v532_v43 = vadd.f32 %v531_v21, %v498_v36 }
  0x54   : > { %v517_v37 = vadd.f32 %v516_v34, %v484_v19 }
  0x55   : > { %v533_v44 = vadd.f32 %v532_v43, %v499_v39 }
  0x56   : > { %v518_v40 = vadd.f32 %v517_v37, %v485_v33 }
  0x57   : > { %v534_v45 = vadd.f32 %v533_v44, %v500_v42 }
  0x58   : > { %519 = vadd.xlane.f32.xlu0 %v518_v40 }
  0x59   : > { %v535_v46 = vadd.f32 %v534_v45, %v501_v41 }
  0x5c   : > { %536 = vadd.xlane.f32.xlu0 %v535_v46 }
  0xe5   : > { %v520_v48 = vpop.xlane.xlu0 %519 }
  0xe6   : > { %v538_v49 = vadd.f32 %v520_v48, %v502_v47  ;;  %546 = sbr.rel (%p645_p11) target bundleno = 247 (0xf7), region = 63 }
  0xe8   : > { %541 = vst.msk [vmem:[#allocation2] sm:$0xff] %vm540_vm1, %v538_v49 }
  0xe9   : > { %v537_v51 = vpop.xlane.xlu0 %536 }
  0xea   : > { %v539_v52 = vadd.f32 %v537_v51, %v503_v50 }
  0xec   : > { %542 = vst.msk [vmem:[#allocation2 + $0x8] sm:$0xff] %vm540_vm1, %v539_v52 }
  0xef   : > { %v547_v53 = vld [vmem:[#allocation2] sm:$0xff] }
  0xf0   : > { %v551_v56 = vadd.f32 %v550_v55, %v547_v53 }
  0xf2   : > { %553 = vst.msk [vmem:[%s918_s3] sm:$0xff] %vm540_vm1, %v551_v56 }
  0xf3   : > { %v548_v54 = vld [vmem:[#allocation2 + $0x8] sm:$0xff] }
  0xf4   : > { %v552_v57 = vadd.f32 %v550_v55, %v548_v54 }
  0xf6   : > { %554 = vst.msk [vmem:[%s918_s3 + $0x8] sm:$0xff] %vm540_vm1, %v552_v57 }
  0xf7 PF: > { %s14_s18 = sadd.s32 1, %s730_s18   ;;  %s919_s14 = smov %s718_s15 }
  0xf8   : > { %p11_p12 = scmp.ge.s32.totalorder %s14_s18, 6   ;;  %s920_s15 = smov %s791_s21 }
  0xf9   : > { %s921_s16 = smov %s726_s17  ;;  %s922_s17 = smov %s924_s2 }
  0xfa   :  { %13 = sbr.rel (!%p11_p12) target bundleno = 5 (0x5), region = 101 }

</bundles_post_ra>
